<compile_context>
chip_gen: v6e
topology: v6e:2x2x1
jax: 0.10.0
libtpu: 0.0.40
codegen_flags: <defaults>
</compile_context>

<pallas_src>
import jax
import jax.numpy as jnp
from jax.experimental import pallas as pl
from jax.experimental.pallas import tpu as pltpu

HIDDEN = 32          # hidden_size (module default is 256; small synthetic size)
NUM_LAYERS = 3
BN_EPS = 1e-5


# ----------------------------------------------------------------------------
# Fused kernel
# ----------------------------------------------------------------------------
def _make_kernel(T, B, H):
    H2, H8 = 2 * H, 8 * H
    f32 = jnp.float32

    def kernel(x_ref,                              # (T*B, D)    bf16, time-major rows
               wf0, wb0, b0, whh0,                 # layer 0: (D,8H),(D,8H),(1,8H),(2H,8H)
               wf1, wb1, b1, whh1,                 # layer 1: (2H,8H),(2H,8H),(1,8H),(2H,8H)
               wf2, wb2, b2, whh2,                 # layer 2
               hw_ref, hbias_ref,                  # folded BN+FC head: (1,2H), (1,1)
               out_ref,                            # (B, 1) f32
               seq_f, seq_b, ga, gb):              # VMEM scratch

        def recurrence(whh_ref):
            """Interleaved fwd/bwd LSTM recurrence over pre-computed input gates.

            ga row-block t : fwd-gate pre-activations from input at time t (+ all biases)
            gb row-block t : bwd-gate pre-activations from input at time t
            Writes h_f(t) -> seq_f[t], h_b(t) -> seq_b[t] (time-indexed).
            """
            whh = whh_ref[...]                     # (2H, 8H) bf16, block-placed per dir
            h = jnp.zeros((B, H2), f32)            # [h_f | h_b]
            c = jnp.zeros((B, H2), f32)            # [c_f | c_b]
            for s in range(T):                     # fully unrolled (T is tiny)
                r = T - 1 - s                      # bwd direction time index
                gx = ga[s * B:(s + 1) * B, :] + gb[r * B:(r + 1) * B, :]
                g = gx + jnp.dot(h.astype(jnp.bfloat16), whh,
                                 preferred_element_type=f32)      # one MXU push/step
                sg = jax.nn.sigmoid(g)             # ONE EUP pass: all gates, both dirs
                i_g = sg[:, 0:H2]
                f_g = sg[:, H2:2 * H2]
                g_g = 2.0 * sg[:, 2 * H2:3 * H2] - 1.0   # tanh via pre-scaled sigmoid
                o_g = sg[:, 3 * H2:4 * H2]
                c = f_g * c + i_g * g_g
                h = o_g * jnp.tanh(c)              # only remaining tanh (2H wide)
                # stream hidden states to VMEM (no unrolled vreg pressure / concat)
                seq_f[s * B:(s + 1) * B, :] = h[:, 0:H]
                seq_b[r * B:(r + 1) * B, :] = h[:, H:H2]

        # ------------------------- layer 0 -----------------------------------
        x16 = x_ref[...]
        ga[...] = jnp.dot(x16, wf0[...], preferred_element_type=f32) + b0[...]
        gb[...] = jnp.dot(x16, wb0[...], preferred_element_type=f32)
        recurrence(whh0)

        # ------------------- layers 1..2 (dropout = identity, eval) ----------
        for wf, wb, bias, whh in ((wf1, wb1, b1, whh1), (wf2, wb2, b2, whh2)):
            sf = seq_f[...].astype(jnp.bfloat16)   # (T*B, H) previous-layer fwd halves
            sb = seq_b[...].astype(jnp.bfloat16)   # (T*B, H) previous-layer bwd halves
            # [sf | sb] @ W  ==  sf @ W[:H] + sb @ W[H:]   (no lane concat ever formed)
            ga[...] = (jnp.dot(sf, wf[0:H, :], preferred_element_type=f32)
                       + jnp.dot(sb, wf[H:H2, :], preferred_element_type=f32)
                       + bias[...])
            gb[...] = (jnp.dot(sf, wb[0:H, :], preferred_element_type=f32)
                       + jnp.dot(sb, wb[H:H2, :], preferred_element_type=f32))
            recurrence(whh)

        # --------- head: eval BatchNorm1d + Linear, pre-folded into hw/hbias --
        hf_last = seq_f[(T - 1) * B:T * B, :]      # h_f at original time T-1
        hb_last = seq_b[(T - 1) * B:T * B, :]      # h_b at original time T-1
        out = (jnp.sum(hf_last * hw_ref[:, 0:H], axis=-1, keepdims=True)
               + jnp.sum(hb_last * hw_ref[:, H:H2], axis=-1, keepdims=True)
               + hbias_ref[...])
        out_ref[...] = out.astype(out_ref.dtype)

    return kernel


# ----------------------------------------------------------------------------
# Forward wrapper
# ----------------------------------------------------------------------------
def bilstm_stock_forward(x_btf, prepped):
    """x_btf: (B, T, D) batch-first (like the PyTorch module). Returns (B, 1)."""
    B, T, D = x_btf.shape
    H = prepped["head_w"].shape[1] // 2
    # time-major rows (row index = t*B + b), bf16 for the MXU / smaller DMA prologue
    x2d = jnp.transpose(x_btf, (1, 0, 2)).reshape(T * B, D).astype(jnp.bfloat16)

    flat = [x2d]
    for wf, wb, bias, whh in prepped["layers"]:
        flat += [wf, wb, bias, whh]
    flat += [prepped["head_w"], prepped["head_b"]]

    vmem = pl.BlockSpec(memory_space=pltpu.MemorySpace.VMEM)
    return pl.pallas_call(
        _make_kernel(T, B, H),
        out_shape=jax.ShapeDtypeStruct((B, 1), jnp.float32),
        in_specs=[vmem] * len(flat),               # everything VMEM-resident, single call
        out_specs=vmem,
        scratch_shapes=[
            pltpu.VMEM((T * B, H), jnp.float32),       # seq_f : per-time fwd hidden
            pltpu.VMEM((T * B, H), jnp.float32),       # seq_b : per-time bwd hidden
            pltpu.VMEM((T * B, 8 * H), jnp.float32),   # ga : fwd-placed input gates + bias
            pltpu.VMEM((T * B, 8 * H), jnp.float32),   # gb : bwd-placed input gates
        ],
        compiler_params=pltpu.CompilerParams(vmem_limit_bytes=32 * 1024 * 1024),
    )(*flat)


# ----------------------------------------------------------------------------
# Parameter initialization (PyTorch-like) and one-time prep (placement/folding)
# ----------------------------------------------------------------------------
def init_params(key, input_size, hidden=HIDDEN, num_layers=NUM_LAYERS):
    k = 1.0 / float(hidden) ** 0.5
    layers = []
    for l in range(num_layers):
        din = input_size if l == 0 else 2 * hidden
        w_ih, w_hh, b_ih, b_hh = [], [], [], []
        for _ in range(2):                         # fwd, bwd
            key, k1, k2, k3, k4 = jax.random.split(key, 5)
            w_ih.append(jax.random.uniform(k1, (4 * hidden, din), jnp.float32, -k, k))
            w_hh.append(jax.random.uniform(k2, (4 * hidden, hidden), jnp.float32, -k, k))
            b_ih.append(jax.random.uniform(k3, (4 * hidden,), jnp.float32, -k, k))
            b_hh.append(jax.random.uniform(k4, (4 * hidden,), jnp.float32, -k, k))
        layers.append({"w_ih": jnp.stack(w_ih), "w_hh": jnp.stack(w_hh),
                       "b_ih": jnp.stack(b_ih), "b_hh": jnp.stack(b_hh)})
    key, kf1, kf2 = jax.random.split(key, 3)
    kf = 1.0 / float(2 * hidden) ** 0.5
    return {
        "lstm": layers,
        "bn": {"gamma": jnp.ones((2 * hidden,), jnp.float32),
               "beta": jnp.zeros((2 * hidden,), jnp.float32),
               "mean": jnp.zeros((2 * hidden,), jnp.float32),    # running stats (eval)
               "var": jnp.ones((2 * hidden,), jnp.float32)},
        "fc": {"w": jax.random.uniform(kf1, (1, 2 * hidden), jnp.float32, -kf, kf),
               "b": jax.random.uniform(kf2, (1,), jnp.float32, -kf, kf)},
    }


def prepare_params(params, hidden=HIDDEN):
    """One-time prep: gate-column placement (interleaved [i_f,i_b,f_f,f_b,g_f,g_b,o_f,o_b]),
    2x scaling of the g-gate (tanh(z) = 2*sigmoid(2z)-1), bf16 cast, and BN+FC fold."""
    H = hidden

    def place_cols(w_t, direction):                # w_t: (din, 4H), PyTorch order i,f,g,o
        din = w_t.shape[0]
        z = jnp.zeros((din, H), w_t.dtype)
        blocks = []
        for gi in range(4):
            col = w_t[:, gi * H:(gi + 1) * H]
            if gi == 2:
                col = col * 2.0                    # fold the 2x of 2*sigmoid(2z)-1
            blocks += ([col, z] if direction == 0 else [z, col])
        return jnp.concatenate(blocks, axis=1)     # (din, 8H)

    def place_bias(b4, direction):                 # b4: (4H,)
        z = jnp.zeros((H,), b4.dtype)
        blocks = []
        for gi in range(4):
            col = b4[gi * H:(gi + 1) * H]
            if gi == 2:
                col = col * 2.0
            blocks += ([col, z] if direction == 0 else [z, col])
        return jnp.concatenate(blocks)             # (8H,)

    layers = []
    for lp in params["lstm"]:
        b = lp["b_ih"] + lp["b_hh"]                # (2, 4H)
        wf = place_cols(lp["w_ih"][0].T, 0).astype(jnp.bfloat16)
        wb = place_cols(lp["w_ih"][1].T, 1).astype(jnp.bfloat16)
        whh = jnp.concatenate([place_cols(lp["w_hh"][0].T, 0),      # rows 0:H  <- h_f
                               place_cols(lp["w_hh"][1].T, 1)],     # rows H:2H <- h_b
                              axis=0).astype(jnp.bfloat16)          # (2H, 8H)
        bias = (place_bias(b[0], 0) + place_bias(b[1], 1)).reshape(1, 8 * H)
        layers.append((wf, wb, bias, whh))

    bn, fc = params["bn"], params["fc"]
    s = jax.lax.rsqrt(bn["var"] + BN_EPS)          # (2H,)
    head_w = (fc["w"][0] * bn["gamma"] * s).reshape(1, 2 * H)
    head_b = (fc["b"][0]
              + jnp.sum((bn["beta"] - bn["mean"] * bn["gamma"] * s) * fc["w"][0])
              ).reshape(1, 1)
    return {"layers": layers, "head_w": head_w, "head_b": head_b}


if __name__ == "__main__":
    B, T, D = 8, 8, 8          # batch, seq_len, input_size (features)
    key = jax.random.PRNGKey(0)
    kx, kp = jax.random.split(key)
    x = jax.random.normal(kx, (B, T, D), jnp.float32)
    params = init_params(kp, D)
    prepped = prepare_params(params)

    out = jax.jit(bilstm_stock_forward)(x, prepped)
    out = jax.block_until_ready(out)
    assert out.shape == (B, 1) and out.dtype == jnp.float32
    print("KERNEL_OK")
</pallas_src>

<mosaic_0001>
module attributes {stable_mosaic.version = 11 : i64} {
  func.func @kernel(%arg0: memref<64x8xbf16, #tpu.memory_space<vmem>>, %arg1: memref<8x256xbf16, #tpu.memory_space<vmem>>, %arg2: memref<8x256xbf16, #tpu.memory_space<vmem>>, %arg3: memref<1x256xf32, #tpu.memory_space<vmem>>, %arg4: memref<64x256xbf16, #tpu.memory_space<vmem>>, %arg5: memref<64x256xbf16, #tpu.memory_space<vmem>>, %arg6: memref<64x256xbf16, #tpu.memory_space<vmem>>, %arg7: memref<1x256xf32, #tpu.memory_space<vmem>>, %arg8: memref<64x256xbf16, #tpu.memory_space<vmem>>, %arg9: memref<64x256xbf16, #tpu.memory_space<vmem>>, %arg10: memref<64x256xbf16, #tpu.memory_space<vmem>>, %arg11: memref<1x256xf32, #tpu.memory_space<vmem>>, %arg12: memref<64x256xbf16, #tpu.memory_space<vmem>>, %arg13: memref<1x64xf32, #tpu.memory_space<vmem>>, %arg14: memref<1x1xf32, #tpu.memory_space<vmem>>, %arg15: memref<8x1xf32, #tpu.memory_space<vmem>>, %arg16: memref<64x32xf32, #tpu.memory_space<vmem>>, %arg17: memref<64x32xf32, #tpu.memory_space<vmem>>, %arg18: memref<64x256xf32, #tpu.memory_space<vmem>>, %arg19: memref<64x256xf32, #tpu.memory_space<vmem>>) attributes {dimension_semantics = [], scalar_prefetch = 0 : i64, scratch_operands = 4 : i64, tpu.core_type = #tpu.core_type<tc>} {
    %c0 = arith.constant 0 : index
    %c0_0 = arith.constant 0 : index
    %0 = vector.load %arg0[%c0, %c0_0] : memref<64x8xbf16, #tpu.memory_space<vmem>>, vector<64x8xbf16>
    %c0_1 = arith.constant 0 : index
    %c0_2 = arith.constant 0 : index
    %1 = vector.load %arg1[%c0_1, %c0_2] : memref<8x256xbf16, #tpu.memory_space<vmem>>, vector<8x256xbf16>
    %cst = arith.constant dense<0.000000e+00> : vector<64x256xf32>
    %2 = tpu.matmul %0, %1, %cst {dimension_numbers = #tpu.dot_dimension_numbers<[1], [0], [0], [1], [0, 0, 1, 1], [], []>} : vector<64x8xbf16>, vector<8x256xbf16>, vector<64x256xf32> -> vector<64x256xf32>
    %c0_3 = arith.constant 0 : index
    %c0_4 = arith.constant 0 : index
    %3 = vector.load %arg3[%c0_3, %c0_4] : memref<1x256xf32, #tpu.memory_space<vmem>>, vector<1x256xf32>
    %4 = vector.broadcast %3 : vector<1x256xf32> to vector<64x256xf32>
    %5 = arith.addf %2, %4 : vector<64x256xf32>
    %c0_5 = arith.constant 0 : index
    %c0_6 = arith.constant 0 : index
    %6 = vector.load %arg18[%c0_5, %c0_6] : memref<64x256xf32, #tpu.memory_space<vmem>>, vector<64x256xf32>
    tpu.vector_store %arg18[%c0_5, %c0_6], %5 {strides = array<i32>} : memref<64x256xf32, #tpu.memory_space<vmem>>, vector<64x256xf32>,
    %c0_7 = arith.constant 0 : index
    %c0_8 = arith.constant 0 : index
    %7 = vector.load %arg2[%c0_7, %c0_8] : memref<8x256xbf16, #tpu.memory_space<vmem>>, vector<8x256xbf16>
    %cst_9 = arith.constant dense<0.000000e+00> : vector<64x256xf32>
    %8 = tpu.matmul %0, %7, %cst_9 {dimension_numbers = #tpu.dot_dimension_numbers<[1], [0], [0], [1], [0, 0, 1, 1], [], []>} : vector<64x8xbf16>, vector<8x256xbf16>, vector<64x256xf32> -> vector<64x256xf32>
    %c0_10 = arith.constant 0 : index
    %c0_11 = arith.constant 0 : index
    %9 = vector.load %arg19[%c0_10, %c0_11] : memref<64x256xf32, #tpu.memory_space<vmem>>, vector<64x256xf32>
    tpu.vector_store %arg19[%c0_10, %c0_11], %8 {strides = array<i32>} : memref<64x256xf32, #tpu.memory_space<vmem>>, vector<64x256xf32>,
    %c0_12 = arith.constant 0 : index
    %c0_13 = arith.constant 0 : index
    %10 = vector.load %arg4[%c0_12, %c0_13] : memref<64x256xbf16, #tpu.memory_space<vmem>>, vector<64x256xbf16>
    %cst_14 = arith.constant 0.000000e+00 : f32
    %11 = vector.broadcast %cst_14 : f32 to vector<8x64xf32>
    %cst_15 = arith.constant 0.000000e+00 : f32
    %12 = vector.broadcast %cst_15 : f32 to vector<8x64xf32>
    %c0_16 = arith.constant 0 : index
    %c0_17 = arith.constant 0 : index
    %13 = vector.load %arg18[%c0_16, %c0_17] : memref<64x256xf32, #tpu.memory_space<vmem>>, vector<8x256xf32>
    %c56 = arith.constant 56 : index
    %c0_18 = arith.constant 0 : index
    %14 = vector.load %arg19[%c56, %c0_18] : memref<64x256xf32, #tpu.memory_space<vmem>>, vector<8x256xf32>
    %15 = arith.addf %13, %14 : vector<8x256xf32>
    %16 = arith.truncf %11 : vector<8x64xf32> to vector<8x64xbf16>
    %cst_19 = arith.constant dense<0.000000e+00> : vector<8x256xf32>
    %17 = tpu.matmul %16, %10, %cst_19 {dimension_numbers = #tpu.dot_dimension_numbers<[1], [0], [0], [1], [0, 0, 1, 1], [], []>} : vector<8x64xbf16>, vector<64x256xbf16>, vector<8x256xf32> -> vector<8x256xf32>
    %18 = arith.addf %15, %17 : vector<8x256xf32>
    %19 = arith.negf %18 : vector<8x256xf32>
    %20 = math.exp %19 : vector<8x256xf32>
    %cst_20 = arith.constant 1.000000e+00 : f32
    %21 = vector.broadcast %cst_20 : f32 to vector<8x256xf32>
    %22 = arith.addf %21, %20 : vector<8x256xf32>
    %23 = arith.divf %21, %22 : vector<8x256xf32>
    %24 = vector.extract_strided_slice %23 {offsets = [0, 0], sizes = [8, 64], strides = [1, 1]} : vector<8x256xf32> to vector<8x64xf32>
    %25 = vector.extract_strided_slice %23 {offsets = [0, 64], sizes = [8, 64], strides = [1, 1]} : vector<8x256xf32> to vector<8x64xf32>
    %26 = vector.extract_strided_slice %23 {offsets = [0, 128], sizes = [8, 64], strides = [1, 1]} : vector<8x256xf32> to vector<8x64xf32>
    %cst_21 = arith.constant 2.000000e+00 : f32
    %27 = vector.broadcast %cst_21 : f32 to vector<8x64xf32>
    %28 = arith.mulf %27, %26 : vector<8x64xf32>
    %cst_22 = arith.constant 1.000000e+00 : f32
    %29 = vector.broadcast %cst_22 : f32 to vector<8x64xf32>
    %30 = arith.subf %28, %29 : vector<8x64xf32>
    %31 = vector.extract_strided_slice %23 {offsets = [0, 192], sizes = [8, 64], strides = [1, 1]} : vector<8x256xf32> to vector<8x64xf32>
    %32 = arith.mulf %25, %12 : vector<8x64xf32>
    %33 = arith.mulf %24, %30 : vector<8x64xf32>
    %34 = arith.addf %32, %33 : vector<8x64xf32>
    %35 = math.tanh %34 : vector<8x64xf32>
    %36 = arith.mulf %31, %35 : vector<8x64xf32>
    %37 = vector.extract_strided_slice %36 {offsets = [0, 0], sizes = [8, 32], strides = [1, 1]} : vector<8x64xf32> to vector<8x32xf32>
    %c0_23 = arith.constant 0 : index
    %c0_24 = arith.constant 0 : index
    %38 = vector.load %arg16[%c0_23, %c0_24] : memref<64x32xf32, #tpu.memory_space<vmem>>, vector<8x32xf32>
    tpu.vector_store %arg16[%c0_23, %c0_24], %37 {strides = array<i32>} : memref<64x32xf32, #tpu.memory_space<vmem>>, vector<8x32xf32>,
    %39 = vector.extract_strided_slice %36 {offsets = [0, 32], sizes = [8, 32], strides = [1, 1]} : vector<8x64xf32> to vector<8x32xf32>
    %c56_25 = arith.constant 56 : index
    %c0_26 = arith.constant 0 : index
    %40 = vector.load %arg17[%c56_25, %c0_26] : memref<64x32xf32, #tpu.memory_space<vmem>>, vector<8x32xf32>
    tpu.vector_store %arg17[%c56_25, %c0_26], %39 {strides = array<i32>} : memref<64x32xf32, #tpu.memory_space<vmem>>, vector<8x32xf32>,
    %c8 = arith.constant 8 : index
    %c0_27 = arith.constant 0 : index
    %41 = vector.load %arg18[%c8, %c0_27] : memref<64x256xf32, #tpu.memory_space<vmem>>, vector<8x256xf32>
    %c48 = arith.constant 48 : index
    %c0_28 = arith.constant 0 : index
    %42 = vector.load %arg19[%c48, %c0_28] : memref<64x256xf32, #tpu.memory_space<vmem>>, vector<8x256xf32>
    %43 = arith.addf %41, %42 : vector<8x256xf32>
    %44 = arith.truncf %36 : vector<8x64xf32> to vector<8x64xbf16>
    %cst_29 = arith.constant dense<0.000000e+00> : vector<8x256xf32>
    %45 = tpu.matmul %44, %10, %cst_29 {dimension_numbers = #tpu.dot_dimension_numbers<[1], [0], [0], [1], [0, 0, 1, 1], [], []>} : vector<8x64xbf16>, vector<64x256xbf16>, vector<8x256xf32> -> vector<8x256xf32>
    %46 = arith.addf %43, %45 : vector<8x256xf32>
    %47 = arith.negf %46 : vector<8x256xf32>
    %48 = math.exp %47 : vector<8x256xf32>
    %cst_30 = arith.constant 1.000000e+00 : f32
    %49 = vector.broadcast %cst_30 : f32 to vector<8x256xf32>
    %50 = arith.addf %49, %48 : vector<8x256xf32>
    %51 = arith.divf %49, %50 : vector<8x256xf32>
    %52 = vector.extract_strided_slice %51 {offsets = [0, 0], sizes = [8, 64], strides = [1, 1]} : vector<8x256xf32> to vector<8x64xf32>
    %53 = vector.extract_strided_slice %51 {offsets = [0, 64], sizes = [8, 64], strides = [1, 1]} : vector<8x256xf32> to vector<8x64xf32>
    %54 = vector.extract_strided_slice %51 {offsets = [0, 128], sizes = [8, 64], strides = [1, 1]} : vector<8x256xf32> to vector<8x64xf32>
    %cst_31 = arith.constant 2.000000e+00 : f32
    %55 = vector.broadcast %cst_31 : f32 to vector<8x64xf32>
    %56 = arith.mulf %55, %54 : vector<8x64xf32>
    %cst_32 = arith.constant 1.000000e+00 : f32
    %57 = vector.broadcast %cst_32 : f32 to vector<8x64xf32>
    %58 = arith.subf %56, %57 : vector<8x64xf32>
    %59 = vector.extract_strided_slice %51 {offsets = [0, 192], sizes = [8, 64], strides = [1, 1]} : vector<8x256xf32> to vector<8x64xf32>
    %60 = arith.mulf %53, %34 : vector<8x64xf32>
    %61 = arith.mulf %52, %58 : vector<8x64xf32>
    %62 = arith.addf %60, %61 : vector<8x64xf32>
    %63 = math.tanh %62 : vector<8x64xf32>
    %64 = arith.mulf %59, %63 : vector<8x64xf32>
    %65 = vector.extract_strided_slice %64 {offsets = [0, 0], sizes = [8, 32], strides = [1, 1]} : vector<8x64xf32> to vector<8x32xf32>
    %c8_33 = arith.constant 8 : index
    %c0_34 = arith.constant 0 : index
    %66 = vector.load %arg16[%c8_33, %c0_34] : memref<64x32xf32, #tpu.memory_space<vmem>>, vector<8x32xf32>
    tpu.vector_store %arg16[%c8_33, %c0_34], %65 {strides = array<i32>} : memref<64x32xf32, #tpu.memory_space<vmem>>, vector<8x32xf32>,
    %67 = vector.extract_strided_slice %64 {offsets = [0, 32], sizes = [8, 32], strides = [1, 1]} : vector<8x64xf32> to vector<8x32xf32>
    %c48_35 = arith.constant 48 : index
    %c0_36 = arith.constant 0 : index
    %68 = vector.load %arg17[%c48_35, %c0_36] : memref<64x32xf32, #tpu.memory_space<vmem>>, vector<8x32xf32>
    tpu.vector_store %arg17[%c48_35, %c0_36], %67 {strides = array<i32>} : memref<64x32xf32, #tpu.memory_space<vmem>>, vector<8x32xf32>,
    %c16 = arith.constant 16 : index
    %c0_37 = arith.constant 0 : index
    %69 = vector.load %arg18[%c16, %c0_37] : memref<64x256xf32, #tpu.memory_space<vmem>>, vector<8x256xf32>
    %c40 = arith.constant 40 : index
    %c0_38 = arith.constant 0 : index
    %70 = vector.load %arg19[%c40, %c0_38] : memref<64x256xf32, #tpu.memory_space<vmem>>, vector<8x256xf32>
    %71 = arith.addf %69, %70 : vector<8x256xf32>
    %72 = arith.truncf %64 : vector<8x64xf32> to vector<8x64xbf16>
    %cst_39 = arith.constant dense<0.000000e+00> : vector<8x256xf32>
    %73 = tpu.matmul %72, %10, %cst_39 {dimension_numbers = #tpu.dot_dimension_numbers<[1], [0], [0], [1], [0, 0, 1, 1], [], []>} : vector<8x64xbf16>, vector<64x256xbf16>, vector<8x256xf32> -> vector<8x256xf32>
    %74 = arith.addf %71, %73 : vector<8x256xf32>
    %75 = arith.negf %74 : vector<8x256xf32>
    %76 = math.exp %75 : vector<8x256xf32>
    %cst_40 = arith.constant 1.000000e+00 : f32
    %77 = vector.broadcast %cst_40 : f32 to vector<8x256xf32>
    %78 = arith.addf %77, %76 : vector<8x256xf32>
    %79 = arith.divf %77, %78 : vector<8x256xf32>
    %80 = vector.extract_strided_slice %79 {offsets = [0, 0], sizes = [8, 64], strides = [1, 1]} : vector<8x256xf32> to vector<8x64xf32>
    %81 = vector.extract_strided_slice %79 {offsets = [0, 64], sizes = [8, 64], strides = [1, 1]} : vector<8x256xf32> to vector<8x64xf32>
    %82 = vector.extract_strided_slice %79 {offsets = [0, 128], sizes = [8, 64], strides = [1, 1]} : vector<8x256xf32> to vector<8x64xf32>
    %cst_41 = arith.constant 2.000000e+00 : f32
    %83 = vector.broadcast %cst_41 : f32 to vector<8x64xf32>
    %84 = arith.mulf %83, %82 : vector<8x64xf32>
    %cst_42 = arith.constant 1.000000e+00 : f32
    %85 = vector.broadcast %cst_42 : f32 to vector<8x64xf32>
    %86 = arith.subf %84, %85 : vector<8x64xf32>
    %87 = vector.extract_strided_slice %79 {offsets = [0, 192], sizes = [8, 64], strides = [1, 1]} : vector<8x256xf32> to vector<8x64xf32>
    %88 = arith.mulf %81, %62 : vector<8x64xf32>
    %89 = arith.mulf %80, %86 : vector<8x64xf32>
    %90 = arith.addf %88, %89 : vector<8x64xf32>
    %91 = math.tanh %90 : vector<8x64xf32>
    %92 = arith.mulf %87, %91 : vector<8x64xf32>
    %93 = vector.extract_strided_slice %92 {offsets = [0, 0], sizes = [8, 32], strides = [1, 1]} : vector<8x64xf32> to vector<8x32xf32>
    %c16_43 = arith.constant 16 : index
    %c0_44 = arith.constant 0 : index
    %94 = vector.load %arg16[%c16_43, %c0_44] : memref<64x32xf32, #tpu.memory_space<vmem>>, vector<8x32xf32>
    tpu.vector_store %arg16[%c16_43, %c0_44], %93 {strides = array<i32>} : memref<64x32xf32, #tpu.memory_space<vmem>>, vector<8x32xf32>,
    %95 = vector.extract_strided_slice %92 {offsets = [0, 32], sizes = [8, 32], strides = [1, 1]} : vector<8x64xf32> to vector<8x32xf32>
    %c40_45 = arith.constant 40 : index
    %c0_46 = arith.constant 0 : index
    %96 = vector.load %arg17[%c40_45, %c0_46] : memref<64x32xf32, #tpu.memory_space<vmem>>, vector<8x32xf32>
    tpu.vector_store %arg17[%c40_45, %c0_46], %95 {strides = array<i32>} : memref<64x32xf32, #tpu.memory_space<vmem>>, vector<8x32xf32>,
    %c24 = arith.constant 24 : index
    %c0_47 = arith.constant 0 : index
    %97 = vector.load %arg18[%c24, %c0_47] : memref<64x256xf32, #tpu.memory_space<vmem>>, vector<8x256xf32>
    %c32 = arith.constant 32 : index
    %c0_48 = arith.constant 0 : index
    %98 = vector.load %arg19[%c32, %c0_48] : memref<64x256xf32, #tpu.memory_space<vmem>>, vector<8x256xf32>
    %99 = arith.addf %97, %98 : vector<8x256xf32>
    %100 = arith.truncf %92 : vector<8x64xf32> to vector<8x64xbf16>
    %cst_49 = arith.constant dense<0.000000e+00> : vector<8x256xf32>
    %101 = tpu.matmul %100, %10, %cst_49 {dimension_numbers = #tpu.dot_dimension_numbers<[1], [0], [0], [1], [0, 0, 1, 1], [], []>} : vector<8x64xbf16>, vector<64x256xbf16>, vector<8x256xf32> -> vector<8x256xf32>
    %102 = arith.addf %99, %101 : vector<8x256xf32>
    %103 = arith.negf %102 : vector<8x256xf32>
    %104 = math.exp %103 : vector<8x256xf32>
    %cst_50 = arith.constant 1.000000e+00 : f32
    %105 = vector.broadcast %cst_50 : f32 to vector<8x256xf32>
    %106 = arith.addf %105, %104 : vector<8x256xf32>
    %107 = arith.divf %105, %106 : vector<8x256xf32>
    %108 = vector.extract_strided_slice %107 {offsets = [0, 0], sizes = [8, 64], strides = [1, 1]} : vector<8x256xf32> to vector<8x64xf32>
    %109 = vector.extract_strided_slice %107 {offsets = [0, 64], sizes = [8, 64], strides = [1, 1]} : vector<8x256xf32> to vector<8x64xf32>
    %110 = vector.extract_strided_slice %107 {offsets = [0, 128], sizes = [8, 64], strides = [1, 1]} : vector<8x256xf32> to vector<8x64xf32>
    %cst_51 = arith.constant 2.000000e+00 : f32
    %111 = vector.broadcast %cst_51 : f32 to vector<8x64xf32>
    %112 = arith.mulf %111, %110 : vector<8x64xf32>
    %cst_52 = arith.constant 1.000000e+00 : f32
    %113 = vector.broadcast %cst_52 : f32 to vector<8x64xf32>
    %114 = arith.subf %112, %113 : vector<8x64xf32>
    %115 = vector.extract_strided_slice %107 {offsets = [0, 192], sizes = [8, 64], strides = [1, 1]} : vector<8x256xf32> to vector<8x64xf32>
    %116 = arith.mulf %109, %90 : vector<8x64xf32>
    %117 = arith.mulf %108, %114 : vector<8x64xf32>
    %118 = arith.addf %116, %117 : vector<8x64xf32>
    %119 = math.tanh %118 : vector<8x64xf32>
    %120 = arith.mulf %115, %119 : vector<8x64xf32>
    %121 = vector.extract_strided_slice %120 {offsets = [0, 0], sizes = [8, 32], strides = [1, 1]} : vector<8x64xf32> to vector<8x32xf32>
    %c24_53 = arith.constant 24 : index
    %c0_54 = arith.constant 0 : index
    %122 = vector.load %arg16[%c24_53, %c0_54] : memref<64x32xf32, #tpu.memory_space<vmem>>, vector<8x32xf32>
    tpu.vector_store %arg16[%c24_53, %c0_54], %121 {strides = array<i32>} : memref<64x32xf32, #tpu.memory_space<vmem>>, vector<8x32xf32>,
    %123 = vector.extract_strided_slice %120 {offsets = [0, 32], sizes = [8, 32], strides = [1, 1]} : vector<8x64xf32> to vector<8x32xf32>
    %c32_55 = arith.constant 32 : index
    %c0_56 = arith.constant 0 : index
    %124 = vector.load %arg17[%c32_55, %c0_56] : memref<64x32xf32, #tpu.memory_space<vmem>>, vector<8x32xf32>
    tpu.vector_store %arg17[%c32_55, %c0_56], %123 {strides = array<i32>} : memref<64x32xf32, #tpu.memory_space<vmem>>, vector<8x32xf32>,
    %c32_57 = arith.constant 32 : index
    %c0_58 = arith.constant 0 : index
    %125 = vector.load %arg18[%c32_57, %c0_58] : memref<64x256xf32, #tpu.memory_space<vmem>>, vector<8x256xf32>
    %c24_59 = arith.constant 24 : index
    %c0_60 = arith.constant 0 : index
    %126 = vector.load %arg19[%c24_59, %c0_60] : memref<64x256xf32, #tpu.memory_space<vmem>>, vector<8x256xf32>
    %127 = arith.addf %125, %126 : vector<8x256xf32>
    %128 = arith.truncf %120 : vector<8x64xf32> to vector<8x64xbf16>
    %cst_61 = arith.constant dense<0.000000e+00> : vector<8x256xf32>
    %129 = tpu.matmul %128, %10, %cst_61 {dimension_numbers = #tpu.dot_dimension_numbers<[1], [0], [0], [1], [0, 0, 1, 1], [], []>} : vector<8x64xbf16>, vector<64x256xbf16>, vector<8x256xf32> -> vector<8x256xf32>
    %130 = arith.addf %127, %129 : vector<8x256xf32>
    %131 = arith.negf %130 : vector<8x256xf32>
    %132 = math.exp %131 : vector<8x256xf32>
    %cst_62 = arith.constant 1.000000e+00 : f32
    %133 = vector.broadcast %cst_62 : f32 to vector<8x256xf32>
    %134 = arith.addf %133, %132 : vector<8x256xf32>
    %135 = arith.divf %133, %134 : vector<8x256xf32>
    %136 = vector.extract_strided_slice %135 {offsets = [0, 0], sizes = [8, 64], strides = [1, 1]} : vector<8x256xf32> to vector<8x64xf32>
    %137 = vector.extract_strided_slice %135 {offsets = [0, 64], sizes = [8, 64], strides = [1, 1]} : vector<8x256xf32> to vector<8x64xf32>
    %138 = vector.extract_strided_slice %135 {offsets = [0, 128], sizes = [8, 64], strides = [1, 1]} : vector<8x256xf32> to vector<8x64xf32>
    %cst_63 = arith.constant 2.000000e+00 : f32
    %139 = vector.broadcast %cst_63 : f32 to vector<8x64xf32>
    %140 = arith.mulf %139, %138 : vector<8x64xf32>
    %cst_64 = arith.constant 1.000000e+00 : f32
    %141 = vector.broadcast %cst_64 : f32 to vector<8x64xf32>
    %142 = arith.subf %140, %141 : vector<8x64xf32>
    %143 = vector.extract_strided_slice %135 {offsets = [0, 192], sizes = [8, 64], strides = [1, 1]} : vector<8x256xf32> to vector<8x64xf32>
    %144 = arith.mulf %137, %118 : vector<8x64xf32>
    %145 = arith.mulf %136, %142 : vector<8x64xf32>
    %146 = arith.addf %144, %145 : vector<8x64xf32>
    %147 = math.tanh %146 : vector<8x64xf32>
    %148 = arith.mulf %143, %147 : vector<8x64xf32>
    %149 = vector.extract_strided_slice %148 {offsets = [0, 0], sizes = [8, 32], strides = [1, 1]} : vector<8x64xf32> to vector<8x32xf32>
    %c32_65 = arith.constant 32 : index
    %c0_66 = arith.constant 0 : index
    %150 = vector.load %arg16[%c32_65, %c0_66] : memref<64x32xf32, #tpu.memory_space<vmem>>, vector<8x32xf32>
    tpu.vector_store %arg16[%c32_65, %c0_66], %149 {strides = array<i32>} : memref<64x32xf32, #tpu.memory_space<vmem>>, vector<8x32xf32>,
    %151 = vector.extract_strided_slice %148 {offsets = [0, 32], sizes = [8, 32], strides = [1, 1]} : vector<8x64xf32> to vector<8x32xf32>
    %c24_67 = arith.constant 24 : index
    %c0_68 = arith.constant 0 : index
    %152 = vector.load %arg17[%c24_67, %c0_68] : memref<64x32xf32, #tpu.memory_space<vmem>>, vector<8x32xf32>
    tpu.vector_store %arg17[%c24_67, %c0_68], %151 {strides = array<i32>} : memref<64x32xf32, #tpu.memory_space<vmem>>, vector<8x32xf32>,
    %c40_69 = arith.constant 40 : index
    %c0_70 = arith.constant 0 : index
    %153 = vector.load %arg18[%c40_69, %c0_70] : memref<64x256xf32, #tpu.memory_space<vmem>>, vector<8x256xf32>
    %c16_71 = arith.constant 16 : index
    %c0_72 = arith.constant 0 : index
    %154 = vector.load %arg19[%c16_71, %c0_72] : memref<64x256xf32, #tpu.memory_space<vmem>>, vector<8x256xf32>
    %155 = arith.addf %153, %154 : vector<8x256xf32>
    %156 = arith.truncf %148 : vector<8x64xf32> to vector<8x64xbf16>
    %cst_73 = arith.constant dense<0.000000e+00> : vector<8x256xf32>
    %157 = tpu.matmul %156, %10, %cst_73 {dimension_numbers = #tpu.dot_dimension_numbers<[1], [0], [0], [1], [0, 0, 1, 1], [], []>} : vector<8x64xbf16>, vector<64x256xbf16>, vector<8x256xf32> -> vector<8x256xf32>
    %158 = arith.addf %155, %157 : vector<8x256xf32>
    %159 = arith.negf %158 : vector<8x256xf32>
    %160 = math.exp %159 : vector<8x256xf32>
    %cst_74 = arith.constant 1.000000e+00 : f32
    %161 = vector.broadcast %cst_74 : f32 to vector<8x256xf32>
    %162 = arith.addf %161, %160 : vector<8x256xf32>
    %163 = arith.divf %161, %162 : vector<8x256xf32>
    %164 = vector.extract_strided_slice %163 {offsets = [0, 0], sizes = [8, 64], strides = [1, 1]} : vector<8x256xf32> to vector<8x64xf32>
    %165 = vector.extract_strided_slice %163 {offsets = [0, 64], sizes = [8, 64], strides = [1, 1]} : vector<8x256xf32> to vector<8x64xf32>
    %166 = vector.extract_strided_slice %163 {offsets = [0, 128], sizes = [8, 64], strides = [1, 1]} : vector<8x256xf32> to vector<8x64xf32>
    %cst_75 = arith.constant 2.000000e+00 : f32
    %167 = vector.broadcast %cst_75 : f32 to vector<8x64xf32>
    %168 = arith.mulf %167, %166 : vector<8x64xf32>
    %cst_76 = arith.constant 1.000000e+00 : f32
    %169 = vector.broadcast %cst_76 : f32 to vector<8x64xf32>
    %170 = arith.subf %168, %169 : vector<8x64xf32>
    %171 = vector.extract_strided_slice %163 {offsets = [0, 192], sizes = [8, 64], strides = [1, 1]} : vector<8x256xf32> to vector<8x64xf32>
    %172 = arith.mulf %165, %146 : vector<8x64xf32>
    %173 = arith.mulf %164, %170 : vector<8x64xf32>
    %174 = arith.addf %172, %173 : vector<8x64xf32>
    %175 = math.tanh %174 : vector<8x64xf32>
    %176 = arith.mulf %171, %175 : vector<8x64xf32>
    %177 = vector.extract_strided_slice %176 {offsets = [0, 0], sizes = [8, 32], strides = [1, 1]} : vector<8x64xf32> to vector<8x32xf32>
    %c40_77 = arith.constant 40 : index
    %c0_78 = arith.constant 0 : index
    %178 = vector.load %arg16[%c40_77, %c0_78] : memref<64x32xf32, #tpu.memory_space<vmem>>, vector<8x32xf32>
    tpu.vector_store %arg16[%c40_77, %c0_78], %177 {strides = array<i32>} : memref<64x32xf32, #tpu.memory_space<vmem>>, vector<8x32xf32>,
    %179 = vector.extract_strided_slice %176 {offsets = [0, 32], sizes = [8, 32], strides = [1, 1]} : vector<8x64xf32> to vector<8x32xf32>
    %c16_79 = arith.constant 16 : index
    %c0_80 = arith.constant 0 : index
    %180 = vector.load %arg17[%c16_79, %c0_80] : memref<64x32xf32, #tpu.memory_space<vmem>>, vector<8x32xf32>
    tpu.vector_store %arg17[%c16_79, %c0_80], %179 {strides = array<i32>} : memref<64x32xf32, #tpu.memory_space<vmem>>, vector<8x32xf32>,
    %c48_81 = arith.constant 48 : index
    %c0_82 = arith.constant 0 : index
    %181 = vector.load %arg18[%c48_81, %c0_82] : memref<64x256xf32, #tpu.memory_space<vmem>>, vector<8x256xf32>
    %c8_83 = arith.constant 8 : index
    %c0_84 = arith.constant 0 : index
    %182 = vector.load %arg19[%c8_83, %c0_84] : memref<64x256xf32, #tpu.memory_space<vmem>>, vector<8x256xf32>
    %183 = arith.addf %181, %182 : vector<8x256xf32>
    %184 = arith.truncf %176 : vector<8x64xf32> to vector<8x64xbf16>
    %cst_85 = arith.constant dense<0.000000e+00> : vector<8x256xf32>
    %185 = tpu.matmul %184, %10, %cst_85 {dimension_numbers = #tpu.dot_dimension_numbers<[1], [0], [0], [1], [0, 0, 1, 1], [], []>} : vector<8x64xbf16>, vector<64x256xbf16>, vector<8x256xf32> -> vector<8x256xf32>
    %186 = arith.addf %183, %185 : vector<8x256xf32>
    %187 = arith.negf %186 : vector<8x256xf32>
    %188 = math.exp %187 : vector<8x256xf32>
    %cst_86 = arith.constant 1.000000e+00 : f32
    %189 = vector.broadcast %cst_86 : f32 to vector<8x256xf32>
    %190 = arith.addf %189, %188 : vector<8x256xf32>
    %191 = arith.divf %189, %190 : vector<8x256xf32>
    %192 = vector.extract_strided_slice %191 {offsets = [0, 0], sizes = [8, 64], strides = [1, 1]} : vector<8x256xf32> to vector<8x64xf32>
    %193 = vector.extract_strided_slice %191 {offsets = [0, 64], sizes = [8, 64], strides = [1, 1]} : vector<8x256xf32> to vector<8x64xf32>
    %194 = vector.extract_strided_slice %191 {offsets = [0, 128], sizes = [8, 64], strides = [1, 1]} : vector<8x256xf32> to vector<8x64xf32>
    %cst_87 = arith.constant 2.000000e+00 : f32
    %195 = vector.broadcast %cst_87 : f32 to vector<8x64xf32>
    %196 = arith.mulf %195, %194 : vector<8x64xf32>
    %cst_88 = arith.constant 1.000000e+00 : f32
    %197 = vector.broadcast %cst_88 : f32 to vector<8x64xf32>
    %198 = arith.subf %196, %197 : vector<8x64xf32>
    %199 = vector.extract_strided_slice %191 {offsets = [0, 192], sizes = [8, 64], strides = [1, 1]} : vector<8x256xf32> to vector<8x64xf32>
    %200 = arith.mulf %193, %174 : vector<8x64xf32>
    %201 = arith.mulf %192, %198 : vector<8x64xf32>
    %202 = arith.addf %200, %201 : vector<8x64xf32>
    %203 = math.tanh %202 : vector<8x64xf32>
    %204 = arith.mulf %199, %203 : vector<8x64xf32>
    %205 = vector.extract_strided_slice %204 {offsets = [0, 0], sizes = [8, 32], strides = [1, 1]} : vector<8x64xf32> to vector<8x32xf32>
    %c48_89 = arith.constant 48 : index
    %c0_90 = arith.constant 0 : index
    %206 = vector.load %arg16[%c48_89, %c0_90] : memref<64x32xf32, #tpu.memory_space<vmem>>, vector<8x32xf32>
    tpu.vector_store %arg16[%c48_89, %c0_90], %205 {strides = array<i32>} : memref<64x32xf32, #tpu.memory_space<vmem>>, vector<8x32xf32>,
    %207 = vector.extract_strided_slice %204 {offsets = [0, 32], sizes = [8, 32], strides = [1, 1]} : vector<8x64xf32> to vector<8x32xf32>
    %c8_91 = arith.constant 8 : index
    %c0_92 = arith.constant 0 : index
    %208 = vector.load %arg17[%c8_91, %c0_92] : memref<64x32xf32, #tpu.memory_space<vmem>>, vector<8x32xf32>
    tpu.vector_store %arg17[%c8_91, %c0_92], %207 {strides = array<i32>} : memref<64x32xf32, #tpu.memory_space<vmem>>, vector<8x32xf32>,
    %c56_93 = arith.constant 56 : index
    %c0_94 = arith.constant 0 : index
    %209 = vector.load %arg18[%c56_93, %c0_94] : memref<64x256xf32, #tpu.memory_space<vmem>>, vector<8x256xf32>
    %c0_95 = arith.constant 0 : index
    %c0_96 = arith.constant 0 : index
    %210 = vector.load %arg19[%c0_95, %c0_96] : memref<64x256xf32, #tpu.memory_space<vmem>>, vector<8x256xf32>
    %211 = arith.addf %209, %210 : vector<8x256xf32>
    %212 = arith.truncf %204 : vector<8x64xf32> to vector<8x64xbf16>
    %cst_97 = arith.constant dense<0.000000e+00> : vector<8x256xf32>
    %213 = tpu.matmul %212, %10, %cst_97 {dimension_numbers = #tpu.dot_dimension_numbers<[1], [0], [0], [1], [0, 0, 1, 1], [], []>} : vector<8x64xbf16>, vector<64x256xbf16>, vector<8x256xf32> -> vector<8x256xf32>
    %214 = arith.addf %211, %213 : vector<8x256xf32>
    %215 = arith.negf %214 : vector<8x256xf32>
    %216 = math.exp %215 : vector<8x256xf32>
    %cst_98 = arith.constant 1.000000e+00 : f32
    %217 = vector.broadcast %cst_98 : f32 to vector<8x256xf32>
    %218 = arith.addf %217, %216 : vector<8x256xf32>
    %219 = arith.divf %217, %218 : vector<8x256xf32>
    %220 = vector.extract_strided_slice %219 {offsets = [0, 0], sizes = [8, 64], strides = [1, 1]} : vector<8x256xf32> to vector<8x64xf32>
    %221 = vector.extract_strided_slice %219 {offsets = [0, 64], sizes = [8, 64], strides = [1, 1]} : vector<8x256xf32> to vector<8x64xf32>
    %222 = vector.extract_strided_slice %219 {offsets = [0, 128], sizes = [8, 64], strides = [1, 1]} : vector<8x256xf32> to vector<8x64xf32>
    %cst_99 = arith.constant 2.000000e+00 : f32
    %223 = vector.broadcast %cst_99 : f32 to vector<8x64xf32>
    %224 = arith.mulf %223, %222 : vector<8x64xf32>
    %cst_100 = arith.constant 1.000000e+00 : f32
    %225 = vector.broadcast %cst_100 : f32 to vector<8x64xf32>
    %226 = arith.subf %224, %225 : vector<8x64xf32>
    %227 = vector.extract_strided_slice %219 {offsets = [0, 192], sizes = [8, 64], strides = [1, 1]} : vector<8x256xf32> to vector<8x64xf32>
    %228 = arith.mulf %221, %202 : vector<8x64xf32>
    %229 = arith.mulf %220, %226 : vector<8x64xf32>
    %230 = arith.addf %228, %229 : vector<8x64xf32>
    %231 = math.tanh %230 : vector<8x64xf32>
    %232 = arith.mulf %227, %231 : vector<8x64xf32>
    %233 = vector.extract_strided_slice %232 {offsets = [0, 0], sizes = [8, 32], strides = [1, 1]} : vector<8x64xf32> to vector<8x32xf32>
    %c56_101 = arith.constant 56 : index
    %c0_102 = arith.constant 0 : index
    %234 = vector.load %arg16[%c56_101, %c0_102] : memref<64x32xf32, #tpu.memory_space<vmem>>, vector<8x32xf32>
    tpu.vector_store %arg16[%c56_101, %c0_102], %233 {strides = array<i32>} : memref<64x32xf32, #tpu.memory_space<vmem>>, vector<8x32xf32>,
    %235 = vector.extract_strided_slice %232 {offsets = [0, 32], sizes = [8, 32], strides = [1, 1]} : vector<8x64xf32> to vector<8x32xf32>
    %c0_103 = arith.constant 0 : index
    %c0_104 = arith.constant 0 : index
    %236 = vector.load %arg17[%c0_103, %c0_104] : memref<64x32xf32, #tpu.memory_space<vmem>>, vector<8x32xf32>
    tpu.vector_store %arg17[%c0_103, %c0_104], %235 {strides = array<i32>} : memref<64x32xf32, #tpu.memory_space<vmem>>, vector<8x32xf32>,
    %c0_105 = arith.constant 0 : index
    %c0_106 = arith.constant 0 : index
    %237 = vector.load %arg16[%c0_105, %c0_106] : memref<64x32xf32, #tpu.memory_space<vmem>>, vector<64x32xf32>
    %238 = arith.truncf %237 : vector<64x32xf32> to vector<64x32xbf16>
    %c0_107 = arith.constant 0 : index
    %c0_108 = arith.constant 0 : index
    %239 = vector.load %arg17[%c0_107, %c0_108] : memref<64x32xf32, #tpu.memory_space<vmem>>, vector<64x32xf32>
    %240 = arith.truncf %239 : vector<64x32xf32> to vector<64x32xbf16>
    %c0_109 = arith.constant 0 : index
    %c0_110 = arith.constant 0 : index
    %241 = vector.load %arg5[%c0_109, %c0_110] : memref<64x256xbf16, #tpu.memory_space<vmem>>, vector<32x256xbf16>
    %cst_111 = arith.constant dense<0.000000e+00> : vector<64x256xf32>
    %242 = tpu.matmul %238, %241, %cst_111 {dimension_numbers = #tpu.dot_dimension_numbers<[1], [0], [0], [1], [0, 0, 1, 1], [], []>} : vector<64x32xbf16>, vector<32x256xbf16>, vector<64x256xf32> -> vector<64x256xf32>
    %c32_112 = arith.constant 32 : index
    %c0_113 = arith.constant 0 : index
    %243 = vector.load %arg5[%c32_112, %c0_113] : memref<64x256xbf16, #tpu.memory_space<vmem>>, vector<32x256xbf16>
    %cst_114 = arith.constant dense<0.000000e+00> : vector<64x256xf32>
    %244 = tpu.matmul %240, %243, %cst_114 {dimension_numbers = #tpu.dot_dimension_numbers<[1], [0], [0], [1], [0, 0, 1, 1], [], []>} : vector<64x32xbf16>, vector<32x256xbf16>, vector<64x256xf32> -> vector<64x256xf32>
    %245 = arith.addf %242, %244 : vector<64x256xf32>
    %c0_115 = arith.constant 0 : index
    %c0_116 = arith.constant 0 : index
    %246 = vector.load %arg7[%c0_115, %c0_116] : memref<1x256xf32, #tpu.memory_space<vmem>>, vector<1x256xf32>
    %247 = vector.broadcast %246 : vector<1x256xf32> to vector<64x256xf32>
    %248 = arith.addf %245, %247 : vector<64x256xf32>
    %c0_117 = arith.constant 0 : index
    %c0_118 = arith.constant 0 : index
    %249 = vector.load %arg18[%c0_117, %c0_118] : memref<64x256xf32, #tpu.memory_space<vmem>>, vector<64x256xf32>
    tpu.vector_store %arg18[%c0_117, %c0_118], %248 {strides = array<i32>} : memref<64x256xf32, #tpu.memory_space<vmem>>, vector<64x256xf32>,
    %c0_119 = arith.constant 0 : index
    %c0_120 = arith.constant 0 : index
    %250 = vector.load %arg6[%c0_119, %c0_120] : memref<64x256xbf16, #tpu.memory_space<vmem>>, vector<32x256xbf16>
    %cst_121 = arith.constant dense<0.000000e+00> : vector<64x256xf32>
    %251 = tpu.matmul %238, %250, %cst_121 {dimension_numbers = #tpu.dot_dimension_numbers<[1], [0], [0], [1], [0, 0, 1, 1], [], []>} : vector<64x32xbf16>, vector<32x256xbf16>, vector<64x256xf32> -> vector<64x256xf32>
    %c32_122 = arith.constant 32 : index
    %c0_123 = arith.constant 0 : index
    %252 = vector.load %arg6[%c32_122, %c0_123] : memref<64x256xbf16, #tpu.memory_space<vmem>>, vector<32x256xbf16>
    %cst_124 = arith.constant dense<0.000000e+00> : vector<64x256xf32>
    %253 = tpu.matmul %240, %252, %cst_124 {dimension_numbers = #tpu.dot_dimension_numbers<[1], [0], [0], [1], [0, 0, 1, 1], [], []>} : vector<64x32xbf16>, vector<32x256xbf16>, vector<64x256xf32> -> vector<64x256xf32>
    %254 = arith.addf %251, %253 : vector<64x256xf32>
    %c0_125 = arith.constant 0 : index
    %c0_126 = arith.constant 0 : index
    %255 = vector.load %arg19[%c0_125, %c0_126] : memref<64x256xf32, #tpu.memory_space<vmem>>, vector<64x256xf32>
    tpu.vector_store %arg19[%c0_125, %c0_126], %254 {strides = array<i32>} : memref<64x256xf32, #tpu.memory_space<vmem>>, vector<64x256xf32>,
    %c0_127 = arith.constant 0 : index
    %c0_128 = arith.constant 0 : index
    %256 = vector.load %arg8[%c0_127, %c0_128] : memref<64x256xbf16, #tpu.memory_space<vmem>>, vector<64x256xbf16>
    %cst_129 = arith.constant 0.000000e+00 : f32
    %257 = vector.broadcast %cst_129 : f32 to vector<8x64xf32>
    %cst_130 = arith.constant 0.000000e+00 : f32
    %258 = vector.broadcast %cst_130 : f32 to vector<8x64xf32>
    %c0_131 = arith.constant 0 : index
    %c0_132 = arith.constant 0 : index
    %259 = vector.load %arg18[%c0_131, %c0_132] : memref<64x256xf32, #tpu.memory_space<vmem>>, vector<8x256xf32>
    %c56_133 = arith.constant 56 : index
    %c0_134 = arith.constant 0 : index
    %260 = vector.load %arg19[%c56_133, %c0_134] : memref<64x256xf32, #tpu.memory_space<vmem>>, vector<8x256xf32>
    %261 = arith.addf %259, %260 : vector<8x256xf32>
    %262 = arith.truncf %257 : vector<8x64xf32> to vector<8x64xbf16>
    %cst_135 = arith.constant dense<0.000000e+00> : vector<8x256xf32>
    %263 = tpu.matmul %262, %256, %cst_135 {dimension_numbers = #tpu.dot_dimension_numbers<[1], [0], [0], [1], [0, 0, 1, 1], [], []>} : vector<8x64xbf16>, vector<64x256xbf16>, vector<8x256xf32> -> vector<8x256xf32>
    %264 = arith.addf %261, %263 : vector<8x256xf32>
    %265 = arith.negf %264 : vector<8x256xf32>
    %266 = math.exp %265 : vector<8x256xf32>
    %cst_136 = arith.constant 1.000000e+00 : f32
    %267 = vector.broadcast %cst_136 : f32 to vector<8x256xf32>
    %268 = arith.addf %267, %266 : vector<8x256xf32>
    %269 = arith.divf %267, %268 : vector<8x256xf32>
    %270 = vector.extract_strided_slice %269 {offsets = [0, 0], sizes = [8, 64], strides = [1, 1]} : vector<8x256xf32> to vector<8x64xf32>
    %271 = vector.extract_strided_slice %269 {offsets = [0, 64], sizes = [8, 64], strides = [1, 1]} : vector<8x256xf32> to vector<8x64xf32>
    %272 = vector.extract_strided_slice %269 {offsets = [0, 128], sizes = [8, 64], strides = [1, 1]} : vector<8x256xf32> to vector<8x64xf32>
    %cst_137 = arith.constant 2.000000e+00 : f32
    %273 = vector.broadcast %cst_137 : f32 to vector<8x64xf32>
    %274 = arith.mulf %273, %272 : vector<8x64xf32>
    %cst_138 = arith.constant 1.000000e+00 : f32
    %275 = vector.broadcast %cst_138 : f32 to vector<8x64xf32>
    %276 = arith.subf %274, %275 : vector<8x64xf32>
    %277 = vector.extract_strided_slice %269 {offsets = [0, 192], sizes = [8, 64], strides = [1, 1]} : vector<8x256xf32> to vector<8x64xf32>
    %278 = arith.mulf %271, %258 : vector<8x64xf32>
    %279 = arith.mulf %270, %276 : vector<8x64xf32>
    %280 = arith.addf %278, %279 : vector<8x64xf32>
    %281 = math.tanh %280 : vector<8x64xf32>
    %282 = arith.mulf %277, %281 : vector<8x64xf32>
    %283 = vector.extract_strided_slice %282 {offsets = [0, 0], sizes = [8, 32], strides = [1, 1]} : vector<8x64xf32> to vector<8x32xf32>
    %c0_139 = arith.constant 0 : index
    %c0_140 = arith.constant 0 : index
    %284 = vector.load %arg16[%c0_139, %c0_140] : memref<64x32xf32, #tpu.memory_space<vmem>>, vector<8x32xf32>
    tpu.vector_store %arg16[%c0_139, %c0_140], %283 {strides = array<i32>} : memref<64x32xf32, #tpu.memory_space<vmem>>, vector<8x32xf32>,
    %285 = vector.extract_strided_slice %282 {offsets = [0, 32], sizes = [8, 32], strides = [1, 1]} : vector<8x64xf32> to vector<8x32xf32>
    %c56_141 = arith.constant 56 : index
    %c0_142 = arith.constant 0 : index
    %286 = vector.load %arg17[%c56_141, %c0_142] : memref<64x32xf32, #tpu.memory_space<vmem>>, vector<8x32xf32>
    tpu.vector_store %arg17[%c56_141, %c0_142], %285 {strides = array<i32>} : memref<64x32xf32, #tpu.memory_space<vmem>>, vector<8x32xf32>,
    %c8_143 = arith.constant 8 : index
    %c0_144 = arith.constant 0 : index
    %287 = vector.load %arg18[%c8_143, %c0_144] : memref<64x256xf32, #tpu.memory_space<vmem>>, vector<8x256xf32>
    %c48_145 = arith.constant 48 : index
    %c0_146 = arith.constant 0 : index
    %288 = vector.load %arg19[%c48_145, %c0_146] : memref<64x256xf32, #tpu.memory_space<vmem>>, vector<8x256xf32>
    %289 = arith.addf %287, %288 : vector<8x256xf32>
    %290 = arith.truncf %282 : vector<8x64xf32> to vector<8x64xbf16>
    %cst_147 = arith.constant dense<0.000000e+00> : vector<8x256xf32>
    %291 = tpu.matmul %290, %256, %cst_147 {dimension_numbers = #tpu.dot_dimension_numbers<[1], [0], [0], [1], [0, 0, 1, 1], [], []>} : vector<8x64xbf16>, vector<64x256xbf16>, vector<8x256xf32> -> vector<8x256xf32>
    %292 = arith.addf %289, %291 : vector<8x256xf32>
    %293 = arith.negf %292 : vector<8x256xf32>
    %294 = math.exp %293 : vector<8x256xf32>
    %cst_148 = arith.constant 1.000000e+00 : f32
    %295 = vector.broadcast %cst_148 : f32 to vector<8x256xf32>
    %296 = arith.addf %295, %294 : vector<8x256xf32>
    %297 = arith.divf %295, %296 : vector<8x256xf32>
    %298 = vector.extract_strided_slice %297 {offsets = [0, 0], sizes = [8, 64], strides = [1, 1]} : vector<8x256xf32> to vector<8x64xf32>
    %299 = vector.extract_strided_slice %297 {offsets = [0, 64], sizes = [8, 64], strides = [1, 1]} : vector<8x256xf32> to vector<8x64xf32>
    %300 = vector.extract_strided_slice %297 {offsets = [0, 128], sizes = [8, 64], strides = [1, 1]} : vector<8x256xf32> to vector<8x64xf32>
    %cst_149 = arith.constant 2.000000e+00 : f32
    %301 = vector.broadcast %cst_149 : f32 to vector<8x64xf32>
    %302 = arith.mulf %301, %300 : vector<8x64xf32>
    %cst_150 = arith.constant 1.000000e+00 : f32
    %303 = vector.broadcast %cst_150 : f32 to vector<8x64xf32>
    %304 = arith.subf %302, %303 : vector<8x64xf32>
    %305 = vector.extract_strided_slice %297 {offsets = [0, 192], sizes = [8, 64], strides = [1, 1]} : vector<8x256xf32> to vector<8x64xf32>
    %306 = arith.mulf %299, %280 : vector<8x64xf32>
    %307 = arith.mulf %298, %304 : vector<8x64xf32>
    %308 = arith.addf %306, %307 : vector<8x64xf32>
    %309 = math.tanh %308 : vector<8x64xf32>
    %310 = arith.mulf %305, %309 : vector<8x64xf32>
    %311 = vector.extract_strided_slice %310 {offsets = [0, 0], sizes = [8, 32], strides = [1, 1]} : vector<8x64xf32> to vector<8x32xf32>
    %c8_151 = arith.constant 8 : index
    %c0_152 = arith.constant 0 : index
    %312 = vector.load %arg16[%c8_151, %c0_152] : memref<64x32xf32, #tpu.memory_space<vmem>>, vector<8x32xf32>
    tpu.vector_store %arg16[%c8_151, %c0_152], %311 {strides = array<i32>} : memref<64x32xf32, #tpu.memory_space<vmem>>, vector<8x32xf32>,
    %313 = vector.extract_strided_slice %310 {offsets = [0, 32], sizes = [8, 32], strides = [1, 1]} : vector<8x64xf32> to vector<8x32xf32>
    %c48_153 = arith.constant 48 : index
    %c0_154 = arith.constant 0 : index
    %314 = vector.load %arg17[%c48_153, %c0_154] : memref<64x32xf32, #tpu.memory_space<vmem>>, vector<8x32xf32>
    tpu.vector_store %arg17[%c48_153, %c0_154], %313 {strides = array<i32>} : memref<64x32xf32, #tpu.memory_space<vmem>>, vector<8x32xf32>,
    %c16_155 = arith.constant 16 : index
    %c0_156 = arith.constant 0 : index
    %315 = vector.load %arg18[%c16_155, %c0_156] : memref<64x256xf32, #tpu.memory_space<vmem>>, vector<8x256xf32>
    %c40_157 = arith.constant 40 : index
    %c0_158 = arith.constant 0 : index
    %316 = vector.load %arg19[%c40_157, %c0_158] : memref<64x256xf32, #tpu.memory_space<vmem>>, vector<8x256xf32>
    %317 = arith.addf %315, %316 : vector<8x256xf32>
    %318 = arith.truncf %310 : vector<8x64xf32> to vector<8x64xbf16>
    %cst_159 = arith.constant dense<0.000000e+00> : vector<8x256xf32>
    %319 = tpu.matmul %318, %256, %cst_159 {dimension_numbers = #tpu.dot_dimension_numbers<[1], [0], [0], [1], [0, 0, 1, 1], [], []>} : vector<8x64xbf16>, vector<64x256xbf16>, vector<8x256xf32> -> vector<8x256xf32>
    %320 = arith.addf %317, %319 : vector<8x256xf32>
    %321 = arith.negf %320 : vector<8x256xf32>
    %322 = math.exp %321 : vector<8x256xf32>
    %cst_160 = arith.constant 1.000000e+00 : f32
    %323 = vector.broadcast %cst_160 : f32 to vector<8x256xf32>
    %324 = arith.addf %323, %322 : vector<8x256xf32>
    %325 = arith.divf %323, %324 : vector<8x256xf32>
    %326 = vector.extract_strided_slice %325 {offsets = [0, 0], sizes = [8, 64], strides = [1, 1]} : vector<8x256xf32> to vector<8x64xf32>
    %327 = vector.extract_strided_slice %325 {offsets = [0, 64], sizes = [8, 64], strides = [1, 1]} : vector<8x256xf32> to vector<8x64xf32>
    %328 = vector.extract_strided_slice %325 {offsets = [0, 128], sizes = [8, 64], strides = [1, 1]} : vector<8x256xf32> to vector<8x64xf32>
    %cst_161 = arith.constant 2.000000e+00 : f32
    %329 = vector.broadcast %cst_161 : f32 to vector<8x64xf32>
    %330 = arith.mulf %329, %328 : vector<8x64xf32>
    %cst_162 = arith.constant 1.000000e+00 : f32
    %331 = vector.broadcast %cst_162 : f32 to vector<8x64xf32>
    %332 = arith.subf %330, %331 : vector<8x64xf32>
    %333 = vector.extract_strided_slice %325 {offsets = [0, 192], sizes = [8, 64], strides = [1, 1]} : vector<8x256xf32> to vector<8x64xf32>
    %334 = arith.mulf %327, %308 : vector<8x64xf32>
    %335 = arith.mulf %326, %332 : vector<8x64xf32>
    %336 = arith.addf %334, %335 : vector<8x64xf32>
    %337 = math.tanh %336 : vector<8x64xf32>
    %338 = arith.mulf %333, %337 : vector<8x64xf32>
    %339 = vector.extract_strided_slice %338 {offsets = [0, 0], sizes = [8, 32], strides = [1, 1]} : vector<8x64xf32> to vector<8x32xf32>
    %c16_163 = arith.constant 16 : index
    %c0_164 = arith.constant 0 : index
    %340 = vector.load %arg16[%c16_163, %c0_164] : memref<64x32xf32, #tpu.memory_space<vmem>>, vector<8x32xf32>
    tpu.vector_store %arg16[%c16_163, %c0_164], %339 {strides = array<i32>} : memref<64x32xf32, #tpu.memory_space<vmem>>, vector<8x32xf32>,
    %341 = vector.extract_strided_slice %338 {offsets = [0, 32], sizes = [8, 32], strides = [1, 1]} : vector<8x64xf32> to vector<8x32xf32>
    %c40_165 = arith.constant 40 : index
    %c0_166 = arith.constant 0 : index
    %342 = vector.load %arg17[%c40_165, %c0_166] : memref<64x32xf32, #tpu.memory_space<vmem>>, vector<8x32xf32>
    tpu.vector_store %arg17[%c40_165, %c0_166], %341 {strides = array<i32>} : memref<64x32xf32, #tpu.memory_space<vmem>>, vector<8x32xf32>,
    %c24_167 = arith.constant 24 : index
    %c0_168 = arith.constant 0 : index
    %343 = vector.load %arg18[%c24_167, %c0_168] : memref<64x256xf32, #tpu.memory_space<vmem>>, vector<8x256xf32>
    %c32_169 = arith.constant 32 : index
    %c0_170 = arith.constant 0 : index
    %344 = vector.load %arg19[%c32_169, %c0_170] : memref<64x256xf32, #tpu.memory_space<vmem>>, vector<8x256xf32>
    %345 = arith.addf %343, %344 : vector<8x256xf32>
    %346 = arith.truncf %338 : vector<8x64xf32> to vector<8x64xbf16>
    %cst_171 = arith.constant dense<0.000000e+00> : vector<8x256xf32>
    %347 = tpu.matmul %346, %256, %cst_171 {dimension_numbers = #tpu.dot_dimension_numbers<[1], [0], [0], [1], [0, 0, 1, 1], [], []>} : vector<8x64xbf16>, vector<64x256xbf16>, vector<8x256xf32> -> vector<8x256xf32>
    %348 = arith.addf %345, %347 : vector<8x256xf32>
    %349 = arith.negf %348 : vector<8x256xf32>
    %350 = math.exp %349 : vector<8x256xf32>
    %cst_172 = arith.constant 1.000000e+00 : f32
    %351 = vector.broadcast %cst_172 : f32 to vector<8x256xf32>
    %352 = arith.addf %351, %350 : vector<8x256xf32>
    %353 = arith.divf %351, %352 : vector<8x256xf32>
    %354 = vector.extract_strided_slice %353 {offsets = [0, 0], sizes = [8, 64], strides = [1, 1]} : vector<8x256xf32> to vector<8x64xf32>
    %355 = vector.extract_strided_slice %353 {offsets = [0, 64], sizes = [8, 64], strides = [1, 1]} : vector<8x256xf32> to vector<8x64xf32>
    %356 = vector.extract_strided_slice %353 {offsets = [0, 128], sizes = [8, 64], strides = [1, 1]} : vector<8x256xf32> to vector<8x64xf32>
    %cst_173 = arith.constant 2.000000e+00 : f32
    %357 = vector.broadcast %cst_173 : f32 to vector<8x64xf32>
    %358 = arith.mulf %357, %356 : vector<8x64xf32>
    %cst_174 = arith.constant 1.000000e+00 : f32
    %359 = vector.broadcast %cst_174 : f32 to vector<8x64xf32>
    %360 = arith.subf %358, %359 : vector<8x64xf32>
    %361 = vector.extract_strided_slice %353 {offsets = [0, 192], sizes = [8, 64], strides = [1, 1]} : vector<8x256xf32> to vector<8x64xf32>
    %362 = arith.mulf %355, %336 : vector<8x64xf32>
    %363 = arith.mulf %354, %360 : vector<8x64xf32>
    %364 = arith.addf %362, %363 : vector<8x64xf32>
    %365 = math.tanh %364 : vector<8x64xf32>
    %366 = arith.mulf %361, %365 : vector<8x64xf32>
    %367 = vector.extract_strided_slice %366 {offsets = [0, 0], sizes = [8, 32], strides = [1, 1]} : vector<8x64xf32> to vector<8x32xf32>
    %c24_175 = arith.constant 24 : index
    %c0_176 = arith.constant 0 : index
    %368 = vector.load %arg16[%c24_175, %c0_176] : memref<64x32xf32, #tpu.memory_space<vmem>>, vector<8x32xf32>
    tpu.vector_store %arg16[%c24_175, %c0_176], %367 {strides = array<i32>} : memref<64x32xf32, #tpu.memory_space<vmem>>, vector<8x32xf32>,
    %369 = vector.extract_strided_slice %366 {offsets = [0, 32], sizes = [8, 32], strides = [1, 1]} : vector<8x64xf32> to vector<8x32xf32>
    %c32_177 = arith.constant 32 : index
    %c0_178 = arith.constant 0 : index
    %370 = vector.load %arg17[%c32_177, %c0_178] : memref<64x32xf32, #tpu.memory_space<vmem>>, vector<8x32xf32>
    tpu.vector_store %arg17[%c32_177, %c0_178], %369 {strides = array<i32>} : memref<64x32xf32, #tpu.memory_space<vmem>>, vector<8x32xf32>,
    %c32_179 = arith.constant 32 : index
    %c0_180 = arith.constant 0 : index
    %371 = vector.load %arg18[%c32_179, %c0_180] : memref<64x256xf32, #tpu.memory_space<vmem>>, vector<8x256xf32>
    %c24_181 = arith.constant 24 : index
    %c0_182 = arith.constant 0 : index
    %372 = vector.load %arg19[%c24_181, %c0_182] : memref<64x256xf32, #tpu.memory_space<vmem>>, vector<8x256xf32>
    %373 = arith.addf %371, %372 : vector<8x256xf32>
    %374 = arith.truncf %366 : vector<8x64xf32> to vector<8x64xbf16>
    %cst_183 = arith.constant dense<0.000000e+00> : vector<8x256xf32>
    %375 = tpu.matmul %374, %256, %cst_183 {dimension_numbers = #tpu.dot_dimension_numbers<[1], [0], [0], [1], [0, 0, 1, 1], [], []>} : vector<8x64xbf16>, vector<64x256xbf16>, vector<8x256xf32> -> vector<8x256xf32>
    %376 = arith.addf %373, %375 : vector<8x256xf32>
    %377 = arith.negf %376 : vector<8x256xf32>
    %378 = math.exp %377 : vector<8x256xf32>
    %cst_184 = arith.constant 1.000000e+00 : f32
    %379 = vector.broadcast %cst_184 : f32 to vector<8x256xf32>
    %380 = arith.addf %379, %378 : vector<8x256xf32>
    %381 = arith.divf %379, %380 : vector<8x256xf32>
    %382 = vector.extract_strided_slice %381 {offsets = [0, 0], sizes = [8, 64], strides = [1, 1]} : vector<8x256xf32> to vector<8x64xf32>
    %383 = vector.extract_strided_slice %381 {offsets = [0, 64], sizes = [8, 64], strides = [1, 1]} : vector<8x256xf32> to vector<8x64xf32>
    %384 = vector.extract_strided_slice %381 {offsets = [0, 128], sizes = [8, 64], strides = [1, 1]} : vector<8x256xf32> to vector<8x64xf32>
    %cst_185 = arith.constant 2.000000e+00 : f32
    %385 = vector.broadcast %cst_185 : f32 to vector<8x64xf32>
    %386 = arith.mulf %385, %384 : vector<8x64xf32>
    %cst_186 = arith.constant 1.000000e+00 : f32
    %387 = vector.broadcast %cst_186 : f32 to vector<8x64xf32>
    %388 = arith.subf %386, %387 : vector<8x64xf32>
    %389 = vector.extract_strided_slice %381 {offsets = [0, 192], sizes = [8, 64], strides = [1, 1]} : vector<8x256xf32> to vector<8x64xf32>
    %390 = arith.mulf %383, %364 : vector<8x64xf32>
    %391 = arith.mulf %382, %388 : vector<8x64xf32>
    %392 = arith.addf %390, %391 : vector<8x64xf32>
    %393 = math.tanh %392 : vector<8x64xf32>
    %394 = arith.mulf %389, %393 : vector<8x64xf32>
    %395 = vector.extract_strided_slice %394 {offsets = [0, 0], sizes = [8, 32], strides = [1, 1]} : vector<8x64xf32> to vector<8x32xf32>
    %c32_187 = arith.constant 32 : index
    %c0_188 = arith.constant 0 : index
    %396 = vector.load %arg16[%c32_187, %c0_188] : memref<64x32xf32, #tpu.memory_space<vmem>>, vector<8x32xf32>
    tpu.vector_store %arg16[%c32_187, %c0_188], %395 {strides = array<i32>} : memref<64x32xf32, #tpu.memory_space<vmem>>, vector<8x32xf32>,
    %397 = vector.extract_strided_slice %394 {offsets = [0, 32], sizes = [8, 32], strides = [1, 1]} : vector<8x64xf32> to vector<8x32xf32>
    %c24_189 = arith.constant 24 : index
    %c0_190 = arith.constant 0 : index
    %398 = vector.load %arg17[%c24_189, %c0_190] : memref<64x32xf32, #tpu.memory_space<vmem>>, vector<8x32xf32>
    tpu.vector_store %arg17[%c24_189, %c0_190], %397 {strides = array<i32>} : memref<64x32xf32, #tpu.memory_space<vmem>>, vector<8x32xf32>,
    %c40_191 = arith.constant 40 : index
    %c0_192 = arith.constant 0 : index
    %399 = vector.load %arg18[%c40_191, %c0_192] : memref<64x256xf32, #tpu.memory_space<vmem>>, vector<8x256xf32>
    %c16_193 = arith.constant 16 : index
    %c0_194 = arith.constant 0 : index
    %400 = vector.load %arg19[%c16_193, %c0_194] : memref<64x256xf32, #tpu.memory_space<vmem>>, vector<8x256xf32>
    %401 = arith.addf %399, %400 : vector<8x256xf32>
    %402 = arith.truncf %394 : vector<8x64xf32> to vector<8x64xbf16>
    %cst_195 = arith.constant dense<0.000000e+00> : vector<8x256xf32>
    %403 = tpu.matmul %402, %256, %cst_195 {dimension_numbers = #tpu.dot_dimension_numbers<[1], [0], [0], [1], [0, 0, 1, 1], [], []>} : vector<8x64xbf16>, vector<64x256xbf16>, vector<8x256xf32> -> vector<8x256xf32>
    %404 = arith.addf %401, %403 : vector<8x256xf32>
    %405 = arith.negf %404 : vector<8x256xf32>
    %406 = math.exp %405 : vector<8x256xf32>
    %cst_196 = arith.constant 1.000000e+00 : f32
    %407 = vector.broadcast %cst_196 : f32 to vector<8x256xf32>
    %408 = arith.addf %407, %406 : vector<8x256xf32>
    %409 = arith.divf %407, %408 : vector<8x256xf32>
    %410 = vector.extract_strided_slice %409 {offsets = [0, 0], sizes = [8, 64], strides = [1, 1]} : vector<8x256xf32> to vector<8x64xf32>
    %411 = vector.extract_strided_slice %409 {offsets = [0, 64], sizes = [8, 64], strides = [1, 1]} : vector<8x256xf32> to vector<8x64xf32>
    %412 = vector.extract_strided_slice %409 {offsets = [0, 128], sizes = [8, 64], strides = [1, 1]} : vector<8x256xf32> to vector<8x64xf32>
    %cst_197 = arith.constant 2.000000e+00 : f32
    %413 = vector.broadcast %cst_197 : f32 to vector<8x64xf32>
    %414 = arith.mulf %413, %412 : vector<8x64xf32>
    %cst_198 = arith.constant 1.000000e+00 : f32
    %415 = vector.broadcast %cst_198 : f32 to vector<8x64xf32>
    %416 = arith.subf %414, %415 : vector<8x64xf32>
    %417 = vector.extract_strided_slice %409 {offsets = [0, 192], sizes = [8, 64], strides = [1, 1]} : vector<8x256xf32> to vector<8x64xf32>
    %418 = arith.mulf %411, %392 : vector<8x64xf32>
    %419 = arith.mulf %410, %416 : vector<8x64xf32>
    %420 = arith.addf %418, %419 : vector<8x64xf32>
    %421 = math.tanh %420 : vector<8x64xf32>
    %422 = arith.mulf %417, %421 : vector<8x64xf32>
    %423 = vector.extract_strided_slice %422 {offsets = [0, 0], sizes = [8, 32], strides = [1, 1]} : vector<8x64xf32> to vector<8x32xf32>
    %c40_199 = arith.constant 40 : index
    %c0_200 = arith.constant 0 : index
    %424 = vector.load %arg16[%c40_199, %c0_200] : memref<64x32xf32, #tpu.memory_space<vmem>>, vector<8x32xf32>
    tpu.vector_store %arg16[%c40_199, %c0_200], %423 {strides = array<i32>} : memref<64x32xf32, #tpu.memory_space<vmem>>, vector<8x32xf32>,
    %425 = vector.extract_strided_slice %422 {offsets = [0, 32], sizes = [8, 32], strides = [1, 1]} : vector<8x64xf32> to vector<8x32xf32>
    %c16_201 = arith.constant 16 : index
    %c0_202 = arith.constant 0 : index
    %426 = vector.load %arg17[%c16_201, %c0_202] : memref<64x32xf32, #tpu.memory_space<vmem>>, vector<8x32xf32>
    tpu.vector_store %arg17[%c16_201, %c0_202], %425 {strides = array<i32>} : memref<64x32xf32, #tpu.memory_space<vmem>>, vector<8x32xf32>,
    %c48_203 = arith.constant 48 : index
    %c0_204 = arith.constant 0 : index
    %427 = vector.load %arg18[%c48_203, %c0_204] : memref<64x256xf32, #tpu.memory_space<vmem>>, vector<8x256xf32>
    %c8_205 = arith.constant 8 : index
    %c0_206 = arith.constant 0 : index
    %428 = vector.load %arg19[%c8_205, %c0_206] : memref<64x256xf32, #tpu.memory_space<vmem>>, vector<8x256xf32>
    %429 = arith.addf %427, %428 : vector<8x256xf32>
    %430 = arith.truncf %422 : vector<8x64xf32> to vector<8x64xbf16>
    %cst_207 = arith.constant dense<0.000000e+00> : vector<8x256xf32>
    %431 = tpu.matmul %430, %256, %cst_207 {dimension_numbers = #tpu.dot_dimension_numbers<[1], [0], [0], [1], [0, 0, 1, 1], [], []>} : vector<8x64xbf16>, vector<64x256xbf16>, vector<8x256xf32> -> vector<8x256xf32>
    %432 = arith.addf %429, %431 : vector<8x256xf32>
    %433 = arith.negf %432 : vector<8x256xf32>
    %434 = math.exp %433 : vector<8x256xf32>
    %cst_208 = arith.constant 1.000000e+00 : f32
    %435 = vector.broadcast %cst_208 : f32 to vector<8x256xf32>
    %436 = arith.addf %435, %434 : vector<8x256xf32>
    %437 = arith.divf %435, %436 : vector<8x256xf32>
    %438 = vector.extract_strided_slice %437 {offsets = [0, 0], sizes = [8, 64], strides = [1, 1]} : vector<8x256xf32> to vector<8x64xf32>
    %439 = vector.extract_strided_slice %437 {offsets = [0, 64], sizes = [8, 64], strides = [1, 1]} : vector<8x256xf32> to vector<8x64xf32>
    %440 = vector.extract_strided_slice %437 {offsets = [0, 128], sizes = [8, 64], strides = [1, 1]} : vector<8x256xf32> to vector<8x64xf32>
    %cst_209 = arith.constant 2.000000e+00 : f32
    %441 = vector.broadcast %cst_209 : f32 to vector<8x64xf32>
    %442 = arith.mulf %441, %440 : vector<8x64xf32>
    %cst_210 = arith.constant 1.000000e+00 : f32
    %443 = vector.broadcast %cst_210 : f32 to vector<8x64xf32>
    %444 = arith.subf %442, %443 : vector<8x64xf32>
    %445 = vector.extract_strided_slice %437 {offsets = [0, 192], sizes = [8, 64], strides = [1, 1]} : vector<8x256xf32> to vector<8x64xf32>
    %446 = arith.mulf %439, %420 : vector<8x64xf32>
    %447 = arith.mulf %438, %444 : vector<8x64xf32>
    %448 = arith.addf %446, %447 : vector<8x64xf32>
    %449 = math.tanh %448 : vector<8x64xf32>
    %450 = arith.mulf %445, %449 : vector<8x64xf32>
    %451 = vector.extract_strided_slice %450 {offsets = [0, 0], sizes = [8, 32], strides = [1, 1]} : vector<8x64xf32> to vector<8x32xf32>
    %c48_211 = arith.constant 48 : index
    %c0_212 = arith.constant 0 : index
    %452 = vector.load %arg16[%c48_211, %c0_212] : memref<64x32xf32, #tpu.memory_space<vmem>>, vector<8x32xf32>
    tpu.vector_store %arg16[%c48_211, %c0_212], %451 {strides = array<i32>} : memref<64x32xf32, #tpu.memory_space<vmem>>, vector<8x32xf32>,
    %453 = vector.extract_strided_slice %450 {offsets = [0, 32], sizes = [8, 32], strides = [1, 1]} : vector<8x64xf32> to vector<8x32xf32>
    %c8_213 = arith.constant 8 : index
    %c0_214 = arith.constant 0 : index
    %454 = vector.load %arg17[%c8_213, %c0_214] : memref<64x32xf32, #tpu.memory_space<vmem>>, vector<8x32xf32>
    tpu.vector_store %arg17[%c8_213, %c0_214], %453 {strides = array<i32>} : memref<64x32xf32, #tpu.memory_space<vmem>>, vector<8x32xf32>,
    %c56_215 = arith.constant 56 : index
    %c0_216 = arith.constant 0 : index
    %455 = vector.load %arg18[%c56_215, %c0_216] : memref<64x256xf32, #tpu.memory_space<vmem>>, vector<8x256xf32>
    %c0_217 = arith.constant 0 : index
    %c0_218 = arith.constant 0 : index
    %456 = vector.load %arg19[%c0_217, %c0_218] : memref<64x256xf32, #tpu.memory_space<vmem>>, vector<8x256xf32>
    %457 = arith.addf %455, %456 : vector<8x256xf32>
    %458 = arith.truncf %450 : vector<8x64xf32> to vector<8x64xbf16>
    %cst_219 = arith.constant dense<0.000000e+00> : vector<8x256xf32>
    %459 = tpu.matmul %458, %256, %cst_219 {dimension_numbers = #tpu.dot_dimension_numbers<[1], [0], [0], [1], [0, 0, 1, 1], [], []>} : vector<8x64xbf16>, vector<64x256xbf16>, vector<8x256xf32> -> vector<8x256xf32>
    %460 = arith.addf %457, %459 : vector<8x256xf32>
    %461 = arith.negf %460 : vector<8x256xf32>
    %462 = math.exp %461 : vector<8x256xf32>
    %cst_220 = arith.constant 1.000000e+00 : f32
    %463 = vector.broadcast %cst_220 : f32 to vector<8x256xf32>
    %464 = arith.addf %463, %462 : vector<8x256xf32>
    %465 = arith.divf %463, %464 : vector<8x256xf32>
    %466 = vector.extract_strided_slice %465 {offsets = [0, 0], sizes = [8, 64], strides = [1, 1]} : vector<8x256xf32> to vector<8x64xf32>
    %467 = vector.extract_strided_slice %465 {offsets = [0, 64], sizes = [8, 64], strides = [1, 1]} : vector<8x256xf32> to vector<8x64xf32>
    %468 = vector.extract_strided_slice %465 {offsets = [0, 128], sizes = [8, 64], strides = [1, 1]} : vector<8x256xf32> to vector<8x64xf32>
    %cst_221 = arith.constant 2.000000e+00 : f32
    %469 = vector.broadcast %cst_221 : f32 to vector<8x64xf32>
    %470 = arith.mulf %469, %468 : vector<8x64xf32>
    %cst_222 = arith.constant 1.000000e+00 : f32
    %471 = vector.broadcast %cst_222 : f32 to vector<8x64xf32>
    %472 = arith.subf %470, %471 : vector<8x64xf32>
    %473 = vector.extract_strided_slice %465 {offsets = [0, 192], sizes = [8, 64], strides = [1, 1]} : vector<8x256xf32> to vector<8x64xf32>
    %474 = arith.mulf %467, %448 : vector<8x64xf32>
    %475 = arith.mulf %466, %472 : vector<8x64xf32>
    %476 = arith.addf %474, %475 : vector<8x64xf32>
    %477 = math.tanh %476 : vector<8x64xf32>
    %478 = arith.mulf %473, %477 : vector<8x64xf32>
    %479 = vector.extract_strided_slice %478 {offsets = [0, 0], sizes = [8, 32], strides = [1, 1]} : vector<8x64xf32> to vector<8x32xf32>
    %c56_223 = arith.constant 56 : index
    %c0_224 = arith.constant 0 : index
    %480 = vector.load %arg16[%c56_223, %c0_224] : memref<64x32xf32, #tpu.memory_space<vmem>>, vector<8x32xf32>
    tpu.vector_store %arg16[%c56_223, %c0_224], %479 {strides = array<i32>} : memref<64x32xf32, #tpu.memory_space<vmem>>, vector<8x32xf32>,
    %481 = vector.extract_strided_slice %478 {offsets = [0, 32], sizes = [8, 32], strides = [1, 1]} : vector<8x64xf32> to vector<8x32xf32>
    %c0_225 = arith.constant 0 : index
    %c0_226 = arith.constant 0 : index
    %482 = vector.load %arg17[%c0_225, %c0_226] : memref<64x32xf32, #tpu.memory_space<vmem>>, vector<8x32xf32>
    tpu.vector_store %arg17[%c0_225, %c0_226], %481 {strides = array<i32>} : memref<64x32xf32, #tpu.memory_space<vmem>>, vector<8x32xf32>,
    %c0_227 = arith.constant 0 : index
    %c0_228 = arith.constant 0 : index
    %483 = vector.load %arg16[%c0_227, %c0_228] : memref<64x32xf32, #tpu.memory_space<vmem>>, vector<64x32xf32>
    %484 = arith.truncf %483 : vector<64x32xf32> to vector<64x32xbf16>
    %c0_229 = arith.constant 0 : index
    %c0_230 = arith.constant 0 : index
    %485 = vector.load %arg17[%c0_229, %c0_230] : memref<64x32xf32, #tpu.memory_space<vmem>>, vector<64x32xf32>
    %486 = arith.truncf %485 : vector<64x32xf32> to vector<64x32xbf16>
    %c0_231 = arith.constant 0 : index
    %c0_232 = arith.constant 0 : index
    %487 = vector.load %arg9[%c0_231, %c0_232] : memref<64x256xbf16, #tpu.memory_space<vmem>>, vector<32x256xbf16>
    %cst_233 = arith.constant dense<0.000000e+00> : vector<64x256xf32>
    %488 = tpu.matmul %484, %487, %cst_233 {dimension_numbers = #tpu.dot_dimension_numbers<[1], [0], [0], [1], [0, 0, 1, 1], [], []>} : vector<64x32xbf16>, vector<32x256xbf16>, vector<64x256xf32> -> vector<64x256xf32>
    %c32_234 = arith.constant 32 : index
    %c0_235 = arith.constant 0 : index
    %489 = vector.load %arg9[%c32_234, %c0_235] : memref<64x256xbf16, #tpu.memory_space<vmem>>, vector<32x256xbf16>
    %cst_236 = arith.constant dense<0.000000e+00> : vector<64x256xf32>
    %490 = tpu.matmul %486, %489, %cst_236 {dimension_numbers = #tpu.dot_dimension_numbers<[1], [0], [0], [1], [0, 0, 1, 1], [], []>} : vector<64x32xbf16>, vector<32x256xbf16>, vector<64x256xf32> -> vector<64x256xf32>
    %491 = arith.addf %488, %490 : vector<64x256xf32>
    %c0_237 = arith.constant 0 : index
    %c0_238 = arith.constant 0 : index
    %492 = vector.load %arg11[%c0_237, %c0_238] : memref<1x256xf32, #tpu.memory_space<vmem>>, vector<1x256xf32>
    %493 = vector.broadcast %492 : vector<1x256xf32> to vector<64x256xf32>
    %494 = arith.addf %491, %493 : vector<64x256xf32>
    %c0_239 = arith.constant 0 : index
    %c0_240 = arith.constant 0 : index
    %495 = vector.load %arg18[%c0_239, %c0_240] : memref<64x256xf32, #tpu.memory_space<vmem>>, vector<64x256xf32>
    tpu.vector_store %arg18[%c0_239, %c0_240], %494 {strides = array<i32>} : memref<64x256xf32, #tpu.memory_space<vmem>>, vector<64x256xf32>,
    %c0_241 = arith.constant 0 : index
    %c0_242 = arith.constant 0 : index
    %496 = vector.load %arg10[%c0_241, %c0_242] : memref<64x256xbf16, #tpu.memory_space<vmem>>, vector<32x256xbf16>
    %cst_243 = arith.constant dense<0.000000e+00> : vector<64x256xf32>
    %497 = tpu.matmul %484, %496, %cst_243 {dimension_numbers = #tpu.dot_dimension_numbers<[1], [0], [0], [1], [0, 0, 1, 1], [], []>} : vector<64x32xbf16>, vector<32x256xbf16>, vector<64x256xf32> -> vector<64x256xf32>
    %c32_244 = arith.constant 32 : index
    %c0_245 = arith.constant 0 : index
    %498 = vector.load %arg10[%c32_244, %c0_245] : memref<64x256xbf16, #tpu.memory_space<vmem>>, vector<32x256xbf16>
    %cst_246 = arith.constant dense<0.000000e+00> : vector<64x256xf32>
    %499 = tpu.matmul %486, %498, %cst_246 {dimension_numbers = #tpu.dot_dimension_numbers<[1], [0], [0], [1], [0, 0, 1, 1], [], []>} : vector<64x32xbf16>, vector<32x256xbf16>, vector<64x256xf32> -> vector<64x256xf32>
    %500 = arith.addf %497, %499 : vector<64x256xf32>
    %c0_247 = arith.constant 0 : index
    %c0_248 = arith.constant 0 : index
    %501 = vector.load %arg19[%c0_247, %c0_248] : memref<64x256xf32, #tpu.memory_space<vmem>>, vector<64x256xf32>
    tpu.vector_store %arg19[%c0_247, %c0_248], %500 {strides = array<i32>} : memref<64x256xf32, #tpu.memory_space<vmem>>, vector<64x256xf32>,
    %c0_249 = arith.constant 0 : index
    %c0_250 = arith.constant 0 : index
    %502 = vector.load %arg12[%c0_249, %c0_250] : memref<64x256xbf16, #tpu.memory_space<vmem>>, vector<64x256xbf16>
    %cst_251 = arith.constant 0.000000e+00 : f32
    %503 = vector.broadcast %cst_251 : f32 to vector<8x64xf32>
    %cst_252 = arith.constant 0.000000e+00 : f32
    %504 = vector.broadcast %cst_252 : f32 to vector<8x64xf32>
    %c0_253 = arith.constant 0 : index
    %c0_254 = arith.constant 0 : index
    %505 = vector.load %arg18[%c0_253, %c0_254] : memref<64x256xf32, #tpu.memory_space<vmem>>, vector<8x256xf32>
    %c56_255 = arith.constant 56 : index
    %c0_256 = arith.constant 0 : index
    %506 = vector.load %arg19[%c56_255, %c0_256] : memref<64x256xf32, #tpu.memory_space<vmem>>, vector<8x256xf32>
    %507 = arith.addf %505, %506 : vector<8x256xf32>
    %508 = arith.truncf %503 : vector<8x64xf32> to vector<8x64xbf16>
    %cst_257 = arith.constant dense<0.000000e+00> : vector<8x256xf32>
    %509 = tpu.matmul %508, %502, %cst_257 {dimension_numbers = #tpu.dot_dimension_numbers<[1], [0], [0], [1], [0, 0, 1, 1], [], []>} : vector<8x64xbf16>, vector<64x256xbf16>, vector<8x256xf32> -> vector<8x256xf32>
    %510 = arith.addf %507, %509 : vector<8x256xf32>
    %511 = arith.negf %510 : vector<8x256xf32>
    %512 = math.exp %511 : vector<8x256xf32>
    %cst_258 = arith.constant 1.000000e+00 : f32
    %513 = vector.broadcast %cst_258 : f32 to vector<8x256xf32>
    %514 = arith.addf %513, %512 : vector<8x256xf32>
    %515 = arith.divf %513, %514 : vector<8x256xf32>
    %516 = vector.extract_strided_slice %515 {offsets = [0, 0], sizes = [8, 64], strides = [1, 1]} : vector<8x256xf32> to vector<8x64xf32>
    %517 = vector.extract_strided_slice %515 {offsets = [0, 64], sizes = [8, 64], strides = [1, 1]} : vector<8x256xf32> to vector<8x64xf32>
    %518 = vector.extract_strided_slice %515 {offsets = [0, 128], sizes = [8, 64], strides = [1, 1]} : vector<8x256xf32> to vector<8x64xf32>
    %cst_259 = arith.constant 2.000000e+00 : f32
    %519 = vector.broadcast %cst_259 : f32 to vector<8x64xf32>
    %520 = arith.mulf %519, %518 : vector<8x64xf32>
    %cst_260 = arith.constant 1.000000e+00 : f32
    %521 = vector.broadcast %cst_260 : f32 to vector<8x64xf32>
    %522 = arith.subf %520, %521 : vector<8x64xf32>
    %523 = vector.extract_strided_slice %515 {offsets = [0, 192], sizes = [8, 64], strides = [1, 1]} : vector<8x256xf32> to vector<8x64xf32>
    %524 = arith.mulf %517, %504 : vector<8x64xf32>
    %525 = arith.mulf %516, %522 : vector<8x64xf32>
    %526 = arith.addf %524, %525 : vector<8x64xf32>
    %527 = math.tanh %526 : vector<8x64xf32>
    %528 = arith.mulf %523, %527 : vector<8x64xf32>
    %529 = vector.extract_strided_slice %528 {offsets = [0, 0], sizes = [8, 32], strides = [1, 1]} : vector<8x64xf32> to vector<8x32xf32>
    %c0_261 = arith.constant 0 : index
    %c0_262 = arith.constant 0 : index
    %530 = vector.load %arg16[%c0_261, %c0_262] : memref<64x32xf32, #tpu.memory_space<vmem>>, vector<8x32xf32>
    tpu.vector_store %arg16[%c0_261, %c0_262], %529 {strides = array<i32>} : memref<64x32xf32, #tpu.memory_space<vmem>>, vector<8x32xf32>,
    %531 = vector.extract_strided_slice %528 {offsets = [0, 32], sizes = [8, 32], strides = [1, 1]} : vector<8x64xf32> to vector<8x32xf32>
    %c56_263 = arith.constant 56 : index
    %c0_264 = arith.constant 0 : index
    %532 = vector.load %arg17[%c56_263, %c0_264] : memref<64x32xf32, #tpu.memory_space<vmem>>, vector<8x32xf32>
    tpu.vector_store %arg17[%c56_263, %c0_264], %531 {strides = array<i32>} : memref<64x32xf32, #tpu.memory_space<vmem>>, vector<8x32xf32>,
    %c8_265 = arith.constant 8 : index
    %c0_266 = arith.constant 0 : index
    %533 = vector.load %arg18[%c8_265, %c0_266] : memref<64x256xf32, #tpu.memory_space<vmem>>, vector<8x256xf32>
    %c48_267 = arith.constant 48 : index
    %c0_268 = arith.constant 0 : index
    %534 = vector.load %arg19[%c48_267, %c0_268] : memref<64x256xf32, #tpu.memory_space<vmem>>, vector<8x256xf32>
    %535 = arith.addf %533, %534 : vector<8x256xf32>
    %536 = arith.truncf %528 : vector<8x64xf32> to vector<8x64xbf16>
    %cst_269 = arith.constant dense<0.000000e+00> : vector<8x256xf32>
    %537 = tpu.matmul %536, %502, %cst_269 {dimension_numbers = #tpu.dot_dimension_numbers<[1], [0], [0], [1], [0, 0, 1, 1], [], []>} : vector<8x64xbf16>, vector<64x256xbf16>, vector<8x256xf32> -> vector<8x256xf32>
    %538 = arith.addf %535, %537 : vector<8x256xf32>
    %539 = arith.negf %538 : vector<8x256xf32>
    %540 = math.exp %539 : vector<8x256xf32>
    %cst_270 = arith.constant 1.000000e+00 : f32
    %541 = vector.broadcast %cst_270 : f32 to vector<8x256xf32>
    %542 = arith.addf %541, %540 : vector<8x256xf32>
    %543 = arith.divf %541, %542 : vector<8x256xf32>
    %544 = vector.extract_strided_slice %543 {offsets = [0, 0], sizes = [8, 64], strides = [1, 1]} : vector<8x256xf32> to vector<8x64xf32>
    %545 = vector.extract_strided_slice %543 {offsets = [0, 64], sizes = [8, 64], strides = [1, 1]} : vector<8x256xf32> to vector<8x64xf32>
    %546 = vector.extract_strided_slice %543 {offsets = [0, 128], sizes = [8, 64], strides = [1, 1]} : vector<8x256xf32> to vector<8x64xf32>
    %cst_271 = arith.constant 2.000000e+00 : f32
    %547 = vector.broadcast %cst_271 : f32 to vector<8x64xf32>
    %548 = arith.mulf %547, %546 : vector<8x64xf32>
    %cst_272 = arith.constant 1.000000e+00 : f32
    %549 = vector.broadcast %cst_272 : f32 to vector<8x64xf32>
    %550 = arith.subf %548, %549 : vector<8x64xf32>
    %551 = vector.extract_strided_slice %543 {offsets = [0, 192], sizes = [8, 64], strides = [1, 1]} : vector<8x256xf32> to vector<8x64xf32>
    %552 = arith.mulf %545, %526 : vector<8x64xf32>
    %553 = arith.mulf %544, %550 : vector<8x64xf32>
    %554 = arith.addf %552, %553 : vector<8x64xf32>
    %555 = math.tanh %554 : vector<8x64xf32>
    %556 = arith.mulf %551, %555 : vector<8x64xf32>
    %557 = vector.extract_strided_slice %556 {offsets = [0, 0], sizes = [8, 32], strides = [1, 1]} : vector<8x64xf32> to vector<8x32xf32>
    %c8_273 = arith.constant 8 : index
    %c0_274 = arith.constant 0 : index
    %558 = vector.load %arg16[%c8_273, %c0_274] : memref<64x32xf32, #tpu.memory_space<vmem>>, vector<8x32xf32>
    tpu.vector_store %arg16[%c8_273, %c0_274], %557 {strides = array<i32>} : memref<64x32xf32, #tpu.memory_space<vmem>>, vector<8x32xf32>,
    %559 = vector.extract_strided_slice %556 {offsets = [0, 32], sizes = [8, 32], strides = [1, 1]} : vector<8x64xf32> to vector<8x32xf32>
    %c48_275 = arith.constant 48 : index
    %c0_276 = arith.constant 0 : index
    %560 = vector.load %arg17[%c48_275, %c0_276] : memref<64x32xf32, #tpu.memory_space<vmem>>, vector<8x32xf32>
    tpu.vector_store %arg17[%c48_275, %c0_276], %559 {strides = array<i32>} : memref<64x32xf32, #tpu.memory_space<vmem>>, vector<8x32xf32>,
    %c16_277 = arith.constant 16 : index
    %c0_278 = arith.constant 0 : index
    %561 = vector.load %arg18[%c16_277, %c0_278] : memref<64x256xf32, #tpu.memory_space<vmem>>, vector<8x256xf32>
    %c40_279 = arith.constant 40 : index
    %c0_280 = arith.constant 0 : index
    %562 = vector.load %arg19[%c40_279, %c0_280] : memref<64x256xf32, #tpu.memory_space<vmem>>, vector<8x256xf32>
    %563 = arith.addf %561, %562 : vector<8x256xf32>
    %564 = arith.truncf %556 : vector<8x64xf32> to vector<8x64xbf16>
    %cst_281 = arith.constant dense<0.000000e+00> : vector<8x256xf32>
    %565 = tpu.matmul %564, %502, %cst_281 {dimension_numbers = #tpu.dot_dimension_numbers<[1], [0], [0], [1], [0, 0, 1, 1], [], []>} : vector<8x64xbf16>, vector<64x256xbf16>, vector<8x256xf32> -> vector<8x256xf32>
    %566 = arith.addf %563, %565 : vector<8x256xf32>
    %567 = arith.negf %566 : vector<8x256xf32>
    %568 = math.exp %567 : vector<8x256xf32>
    %cst_282 = arith.constant 1.000000e+00 : f32
    %569 = vector.broadcast %cst_282 : f32 to vector<8x256xf32>
    %570 = arith.addf %569, %568 : vector<8x256xf32>
    %571 = arith.divf %569, %570 : vector<8x256xf32>
    %572 = vector.extract_strided_slice %571 {offsets = [0, 0], sizes = [8, 64], strides = [1, 1]} : vector<8x256xf32> to vector<8x64xf32>
    %573 = vector.extract_strided_slice %571 {offsets = [0, 64], sizes = [8, 64], strides = [1, 1]} : vector<8x256xf32> to vector<8x64xf32>
    %574 = vector.extract_strided_slice %571 {offsets = [0, 128], sizes = [8, 64], strides = [1, 1]} : vector<8x256xf32> to vector<8x64xf32>
    %cst_283 = arith.constant 2.000000e+00 : f32
    %575 = vector.broadcast %cst_283 : f32 to vector<8x64xf32>
    %576 = arith.mulf %575, %574 : vector<8x64xf32>
    %cst_284 = arith.constant 1.000000e+00 : f32
    %577 = vector.broadcast %cst_284 : f32 to vector<8x64xf32>
    %578 = arith.subf %576, %577 : vector<8x64xf32>
    %579 = vector.extract_strided_slice %571 {offsets = [0, 192], sizes = [8, 64], strides = [1, 1]} : vector<8x256xf32> to vector<8x64xf32>
    %580 = arith.mulf %573, %554 : vector<8x64xf32>
    %581 = arith.mulf %572, %578 : vector<8x64xf32>
    %582 = arith.addf %580, %581 : vector<8x64xf32>
    %583 = math.tanh %582 : vector<8x64xf32>
    %584 = arith.mulf %579, %583 : vector<8x64xf32>
    %585 = vector.extract_strided_slice %584 {offsets = [0, 0], sizes = [8, 32], strides = [1, 1]} : vector<8x64xf32> to vector<8x32xf32>
    %c16_285 = arith.constant 16 : index
    %c0_286 = arith.constant 0 : index
    %586 = vector.load %arg16[%c16_285, %c0_286] : memref<64x32xf32, #tpu.memory_space<vmem>>, vector<8x32xf32>
    tpu.vector_store %arg16[%c16_285, %c0_286], %585 {strides = array<i32>} : memref<64x32xf32, #tpu.memory_space<vmem>>, vector<8x32xf32>,
    %587 = vector.extract_strided_slice %584 {offsets = [0, 32], sizes = [8, 32], strides = [1, 1]} : vector<8x64xf32> to vector<8x32xf32>
    %c40_287 = arith.constant 40 : index
    %c0_288 = arith.constant 0 : index
    %588 = vector.load %arg17[%c40_287, %c0_288] : memref<64x32xf32, #tpu.memory_space<vmem>>, vector<8x32xf32>
    tpu.vector_store %arg17[%c40_287, %c0_288], %587 {strides = array<i32>} : memref<64x32xf32, #tpu.memory_space<vmem>>, vector<8x32xf32>,
    %c24_289 = arith.constant 24 : index
    %c0_290 = arith.constant 0 : index
    %589 = vector.load %arg18[%c24_289, %c0_290] : memref<64x256xf32, #tpu.memory_space<vmem>>, vector<8x256xf32>
    %c32_291 = arith.constant 32 : index
    %c0_292 = arith.constant 0 : index
    %590 = vector.load %arg19[%c32_291, %c0_292] : memref<64x256xf32, #tpu.memory_space<vmem>>, vector<8x256xf32>
    %591 = arith.addf %589, %590 : vector<8x256xf32>
    %592 = arith.truncf %584 : vector<8x64xf32> to vector<8x64xbf16>
    %cst_293 = arith.constant dense<0.000000e+00> : vector<8x256xf32>
    %593 = tpu.matmul %592, %502, %cst_293 {dimension_numbers = #tpu.dot_dimension_numbers<[1], [0], [0], [1], [0, 0, 1, 1], [], []>} : vector<8x64xbf16>, vector<64x256xbf16>, vector<8x256xf32> -> vector<8x256xf32>
    %594 = arith.addf %591, %593 : vector<8x256xf32>
    %595 = arith.negf %594 : vector<8x256xf32>
    %596 = math.exp %595 : vector<8x256xf32>
    %cst_294 = arith.constant 1.000000e+00 : f32
    %597 = vector.broadcast %cst_294 : f32 to vector<8x256xf32>
    %598 = arith.addf %597, %596 : vector<8x256xf32>
    %599 = arith.divf %597, %598 : vector<8x256xf32>
    %600 = vector.extract_strided_slice %599 {offsets = [0, 0], sizes = [8, 64], strides = [1, 1]} : vector<8x256xf32> to vector<8x64xf32>
    %601 = vector.extract_strided_slice %599 {offsets = [0, 64], sizes = [8, 64], strides = [1, 1]} : vector<8x256xf32> to vector<8x64xf32>
    %602 = vector.extract_strided_slice %599 {offsets = [0, 128], sizes = [8, 64], strides = [1, 1]} : vector<8x256xf32> to vector<8x64xf32>
    %cst_295 = arith.constant 2.000000e+00 : f32
    %603 = vector.broadcast %cst_295 : f32 to vector<8x64xf32>
    %604 = arith.mulf %603, %602 : vector<8x64xf32>
    %cst_296 = arith.constant 1.000000e+00 : f32
    %605 = vector.broadcast %cst_296 : f32 to vector<8x64xf32>
    %606 = arith.subf %604, %605 : vector<8x64xf32>
    %607 = vector.extract_strided_slice %599 {offsets = [0, 192], sizes = [8, 64], strides = [1, 1]} : vector<8x256xf32> to vector<8x64xf32>
    %608 = arith.mulf %601, %582 : vector<8x64xf32>
    %609 = arith.mulf %600, %606 : vector<8x64xf32>
    %610 = arith.addf %608, %609 : vector<8x64xf32>
    %611 = math.tanh %610 : vector<8x64xf32>
    %612 = arith.mulf %607, %611 : vector<8x64xf32>
    %613 = vector.extract_strided_slice %612 {offsets = [0, 0], sizes = [8, 32], strides = [1, 1]} : vector<8x64xf32> to vector<8x32xf32>
    %c24_297 = arith.constant 24 : index
    %c0_298 = arith.constant 0 : index
    %614 = vector.load %arg16[%c24_297, %c0_298] : memref<64x32xf32, #tpu.memory_space<vmem>>, vector<8x32xf32>
    tpu.vector_store %arg16[%c24_297, %c0_298], %613 {strides = array<i32>} : memref<64x32xf32, #tpu.memory_space<vmem>>, vector<8x32xf32>,
    %615 = vector.extract_strided_slice %612 {offsets = [0, 32], sizes = [8, 32], strides = [1, 1]} : vector<8x64xf32> to vector<8x32xf32>
    %c32_299 = arith.constant 32 : index
    %c0_300 = arith.constant 0 : index
    %616 = vector.load %arg17[%c32_299, %c0_300] : memref<64x32xf32, #tpu.memory_space<vmem>>, vector<8x32xf32>
    tpu.vector_store %arg17[%c32_299, %c0_300], %615 {strides = array<i32>} : memref<64x32xf32, #tpu.memory_space<vmem>>, vector<8x32xf32>,
    %c32_301 = arith.constant 32 : index
    %c0_302 = arith.constant 0 : index
    %617 = vector.load %arg18[%c32_301, %c0_302] : memref<64x256xf32, #tpu.memory_space<vmem>>, vector<8x256xf32>
    %c24_303 = arith.constant 24 : index
    %c0_304 = arith.constant 0 : index
    %618 = vector.load %arg19[%c24_303, %c0_304] : memref<64x256xf32, #tpu.memory_space<vmem>>, vector<8x256xf32>
    %619 = arith.addf %617, %618 : vector<8x256xf32>
    %620 = arith.truncf %612 : vector<8x64xf32> to vector<8x64xbf16>
    %cst_305 = arith.constant dense<0.000000e+00> : vector<8x256xf32>
    %621 = tpu.matmul %620, %502, %cst_305 {dimension_numbers = #tpu.dot_dimension_numbers<[1], [0], [0], [1], [0, 0, 1, 1], [], []>} : vector<8x64xbf16>, vector<64x256xbf16>, vector<8x256xf32> -> vector<8x256xf32>
    %622 = arith.addf %619, %621 : vector<8x256xf32>
    %623 = arith.negf %622 : vector<8x256xf32>
    %624 = math.exp %623 : vector<8x256xf32>
    %cst_306 = arith.constant 1.000000e+00 : f32
    %625 = vector.broadcast %cst_306 : f32 to vector<8x256xf32>
    %626 = arith.addf %625, %624 : vector<8x256xf32>
    %627 = arith.divf %625, %626 : vector<8x256xf32>
    %628 = vector.extract_strided_slice %627 {offsets = [0, 0], sizes = [8, 64], strides = [1, 1]} : vector<8x256xf32> to vector<8x64xf32>
    %629 = vector.extract_strided_slice %627 {offsets = [0, 64], sizes = [8, 64], strides = [1, 1]} : vector<8x256xf32> to vector<8x64xf32>
    %630 = vector.extract_strided_slice %627 {offsets = [0, 128], sizes = [8, 64], strides = [1, 1]} : vector<8x256xf32> to vector<8x64xf32>
    %cst_307 = arith.constant 2.000000e+00 : f32
    %631 = vector.broadcast %cst_307 : f32 to vector<8x64xf32>
    %632 = arith.mulf %631, %630 : vector<8x64xf32>
    %cst_308 = arith.constant 1.000000e+00 : f32
    %633 = vector.broadcast %cst_308 : f32 to vector<8x64xf32>
    %634 = arith.subf %632, %633 : vector<8x64xf32>
    %635 = vector.extract_strided_slice %627 {offsets = [0, 192], sizes = [8, 64], strides = [1, 1]} : vector<8x256xf32> to vector<8x64xf32>
    %636 = arith.mulf %629, %610 : vector<8x64xf32>
    %637 = arith.mulf %628, %634 : vector<8x64xf32>
    %638 = arith.addf %636, %637 : vector<8x64xf32>
    %639 = math.tanh %638 : vector<8x64xf32>
    %640 = arith.mulf %635, %639 : vector<8x64xf32>
    %641 = vector.extract_strided_slice %640 {offsets = [0, 0], sizes = [8, 32], strides = [1, 1]} : vector<8x64xf32> to vector<8x32xf32>
    %c32_309 = arith.constant 32 : index
    %c0_310 = arith.constant 0 : index
    %642 = vector.load %arg16[%c32_309, %c0_310] : memref<64x32xf32, #tpu.memory_space<vmem>>, vector<8x32xf32>
    tpu.vector_store %arg16[%c32_309, %c0_310], %641 {strides = array<i32>} : memref<64x32xf32, #tpu.memory_space<vmem>>, vector<8x32xf32>,
    %643 = vector.extract_strided_slice %640 {offsets = [0, 32], sizes = [8, 32], strides = [1, 1]} : vector<8x64xf32> to vector<8x32xf32>
    %c24_311 = arith.constant 24 : index
    %c0_312 = arith.constant 0 : index
    %644 = vector.load %arg17[%c24_311, %c0_312] : memref<64x32xf32, #tpu.memory_space<vmem>>, vector<8x32xf32>
    tpu.vector_store %arg17[%c24_311, %c0_312], %643 {strides = array<i32>} : memref<64x32xf32, #tpu.memory_space<vmem>>, vector<8x32xf32>,
    %c40_313 = arith.constant 40 : index
    %c0_314 = arith.constant 0 : index
    %645 = vector.load %arg18[%c40_313, %c0_314] : memref<64x256xf32, #tpu.memory_space<vmem>>, vector<8x256xf32>
    %c16_315 = arith.constant 16 : index
    %c0_316 = arith.constant 0 : index
    %646 = vector.load %arg19[%c16_315, %c0_316] : memref<64x256xf32, #tpu.memory_space<vmem>>, vector<8x256xf32>
    %647 = arith.addf %645, %646 : vector<8x256xf32>
    %648 = arith.truncf %640 : vector<8x64xf32> to vector<8x64xbf16>
    %cst_317 = arith.constant dense<0.000000e+00> : vector<8x256xf32>
    %649 = tpu.matmul %648, %502, %cst_317 {dimension_numbers = #tpu.dot_dimension_numbers<[1], [0], [0], [1], [0, 0, 1, 1], [], []>} : vector<8x64xbf16>, vector<64x256xbf16>, vector<8x256xf32> -> vector<8x256xf32>
    %650 = arith.addf %647, %649 : vector<8x256xf32>
    %651 = arith.negf %650 : vector<8x256xf32>
    %652 = math.exp %651 : vector<8x256xf32>
    %cst_318 = arith.constant 1.000000e+00 : f32
    %653 = vector.broadcast %cst_318 : f32 to vector<8x256xf32>
    %654 = arith.addf %653, %652 : vector<8x256xf32>
    %655 = arith.divf %653, %654 : vector<8x256xf32>
    %656 = vector.extract_strided_slice %655 {offsets = [0, 0], sizes = [8, 64], strides = [1, 1]} : vector<8x256xf32> to vector<8x64xf32>
    %657 = vector.extract_strided_slice %655 {offsets = [0, 64], sizes = [8, 64], strides = [1, 1]} : vector<8x256xf32> to vector<8x64xf32>
    %658 = vector.extract_strided_slice %655 {offsets = [0, 128], sizes = [8, 64], strides = [1, 1]} : vector<8x256xf32> to vector<8x64xf32>
    %cst_319 = arith.constant 2.000000e+00 : f32
    %659 = vector.broadcast %cst_319 : f32 to vector<8x64xf32>
    %660 = arith.mulf %659, %658 : vector<8x64xf32>
    %cst_320 = arith.constant 1.000000e+00 : f32
    %661 = vector.broadcast %cst_320 : f32 to vector<8x64xf32>
    %662 = arith.subf %660, %661 : vector<8x64xf32>
    %663 = vector.extract_strided_slice %655 {offsets = [0, 192], sizes = [8, 64], strides = [1, 1]} : vector<8x256xf32> to vector<8x64xf32>
    %664 = arith.mulf %657, %638 : vector<8x64xf32>
    %665 = arith.mulf %656, %662 : vector<8x64xf32>
    %666 = arith.addf %664, %665 : vector<8x64xf32>
    %667 = math.tanh %666 : vector<8x64xf32>
    %668 = arith.mulf %663, %667 : vector<8x64xf32>
    %669 = vector.extract_strided_slice %668 {offsets = [0, 0], sizes = [8, 32], strides = [1, 1]} : vector<8x64xf32> to vector<8x32xf32>
    %c40_321 = arith.constant 40 : index
    %c0_322 = arith.constant 0 : index
    %670 = vector.load %arg16[%c40_321, %c0_322] : memref<64x32xf32, #tpu.memory_space<vmem>>, vector<8x32xf32>
    tpu.vector_store %arg16[%c40_321, %c0_322], %669 {strides = array<i32>} : memref<64x32xf32, #tpu.memory_space<vmem>>, vector<8x32xf32>,
    %671 = vector.extract_strided_slice %668 {offsets = [0, 32], sizes = [8, 32], strides = [1, 1]} : vector<8x64xf32> to vector<8x32xf32>
    %c16_323 = arith.constant 16 : index
    %c0_324 = arith.constant 0 : index
    %672 = vector.load %arg17[%c16_323, %c0_324] : memref<64x32xf32, #tpu.memory_space<vmem>>, vector<8x32xf32>
    tpu.vector_store %arg17[%c16_323, %c0_324], %671 {strides = array<i32>} : memref<64x32xf32, #tpu.memory_space<vmem>>, vector<8x32xf32>,
    %c48_325 = arith.constant 48 : index
    %c0_326 = arith.constant 0 : index
    %673 = vector.load %arg18[%c48_325, %c0_326] : memref<64x256xf32, #tpu.memory_space<vmem>>, vector<8x256xf32>
    %c8_327 = arith.constant 8 : index
    %c0_328 = arith.constant 0 : index
    %674 = vector.load %arg19[%c8_327, %c0_328] : memref<64x256xf32, #tpu.memory_space<vmem>>, vector<8x256xf32>
    %675 = arith.addf %673, %674 : vector<8x256xf32>
    %676 = arith.truncf %668 : vector<8x64xf32> to vector<8x64xbf16>
    %cst_329 = arith.constant dense<0.000000e+00> : vector<8x256xf32>
    %677 = tpu.matmul %676, %502, %cst_329 {dimension_numbers = #tpu.dot_dimension_numbers<[1], [0], [0], [1], [0, 0, 1, 1], [], []>} : vector<8x64xbf16>, vector<64x256xbf16>, vector<8x256xf32> -> vector<8x256xf32>
    %678 = arith.addf %675, %677 : vector<8x256xf32>
    %679 = arith.negf %678 : vector<8x256xf32>
    %680 = math.exp %679 : vector<8x256xf32>
    %cst_330 = arith.constant 1.000000e+00 : f32
    %681 = vector.broadcast %cst_330 : f32 to vector<8x256xf32>
    %682 = arith.addf %681, %680 : vector<8x256xf32>
    %683 = arith.divf %681, %682 : vector<8x256xf32>
    %684 = vector.extract_strided_slice %683 {offsets = [0, 0], sizes = [8, 64], strides = [1, 1]} : vector<8x256xf32> to vector<8x64xf32>
    %685 = vector.extract_strided_slice %683 {offsets = [0, 64], sizes = [8, 64], strides = [1, 1]} : vector<8x256xf32> to vector<8x64xf32>
    %686 = vector.extract_strided_slice %683 {offsets = [0, 128], sizes = [8, 64], strides = [1, 1]} : vector<8x256xf32> to vector<8x64xf32>
    %cst_331 = arith.constant 2.000000e+00 : f32
    %687 = vector.broadcast %cst_331 : f32 to vector<8x64xf32>
    %688 = arith.mulf %687, %686 : vector<8x64xf32>
    %cst_332 = arith.constant 1.000000e+00 : f32
    %689 = vector.broadcast %cst_332 : f32 to vector<8x64xf32>
    %690 = arith.subf %688, %689 : vector<8x64xf32>
    %691 = vector.extract_strided_slice %683 {offsets = [0, 192], sizes = [8, 64], strides = [1, 1]} : vector<8x256xf32> to vector<8x64xf32>
    %692 = arith.mulf %685, %666 : vector<8x64xf32>
    %693 = arith.mulf %684, %690 : vector<8x64xf32>
    %694 = arith.addf %692, %693 : vector<8x64xf32>
    %695 = math.tanh %694 : vector<8x64xf32>
    %696 = arith.mulf %691, %695 : vector<8x64xf32>
    %697 = vector.extract_strided_slice %696 {offsets = [0, 0], sizes = [8, 32], strides = [1, 1]} : vector<8x64xf32> to vector<8x32xf32>
    %c48_333 = arith.constant 48 : index
    %c0_334 = arith.constant 0 : index
    %698 = vector.load %arg16[%c48_333, %c0_334] : memref<64x32xf32, #tpu.memory_space<vmem>>, vector<8x32xf32>
    tpu.vector_store %arg16[%c48_333, %c0_334], %697 {strides = array<i32>} : memref<64x32xf32, #tpu.memory_space<vmem>>, vector<8x32xf32>,
    %699 = vector.extract_strided_slice %696 {offsets = [0, 32], sizes = [8, 32], strides = [1, 1]} : vector<8x64xf32> to vector<8x32xf32>
    %c8_335 = arith.constant 8 : index
    %c0_336 = arith.constant 0 : index
    %700 = vector.load %arg17[%c8_335, %c0_336] : memref<64x32xf32, #tpu.memory_space<vmem>>, vector<8x32xf32>
    tpu.vector_store %arg17[%c8_335, %c0_336], %699 {strides = array<i32>} : memref<64x32xf32, #tpu.memory_space<vmem>>, vector<8x32xf32>,
    %c56_337 = arith.constant 56 : index
    %c0_338 = arith.constant 0 : index
    %701 = vector.load %arg18[%c56_337, %c0_338] : memref<64x256xf32, #tpu.memory_space<vmem>>, vector<8x256xf32>
    %c0_339 = arith.constant 0 : index
    %c0_340 = arith.constant 0 : index
    %702 = vector.load %arg19[%c0_339, %c0_340] : memref<64x256xf32, #tpu.memory_space<vmem>>, vector<8x256xf32>
    %703 = arith.addf %701, %702 : vector<8x256xf32>
    %704 = arith.truncf %696 : vector<8x64xf32> to vector<8x64xbf16>
    %cst_341 = arith.constant dense<0.000000e+00> : vector<8x256xf32>
    %705 = tpu.matmul %704, %502, %cst_341 {dimension_numbers = #tpu.dot_dimension_numbers<[1], [0], [0], [1], [0, 0, 1, 1], [], []>} : vector<8x64xbf16>, vector<64x256xbf16>, vector<8x256xf32> -> vector<8x256xf32>
    %706 = arith.addf %703, %705 : vector<8x256xf32>
    %707 = arith.negf %706 : vector<8x256xf32>
    %708 = math.exp %707 : vector<8x256xf32>
    %cst_342 = arith.constant 1.000000e+00 : f32
    %709 = vector.broadcast %cst_342 : f32 to vector<8x256xf32>
    %710 = arith.addf %709, %708 : vector<8x256xf32>
    %711 = arith.divf %709, %710 : vector<8x256xf32>
    %712 = vector.extract_strided_slice %711 {offsets = [0, 0], sizes = [8, 64], strides = [1, 1]} : vector<8x256xf32> to vector<8x64xf32>
    %713 = vector.extract_strided_slice %711 {offsets = [0, 64], sizes = [8, 64], strides = [1, 1]} : vector<8x256xf32> to vector<8x64xf32>
    %714 = vector.extract_strided_slice %711 {offsets = [0, 128], sizes = [8, 64], strides = [1, 1]} : vector<8x256xf32> to vector<8x64xf32>
    %cst_343 = arith.constant 2.000000e+00 : f32
    %715 = vector.broadcast %cst_343 : f32 to vector<8x64xf32>
    %716 = arith.mulf %715, %714 : vector<8x64xf32>
    %cst_344 = arith.constant 1.000000e+00 : f32
    %717 = vector.broadcast %cst_344 : f32 to vector<8x64xf32>
    %718 = arith.subf %716, %717 : vector<8x64xf32>
    %719 = vector.extract_strided_slice %711 {offsets = [0, 192], sizes = [8, 64], strides = [1, 1]} : vector<8x256xf32> to vector<8x64xf32>
    %720 = arith.mulf %713, %694 : vector<8x64xf32>
    %721 = arith.mulf %712, %718 : vector<8x64xf32>
    %722 = arith.addf %720, %721 : vector<8x64xf32>
    %723 = math.tanh %722 : vector<8x64xf32>
    %724 = arith.mulf %719, %723 : vector<8x64xf32>
    %725 = vector.extract_strided_slice %724 {offsets = [0, 0], sizes = [8, 32], strides = [1, 1]} : vector<8x64xf32> to vector<8x32xf32>
    %c56_345 = arith.constant 56 : index
    %c0_346 = arith.constant 0 : index
    %726 = vector.load %arg16[%c56_345, %c0_346] : memref<64x32xf32, #tpu.memory_space<vmem>>, vector<8x32xf32>
    tpu.vector_store %arg16[%c56_345, %c0_346], %725 {strides = array<i32>} : memref<64x32xf32, #tpu.memory_space<vmem>>, vector<8x32xf32>,
    %727 = vector.extract_strided_slice %724 {offsets = [0, 32], sizes = [8, 32], strides = [1, 1]} : vector<8x64xf32> to vector<8x32xf32>
    %c0_347 = arith.constant 0 : index
    %c0_348 = arith.constant 0 : index
    %728 = vector.load %arg17[%c0_347, %c0_348] : memref<64x32xf32, #tpu.memory_space<vmem>>, vector<8x32xf32>
    tpu.vector_store %arg17[%c0_347, %c0_348], %727 {strides = array<i32>} : memref<64x32xf32, #tpu.memory_space<vmem>>, vector<8x32xf32>,
    %c56_349 = arith.constant 56 : index
    %c0_350 = arith.constant 0 : index
    %729 = vector.load %arg16[%c56_349, %c0_350] : memref<64x32xf32, #tpu.memory_space<vmem>>, vector<8x32xf32>
    %c56_351 = arith.constant 56 : index
    %c0_352 = arith.constant 0 : index
    %730 = vector.load %arg17[%c56_351, %c0_352] : memref<64x32xf32, #tpu.memory_space<vmem>>, vector<8x32xf32>
    %c0_353 = arith.constant 0 : index
    %c0_354 = arith.constant 0 : index
    %731 = vector.load %arg13[%c0_353, %c0_354] : memref<1x64xf32, #tpu.memory_space<vmem>>, vector<1x32xf32>
    %732 = vector.broadcast %731 : vector<1x32xf32> to vector<8x32xf32>
    %733 = arith.mulf %729, %732 : vector<8x32xf32>
    %cst_355 = arith.constant dense<0.000000e+00> : vector<8xf32>
    %734 = vector.multi_reduction <add>, %733, %cst_355 [1] : vector<8x32xf32> to vector<8xf32>
    %735 = vector.shape_cast %734 : vector<8xf32> to vector<8x1xf32>
    %c0_356 = arith.constant 0 : index
    %c32_357 = arith.constant 32 : index
    %736 = vector.load %arg13[%c0_356, %c32_357] : memref<1x64xf32, #tpu.memory_space<vmem>>, vector<1x32xf32>
    %737 = vector.broadcast %736 : vector<1x32xf32> to vector<8x32xf32>
    %738 = arith.mulf %730, %737 : vector<8x32xf32>
    %cst_358 = arith.constant dense<0.000000e+00> : vector<8xf32>
    %739 = vector.multi_reduction <add>, %738, %cst_358 [1] : vector<8x32xf32> to vector<8xf32>
    %740 = vector.shape_cast %739 : vector<8xf32> to vector<8x1xf32>
    %741 = arith.addf %735, %740 : vector<8x1xf32>
    %c0_359 = arith.constant 0 : index
    %c0_360 = arith.constant 0 : index
    %742 = vector.load %arg14[%c0_359, %c0_360] : memref<1x1xf32, #tpu.memory_space<vmem>>, vector<1x1xf32>
    %743 = vector.broadcast %742 : vector<1x1xf32> to vector<8x1xf32>
    %744 = arith.addf %741, %743 : vector<8x1xf32>
    %c0_361 = arith.constant 0 : index
    %c0_362 = arith.constant 0 : index
    %745 = vector.load %arg15[%c0_361, %c0_362] : memref<8x1xf32, #tpu.memory_space<vmem>>, vector<8x1xf32>
    tpu.vector_store %arg15[%c0_361, %c0_362], %744 {strides = array<i32>} : memref<8x1xf32, #tpu.memory_space<vmem>>, vector<8x1xf32>,
    return
  }
}

</mosaic_0001>

<bundles_post_ra>
// kernel: bilstm_stock_forward.1
= control target key start
LH: loop header
LB: loop body
LE: loop exit
PB: predicated region body
PF: predicated region fallthrough
CT: control target
= control target key end

     0   :  { %s5374_s0 = inlined_call_operand.vmem [shape: bf16[64,8], index: 0, kind: input, shape index: {}]   ;;  %s5375_s1 = inlined_call_operand.vmem [shape: bf16[8,256], index: 1, kind: input, shape index: {}]   ;;  %s5376_s2 = inlined_call_operand.vmem [shape: bf16[8,256], index: 2, kind: input, shape index: {}]   ;;  %s5377_s3 = inlined_call_operand.vmem [shape: f32[1,256], index: 3, kind: input, shape index: {}]   ;;  %s5378_s4 = inlined_call_operand.vmem [shape: bf16[64,256], index: 4, kind: input, shape index: {}]   ;;  %s5379_s5 = inlined_call_operand.vmem [shape: bf16[64,256], index: 5, kind: input, shape index: {}]   ;;  %s5380_s6 = inlined_call_operand.hbm [shape: bf16[64,256], index: 6, kind: input, shape index: {}]   ;;  %s5381_s7 = inlined_call_operand.vmem [shape: f32[1,256], index: 7, kind: input, shape index: {}]   ;;  %s5382_s8 = inlined_call_operand.hbm [shape: bf16[64,256], index: 8, kind: input, shape index: {}]   ;;  %s5383_s9 = inlined_call_operand.hbm [shape: bf16[64,256], index: 9, kind: input, shape index: {}]   ;;  %s5384_s10 = inlined_call_operand.hbm [shape: bf16[64,256], index: 10, kind: input, shape index: {}]   ;;  %s5385_s11 = inlined_call_operand.vmem [shape: f32[1,256], index: 11, kind: input, shape index: {}]   ;;  %s5386_s12 = inlined_call_operand.hbm [shape: bf16[64,256], index: 12, kind: input, shape index: {}]   ;;  %s5387_s13 = inlined_call_operand.vmem [shape: f32[1,64], index: 13, kind: input, shape index: {}]   ;;  %s5388_s14 = inlined_call_operand.<no memory space> [shape: f32[1,1], index: 14, kind: input, shape index: {}]   ;;  %s5389_s15 = inlined_call_operand.vmem [shape: f32[8,1], index: 15, kind: output, shape index: {}]  }
   0x1   :  { %v20_v0 = vstv %s5388_s14 }
   0x2   :  { %21 = vst [vmem:[#allocation6] sm:$0x1] %v20_v0 }
   0x3   :  { %22 = vsyncpa [#allocation8], 0 }
   0x4   :  { %23 = vsyncpa [#allocation10], 0 }
   0x5   :  { %24 = vsyncpa [#allocation13], 0  ;;  %s4297_s20 = smov [#allocation9]   ;;  %s4298_s22 = smov [#allocation12]  }
   0x6   :  { %s56_s21 = sshll.u32 %s4297_s20, 4  ;;  %s80_s23 = sshll.u32 %s4298_s22, 4  ;;  %s57_s21 = int_to_ptr.vmem [resolvable:$true] %s56_s21  ;;  %s81_s23 = int_to_ptr.vmem [resolvable:$true] %s80_s23 }
   0x7   :  { %s4199_s24 = scalar_lea.vmem %s57_s21, 1024  ;;  %p4204_p1 = scmp.lt.s32.totalorder %s57_s21, %s57_s21 }
   0x8   :  { %p4200_p0 = scmp.ne.s32.totalorder %s57_s21, %s4199_s24  ;;  %p4205_p2 = scmp.lt.s32.totalorder %s4199_s24, %s4199_s24 }
   0xa   :  { %p4206_p3 = por %p4205_p2, %p4204_p1 }
   0xc   :  { %p4207_p4 = pnand %p4206_p3, %p4200_p0 }
   0xe   :  { %4210 = shalt.err (!%p4207_p4)
}
   0xf   :  { %s4299_s25 = smov 128   ;;  %s4300_s26 = smov 8  }
  0x10   :  { %62 = dma.hbm_to_vmem [thread:$0]  %s5382_s8, 1024, %s57_s21, [#allocation10], %s4299_s25, %s4299_s25, %s4300_s26  }
  0x11   :  { %s4219_s28 = scalar_lea.vmem %s81_s23, 1024  ;;  %p4224_p6 = scmp.lt.s32.totalorder %s81_s23, %s81_s23 }
  0x12   :  { %p4220_p5 = scmp.ne.s32.totalorder %s81_s23, %s4219_s28  ;;  %p4225_p7 = scmp.lt.s32.totalorder %s4219_s28, %s4219_s28 }
  0x14   :  { %p4226_p8 = por %p4225_p7, %p4224_p6 }
  0x16   :  { %p4227_p9 = pnand %p4226_p8, %p4220_p5 }
  0x18   :  { %4230 = shalt.err (!%p4227_p9)
}
  0x19   :  { %86 = dma.hbm_to_vmem [thread:$0]  %s5384_s10, 1024, %s81_s23, [#allocation13], %s4299_s25, %s4299_s25, %s4300_s26  }
  0x1a   :  { %s4301_s16 = smov [#allocation7]   ;;  %s4302_s18 = smov [#allocation11]  }
  0x1b   :  { %s42_s17 = sshll.u32 %s4301_s16, 4  ;;  %s68_s19 = sshll.u32 %s4302_s18, 4  ;;  %s43_s17 = int_to_ptr.vmem [resolvable:$true] %s42_s17  ;;  %s69_s19 = int_to_ptr.vmem [resolvable:$true] %s68_s19 }
  0x1c   :  { %s4239_s8 = scalar_lea.vmem %s43_s17, 1024  ;;  %p4244_p11 = scmp.lt.s32.totalorder %s43_s17, %s43_s17 }
  0x1d   :  { %p4240_p10 = scmp.ne.s32.totalorder %s43_s17, %s4239_s8  ;;  %p4245_p12 = scmp.lt.s32.totalorder %s4239_s8, %s4239_s8 }
  0x1f   :  { %p4246_p13 = por %p4245_p12, %p4244_p11 }
  0x21   :  { %p4247_p0 = pnand %p4246_p13, %p4240_p10 }
  0x23   :  { %4250 = shalt.err (!%p4247_p0)
}
  0x24   :  { %48 = dma.hbm_to_vmem [thread:$0]  %s5380_s6, 1024, %s43_s17, [#allocation8], %s4299_s25, %s4299_s25, %s4300_s26  }
  0x25   :  { %s4259_s10 = scalar_lea.vmem %s69_s19, 1024  ;;  %p4264_p2 = scmp.lt.s32.totalorder %s69_s19, %s69_s19 }
  0x26   :  { %p4260_p1 = scmp.ne.s32.totalorder %s69_s19, %s4259_s10  ;;  %p4265_p3 = scmp.lt.s32.totalorder %s4259_s10, %s4259_s10 }
  0x28   :  { %p4266_p4 = por %p4265_p3, %p4264_p2 }
  0x2a   :  { %p4267_p5 = pnand %p4266_p4, %p4260_p1 }
  0x2c   :  { %4270 = shalt.err (!%p4267_p5)
}
  0x2d   :  { %74 = dma.hbm_to_vmem [thread:$0]  %s5383_s9, 1024, %s69_s19, [#allocation10], %s4299_s25, %s4299_s25, %s4300_s26  }
  0x2e   :  { %s4303_s24 = smov [#allocation14]  }
  0x2f   :  { %s94_s14 = sshll.u32 %s4303_s24, 4  ;;  %s95_s14 = int_to_ptr.vmem [resolvable:$true] %s94_s14 }
  0x30   :  { %s4279_s27 = scalar_lea.vmem %s95_s14, 1024  ;;  %p4284_p7 = scmp.lt.s32.totalorder %s95_s14, %s95_s14 }
  0x31   :  { %p4280_p6 = scmp.ne.s32.totalorder %s95_s14, %s4279_s27  ;;  %p4285_p8 = scmp.lt.s32.totalorder %s4279_s27, %s4279_s27 }
  0x33   :  { %p4286_p9 = por %p4285_p8, %p4284_p7 }
  0x35   :  { %p4287_p10 = pnand %p4286_p9, %p4280_p6 }
  0x37   :  { %4290 = shalt.err (!%p4287_p10)
}
  0x38   :  { %100 = dma.hbm_to_vmem [thread:$0]  %s5386_s12, 1024, %s95_s14, [#allocation13], %s4299_s25, %s4299_s25, %s4300_s26  }
  0x39   :  { %4291 = dma.done.wait [#allocation8], 1024  }
  0x3a   :  { %4292 = vsyncadd [#allocation8], 4294966272 }
  0x3b   :  { %4293 = dma.done.wait [#allocation10], 2048  }
  0x3c   :  { %4294 = vsyncadd [#allocation10], 4294965248 }
  0x3d   :  { %4295 = dma.done.wait [#allocation13], 2048  }
  0x3e   :  { %4296 = vsyncadd [#allocation13], 4294965248  ;;  %v4304_v1 = vmov 0   ;;  %v129_v2 = vld [vmem:[%s5375_s1] sm:$0xff]  ;;  %vm180_vm0 = vcmask 1043456   ;;  %vm167_vm1 = vcmask 64512   ;;  %v132_v22 = vlaneseq }
  0x3f   :  { %219 = vmatprep.mubr.bf16.mxu0 %v4304_v1  ;;  %320 = vmatprep.mubr.bf16.mxu1 %v4304_v1  ;;  %v276_v3 = vld [vmem:[%s5376_s2] sm:$0xff]  ;;  %v3652_v4 = vcombine.high %v129_v2, %v129_v2  ;;  %v3651_v6 = vcombine.low %v129_v2, %v129_v2  ;;  %v4435_v9 = vld [vmem:[%s5378_s4 + $0x34] ss:$8 sps:$4 sm:$0xff]   ;;  %v4440_v12 = vld [vmem:[%s5378_s4 + $0x30] ss:$8 sps:$4 sm:$0xff]   ;;  %vm431_vm2 = vcmask 523264  }
  0x40   :  { %v3659_v5 = vcombine.high %v276_v3, %v276_v3  ;;  %v3658_v7 = vcombine.low %v276_v3, %v276_v3  ;;  %v3863_v8 = vld [vmem:[%s5374_s0] sm:$0xff]   ;;  %v4463_v15 = vld [vmem:[%s5378_s4 + $0x14] ss:$8 sps:$4 sm:$0xff]   ;;  %v3867_v16 = vld [vmem:[%s5374_s0 + $0x8] sm:$0xff]   ;;  %v133_v23 = vshrl.u32 %v132_v22, 7  ;;  %s4306_s25 = smov 32  }
  0x41   :  { %3653 = vmatprep.subr.msk.bf16.mxu0 %vm180_vm0, %v3652_v4  ;;  %v182_v10 = vsel %vm180_vm0, %v3651_v6, 0  ;;  %v4446_v13 = vld [vmem:[%s5378_s4 + $0x24] ss:$8 sps:$4 sm:$0xff]   ;;  %v4456_v14 = vld [vmem:[%s5378_s4 + $0x20] ss:$8 sps:$4 sm:$0xff]   ;;  %v3871_v20 = vld [vmem:[%s5374_s0 + $0x10] sm:$0xff]  }
  0x42   :  { %3660 = vmatprep.subr.msk.bf16.mxu1 %vm180_vm0, %v3659_v5  ;;  %v283_v11 = vsel %vm180_vm0, %v3658_v7, 0  ;;  %202 = vmatpush1.bf16.msra.mxu0 %v182_v10  ;;  %v4472_v17 = vld [vmem:[%s5378_s4 + $0x10] ss:$8 sps:$4 sm:$0xff]   ;;  %v4479_v18 = vld [vmem:[%s5378_s4 + $0x4] ss:$8 sps:$4 sm:$0xff]   ;;  %v4525_v24 = vsub.s32 0, %v133_v23 }
  0x43   :  { %303 = vmatpush1.bf16.msra.mxu1 %v283_v11  ;;  %443 = vmatprep.subr.bf16.mxu0 %v4435_v9  ;;  %v4488_v19 = vld [vmem:[%s5378_s4] ss:$8 sps:$4 sm:$0xff]   ;;  %v3875_v21 = vld [vmem:[%s5374_s0 + $0x18] sm:$0xff]   ;;  %v4531_v33 = vsub.s32 1, %v133_v23  ;;  %vm505_vm3 = vcmask 261120   ;;  %s4307_s30 = smov 96  }
  0x44   :  { %532 = vmatprep.subr.bf16.mxu1 %v4435_v9  ;;  %v130_v25 = vld [vmem:[%s5377_s3] sm:$0x3]  ;;  %s4305_s3 = smov 64   ;;  %vm3638_vm4 = vcmask 7168  }
  0x45   :  { %3654 = vmatmul.mubr.msk.bf16.vlgmr.msra.gmra.mxu0 %vm167_vm1, %v3863_v8  ;;  %v135_v30 = vrot.slane %v130_v25, %v4525_v24  ;;  %v139_v39 = vrot.slane %v130_v25, %v4531_v33 }
  0x46   :  { %3661 = vmatmul.mubr.msk.bf16.vlgmr.msra.gmra.mxu1 %vm167_vm1, %v3863_v8  ;;  %444 = vmatpush1.bf16.msra.mxu0 %v4440_v12 }
  0x47   :  { %229 = vmatprep.mubr.bf16.mxu0 %v4304_v1  ;;  %330 = vmatprep.mubr.bf16.mxu1 %v4304_v1 }
  0x48   :  { %445 = vmatprep.subr.bf16.mxu0 %v4446_v13  ;;  %533 = vmatpush1.bf16.msra.mxu1 %v4440_v12 }
  0x49   :  { %534 = vmatprep.subr.bf16.mxu1 %v4446_v13 }
  0x4a   :  { %446 = vmatpush1.bf16.msra.mxu0 %v4456_v14 }
  0x4b   :  { %447 = vmatprep.subr.bf16.mxu0 %v4463_v15 }
  0x4c   :  { %535 = vmatpush1.bf16.msra.mxu1 %v4456_v14 }
  0x4d   :  { %3655 = vmatmul.mubr.msk.bf16.gmra.mxu0 %vm167_vm1, %v3867_v16  ;;  %536 = vmatprep.subr.bf16.mxu1 %v4463_v15 }
  0x4e   :  { %3662 = vmatmul.mubr.msk.bf16.gmra.mxu1 %vm167_vm1, %v3867_v16  ;;  %239 = vmatprep.mubr.bf16.mxu0 %v4304_v1 }
  0x4f   :  { %340 = vmatprep.mubr.bf16.mxu1 %v4304_v1  ;;  %448 = vmatpush1.bf16.msra.mxu0 %v4472_v17 }
  0x50   :  { %449 = vmatprep.subr.bf16.mxu0 %v4479_v18  ;;  %537 = vmatpush1.bf16.msra.mxu1 %v4472_v17 }
  0x51   :  { %538 = vmatprep.subr.bf16.mxu1 %v4479_v18 }
  0x53   :  { %450 = vmatpush1.bf16.msra.mxu0 %v4488_v19 }
  0x54   :  { %539 = vmatpush1.bf16.msra.mxu1 %v4488_v19  ;;  %620 = vmatprep.subr.bf16.mxu0 %v4435_v9 }
  0x55   :  { %3656 = vmatmul.mubr.msk.bf16.gmra.mxu0 %vm167_vm1, %v3871_v20  ;;  %708 = vmatprep.subr.bf16.mxu1 %v4435_v9 }
  0x56   :  { %3663 = vmatmul.mubr.msk.bf16.gmra.mxu1 %vm167_vm1, %v3871_v20  ;;  %249 = vmatprep.mubr.bf16.mxu0 %v4304_v1 }
  0x57   :  { %350 = vmatprep.mubr.bf16.mxu1 %v4304_v1 }
  0x5d   :  { %3657 = vmatmul.mubr.msk.bf16.gmra.mxu0 %vm167_vm1, %v3875_v21 }
  0x5e   :  { %3664 = vmatmul.mubr.msk.bf16.gmra.mxu1 %vm167_vm1, %v3875_v21  ;;  %467 = vmatprep.mubr.bf16.mxu0 %v4304_v1 }
  0x5f   :  { %556 = vmatprep.mubr.bf16.mxu1 %v4304_v1 }
  0x65   :  { %468 = vmatmul.mubr.bf16.vlgmr.msra.gmra.mxu0 %v4304_v1 }
  0x66   :  { %621 = vmatpush1.bf16.msra.mxu0 %v4440_v12  ;;  %644 = vmatprep.mubr.bf16.mxu0 %v4304_v1 }
  0x67   :  { %622 = vmatprep.subr.bf16.mxu0 %v4446_v13 }
  0x6a   :  { %623 = vmatpush1.bf16.msra.mxu0 %v4456_v14 }
  0x6b   :  { %624 = vmatprep.subr.bf16.mxu0 %v4463_v15 }
  0x6e   :  { %625 = vmatpush1.bf16.msra.mxu0 %v4472_v17 }
  0x6f   :  { %626 = vmatprep.subr.bf16.mxu0 %v4479_v18 }
  0x72   :  { %627 = vmatpush1.bf16.msra.mxu0 %v4488_v19 }
  0x73   :  { %796 = vmatprep.subr.bf16.mxu0 %v4435_v9 }
 0x105   :  { %v221_v26 = vpop.f32.mrf.mxu0 }
 0x106   :  { %v322_v27 = vpop.f32.mrf.mxu1 }
 0x107   :  { %v223_v28 = vpop.f32.mrf.mxu0 }
 0x108   :  { %v324_v29 = vpop.f32.mrf.mxu1 }
 0x109   :  { %v225_v31 = vpop.f32.mrf.mxu0 }
 0x10a   :  { %v326_v32 = vpop.f32.mrf.mxu1  ;;  %v226_v34 = vadd.f32 %v225_v31, %v135_v30  ;;  %v222_v31 = vadd.f32 %v221_v26, %v135_v30 }
 0x10b   :  { %v227_v35 = vpop.f32.mrf.mxu0 }
 0x10c   :  { %v4533_v36 = vpop.f32.mrf.mxu1  ;;  %v228_v6 = vadd.f32 %v227_v35, %v139_v39 }
 0x10d   :  { %v231_v37 = vpop.f32.mrf.mxu0 }
 0x10e   :  { %v332_v38 = vpop.f32.mrf.mxu1  ;;  %v232_v40 = vadd.f32 %v231_v37, %v135_v30 }
 0x10f   :  { %v233_v41 = vpop.f32.mrf.mxu0 }
 0x110   :  { %v334_v42 = vpop.f32.mrf.mxu1  ;;  %v4536_v43 = vadd.f32 %v233_v41, %v139_v39  ;;  %v224_v41 = vadd.f32 %v223_v28, %v139_v39 }
 0x111   :  { %v235_v44 = vpop.f32.mrf.mxu0 }
 0x112   :  { %v336_v45 = vpop.f32.mrf.mxu1  ;;  %v236_v46 = vadd.f32 %v235_v44, %v135_v30 }
 0x113   :  { %v237_v47 = vpop.f32.mrf.mxu0 }
 0x114   :  { %v4538_v48 = vpop.f32.mrf.mxu1  ;;  %v238_v51 = vadd.f32 %v237_v47, %v139_v39 }
 0x115   :  { %v241_v49 = vpop.f32.mrf.mxu0 }
 0x116   :  { %v342_v50 = vpop.f32.mrf.mxu1  ;;  %v242_v52 = vadd.f32 %v241_v49, %v135_v30 }
 0x117   :  { %v4540_v53 = vadd.f32 %v342_v50, %v236_v46  ;;  %v243_v54 = vpop.f32.mrf.mxu0 }
 0x118   :  { %v344_v55 = vpop.f32.mrf.mxu1  ;;  %v4542_v56 = vadd.f32 %v243_v54, %v139_v39  ;;  %v4546_v58 = vadd.f32 %v336_v45, %v242_v52 }
 0x119   :  { %v4544_v57 = vadd.f32 %v344_v55, %v238_v51  ;;  %v245_v59 = vpop.f32.mrf.mxu0 }
 0x11a   :  { %v346_v60 = vpop.f32.mrf.mxu1  ;;  %v246_v61 = vadd.f32 %v245_v59, %v135_v30 }
 0x11b   :  { %v4548_v62 = vadd.f32 %v346_v60, %v232_v40  ;;  %v247_v63 = vpop.f32.mrf.mxu0 }
 0x11c   :  { %v4550_v0 = vpop.f32.mrf.mxu1  ;;  %v248_v2 = vadd.f32 %v247_v63, %v139_v39  ;;  %v4552_v3 = vadd.f32 %v332_v38, %v246_v61 }
 0x11d   :  { %v251_v4 = vpop.f32.mrf.mxu0 }
 0x11e   :  { %v352_v5 = vpop.f32.mrf.mxu1  ;;  %v252_v7 = vadd.f32 %v251_v4, %v135_v30  ;;  %v4556_v10 = vadd.f32 %v334_v42, %v248_v2 }
 0x11f   :  { %v4554_v8 = vadd.f32 %v352_v5, %v226_v34  ;;  %v253_v11 = vpop.f32.mrf.mxu0 }
 0x120   :  { %v354_v16 = vpop.f32.mrf.mxu1  ;;  %v4558_v20 = vadd.f32 %v253_v11, %v139_v39  ;;  %v4560_v22 = vadd.f32 %v326_v32, %v252_v7 }
 0x121   :  { %v516_v21 = vadd.f32 %v354_v16, %v228_v6  ;;  %v255_v23 = vpop.f32.mrf.mxu0 }
 0x122   :  { %v356_v25 = vpop.f32.mrf.mxu1  ;;  %v256_v37 = vadd.f32 %v255_v23, %v135_v30 }
 0x123   :  { %v257_v38 = vpop.f32.mrf.mxu0  ;;  %v389_v35 = vadd.f32 %v356_v25, %v222_v31 }
 0x124   :  { %v358_v40 = vpop.f32.mrf.mxu1  ;;  %v258_v44 = vadd.f32 %v257_v38, %v139_v39  ;;  %v4562_v34 = vadd.f32 %v322_v27, %v256_v37 }
 0x125   :  { %v469_v42 = vpop.f32.mrf.mxu0  ;;  %v390_v45 = vadd.f32 %v358_v40, %v224_v41 }
 0x126   :  { %v476_v46 = vadd.f32 %v469_v42, %v389_v35  ;;  %v4564_v47 = vadd.f32 %v324_v29, %v258_v44 }
 0x127   :  { %v471_v49 = vpop.f32.mrf.mxu0 }
 0x128   :  { %v3673_v50 = vmul.f32 -1.442695, %v476_v46  ;;  %v477_v32 = vadd.f32 %v471_v49, %v390_v45 }
 0x129   :  { %v473_v51 = vpop.f32.mrf.mxu0 }
 0x12a   :  { %v3674_v52 = vmul.f32 -1.442695, %v477_v32  ;;  %3951 = vpow2.f32 %v3673_v50 }
 0x12b   :  { %v474_v26 = vpop.f32.mrf.mxu0 }
 0x12c   :  { %3953 = vpow2.f32 %v3674_v52 }
 0x137   :  { %v3952_v30 = vpop.eup %3951 }
 0x138   :  { %v484_v55 = vadd.f32 1.0, %v3952_v30 }
 0x139   :  { %v3954_v54 = vpop.eup %3953 }
 0x13a   :  { %v485_v28 = vadd.f32 1.0, %v3954_v54 }
 0x13c   :  { %3955 = vrcp.f32 %v485_v28 }
 0x13d   :  { %3957 = vrcp.f32 %v484_v55  ;;  %v604_v55 = vadd.f32 %v4550_v0, %v4536_v43 }
 0x149   :  { %v3956_v27 = vpop.eup %3955 }
 0x14a   :  { %v490_v39 = vmul.f32 2.0, %v3956_v27  ;;  %v3958_v60 = vpop.eup %3957 }
 0x14b   :  { %v492_v61 = vmul.f32 0.0, %v3958_v60 }
 0x14c   :  { %v3675_v59 = vadd.f32 -1.0, %v490_v39 }
 0x14e   :  { %v493_v29 = vmul.f32 %v3958_v60, %v3675_v59 }
 0x150   :  { %495 = vrot.lane.b32.xlu0 %v493_v29, %s4305_s3 }
 0x1c2   :  { %v496_v63 = vpop.permute.xlu0 %495 }
 0x1c3   :  { %v498_v2 = vadd.f32 %v496_v63, %v492_v61 }
 0x1c5   :  { %3959 = vtanh.f32 %v498_v2 }
 0x1d2   :  { %v3960_v4 = vpop.eup %3959 }
 0x1d3   :  { %v4567_v5 = vmul.f32 %v3960_v4, %v3956_v27 }
 0x1d5   :  { %v517_v6 = vpack.c.bf16 %v4567_v5, %v4567_v5 }
 0x1d7   :  { %519 = vrot.lane.b32.xlu0 %v517_v6, %s4305_s3 }
 0x249   :  { %v520_v7 = vpop.permute.xlu0 %519 }
 0x24a   :  { %3676 = vmatmul.mubr.msk.bf16.vlgmr.msra.gmra.mxu1 %vm431_vm2, %v520_v7 }
 0x24b   :  { %709 = vmatpush1.bf16.msra.mxu1 %v4440_v12  ;;  %732 = vmatprep.mubr.bf16.mxu1 %v4304_v1 }
 0x24c   :  { %710 = vmatprep.subr.bf16.mxu1 %v4446_v13 }
 0x24f   :  { %711 = vmatpush1.bf16.msra.mxu1 %v4456_v14 }
 0x250   :  { %712 = vmatprep.subr.bf16.mxu1 %v4463_v15 }
 0x253   :  { %713 = vmatpush1.bf16.msra.mxu1 %v4472_v17 }
 0x254   :  { %714 = vmatprep.subr.bf16.mxu1 %v4479_v18 }
 0x257   :  { %715 = vmatpush1.bf16.msra.mxu1 %v4488_v19 }
 0x258   :  { %884 = vmatprep.subr.bf16.mxu1 %v4435_v9 }
 0x30a   :  { %v558_v11 = vpop.f32.mrf.mxu1 }
 0x30b   :  { %v565_v16 = vadd.f32 %v558_v11, %v4554_v8 }
 0x30c   :  { %v560_v23 = vpop.f32.mrf.mxu1 }
 0x30d   :  { %v3677_v25 = vmul.f32 -1.442695, %v565_v16  ;;  %v566_v31 = vadd.f32 %v560_v23, %v516_v21 }
 0x30e   :  { %v562_v37 = vpop.f32.mrf.mxu1 }
 0x30f   :  { %v3678_v38 = vmul.f32 -1.442695, %v566_v31  ;;  %3961 = vpow2.f32 %v3677_v25 }
 0x310   :  { %v563_v40 = vpop.f32.mrf.mxu1 }
 0x311   :  { %3963 = vpow2.f32 %v3678_v38 }
 0x31c   :  { %v3962_v41 = vpop.eup %3961 }
 0x31d   :  { %v573_v42 = vadd.f32 1.0, %v3962_v41 }
 0x31e   :  { %v3964_v35 = vpop.eup %3963 }
 0x31f   :  { %v574_v44 = vadd.f32 1.0, %v3964_v35 }
 0x321   :  { %3965 = vrcp.f32 %v574_v44 }
 0x322   :  { %3967 = vrcp.f32 %v573_v42 }
 0x32e   :  { %v3966_v45 = vpop.eup %3965 }
 0x32f   :  { %v579_v46 = vmul.f32 2.0, %v3966_v45  ;;  %v3968_v50 = vpop.eup %3967 }
 0x330   :  { %v581_v8 = vmul.f32 %v3968_v50, %v498_v2 }
 0x331   :  { %v3679_v49 = vadd.f32 -1.0, %v579_v46 }
 0x333   :  { %v582_v32 = vmul.f32 %v3968_v50, %v3679_v49 }
 0x335   :  { %584 = vrot.lane.b32.xlu1 %v582_v32, %s4305_s3 }
 0x3a7   :  { %v585_v21 = vpop.permute.xlu1 %584 }
 0x3a8   :  { %v587_v51 = vadd.f32 %v585_v21, %v581_v8 }
 0x3aa   :  { %3969 = vtanh.f32 %v587_v51 }
 0x3b7   :  { %v3970_v52 = vpop.eup %3969 }
 0x3b8   :  { %v4584_v26 = vmul.f32 %v3970_v52, %v3966_v45 }
 0x3ba   :  { %v605_v30 = vpack.c.bf16 %v4584_v26, %v4584_v26 }
 0x3bc   :  { %607 = vrot.lane.b32.xlu1 %v605_v30, %s4305_s3 }
 0x42e   :  { %v608_v54 = vpop.permute.xlu1 %607 }
 0x42f   :  { %3680 = vmatmul.mubr.msk.bf16.vlgmr.msra.gmra.mxu0 %vm431_vm2, %v608_v54 }
 0x430   :  { %797 = vmatpush1.bf16.msra.mxu0 %v4440_v12  ;;  %820 = vmatprep.mubr.bf16.mxu0 %v4304_v1 }
 0x431   :  { %798 = vmatprep.subr.bf16.mxu0 %v4446_v13 }
 0x434   :  { %799 = vmatpush1.bf16.msra.mxu0 %v4456_v14 }
 0x435   :  { %800 = vmatprep.subr.bf16.mxu0 %v4463_v15 }
 0x438   :  { %801 = vmatpush1.bf16.msra.mxu0 %v4472_v17 }
 0x439   :  { %802 = vmatprep.subr.bf16.mxu0 %v4479_v18 }
 0x43c   :  { %803 = vmatpush1.bf16.msra.mxu0 %v4488_v19 }
 0x43d   :  { %972 = vmatprep.subr.bf16.mxu0 %v4435_v9 }
 0x4ef   :  { %v646_v28 = vpop.f32.mrf.mxu0 }
 0x4f0   :  { %v653_v27 = vadd.f32 %v646_v28, %v4548_v62 }
 0x4f1   :  { %v648_v39 = vpop.f32.mrf.mxu0 }
 0x4f2   :  { %v3681_v59 = vmul.f32 -1.442695, %v653_v27  ;;  %v654_v60 = vadd.f32 %v648_v39, %v604_v55 }
 0x4f3   :  { %v650_v29 = vpop.f32.mrf.mxu0 }
 0x4f4   :  { %v3682_v61 = vmul.f32 -1.442695, %v654_v60  ;;  %3971 = vpow2.f32 %v3681_v59 }
 0x4f5   :  { %v651_v63 = vpop.f32.mrf.mxu0 }
 0x4f6   :  { %3973 = vpow2.f32 %v3682_v61 }
 0x501   :  { %v3972_v2 = vpop.eup %3971 }
 0x502   :  { %v661_v7 = vadd.f32 1.0, %v3972_v2  ;;  %v780_v2 = vadd.f32 %v4538_v48, %v4542_v56 }
 0x503   :  { %v3974_v4 = vpop.eup %3973 }
 0x504   :  { %v662_v6 = vadd.f32 1.0, %v3974_v4 }
 0x506   :  { %3975 = vrcp.f32 %v662_v6 }
 0x507   :  { %3977 = vrcp.f32 %v661_v7 }
 0x513   :  { %v3976_v11 = vpop.eup %3975 }
 0x514   :  { %v667_v16 = vmul.f32 2.0, %v3976_v11  ;;  %v3978_v43 = vpop.eup %3977 }
 0x515   :  { %v669_v62 = vmul.f32 %v3978_v43, %v587_v51 }
 0x516   :  { %v3683_v23 = vadd.f32 -1.0, %v667_v16 }
 0x518   :  { %v670_v0 = vmul.f32 %v3978_v43, %v3683_v23 }
 0x51a   :  { %672 = vrot.lane.b32.xlu0 %v670_v0, %s4305_s3 }
 0x58c   :  { %v673_v25 = vpop.permute.xlu0 %672 }
 0x58d   :  { %v675_v31 = vadd.f32 %v673_v25, %v669_v62 }
 0x58f   :  { %3979 = vtanh.f32 %v675_v31 }
 0x59c   :  { %v3980_v37 = vpop.eup %3979 }
 0x59d   :  { %v4603_v38 = vmul.f32 %v3980_v37, %v3976_v11 }
 0x59f   :  { %v693_v40 = vpack.c.bf16 %v4603_v38, %v4603_v38 }
 0x5a1   :  { %695 = vrot.lane.b32.xlu1 %v693_v40, %s4305_s3 }
 0x613   :  { %v696_v41 = vpop.permute.xlu1 %695 }
 0x614   :  { %3684 = vmatmul.mubr.msk.bf16.vlgmr.msra.gmra.mxu1 %vm431_vm2, %v696_v41 }
 0x615   :  { %885 = vmatpush1.bf16.msra.mxu1 %v4440_v12  ;;  %908 = vmatprep.mubr.bf16.mxu1 %v4304_v1 }
 0x616   :  { %886 = vmatprep.subr.bf16.mxu1 %v4446_v13 }
 0x619   :  { %887 = vmatpush1.bf16.msra.mxu1 %v4456_v14 }
 0x61a   :  { %888 = vmatprep.subr.bf16.mxu1 %v4463_v15 }
 0x61d   :  { %889 = vmatpush1.bf16.msra.mxu1 %v4472_v17 }
 0x61e   :  { %890 = vmatprep.subr.bf16.mxu1 %v4479_v18 }
 0x621   :  { %891 = vmatpush1.bf16.msra.mxu1 %v4488_v19 }
 0x622   :  { %1060 = vmatprep.subr.bf16.mxu1 %v4435_v9 }
 0x6d4   :  { %v734_v35 = vpop.f32.mrf.mxu1 }
 0x6d5   :  { %v741_v44 = vadd.f32 %v734_v35, %v4540_v53 }
 0x6d6   :  { %v736_v42 = vpop.f32.mrf.mxu1 }
 0x6d7   :  { %v3685_v45 = vmul.f32 -1.442695, %v741_v44  ;;  %v742_v46 = vadd.f32 %v736_v42, %v4544_v57 }
 0x6d8   :  { %v738_v49 = vpop.f32.mrf.mxu1 }
 0x6d9   :  { %v3686_v50 = vmul.f32 -1.442695, %v742_v46  ;;  %3981 = vpow2.f32 %v3685_v45 }
 0x6da   :  { %v739_v32 = vpop.f32.mrf.mxu1 }
 0x6db   :  { %3983 = vpow2.f32 %v3686_v50 }
 0x6e6   :  { %v3982_v8 = vpop.eup %3981 }
 0x6e7   :  { %v749_v52 = vadd.f32 1.0, %v3982_v8 }
 0x6e8   :  { %v3984_v21 = vpop.eup %3983 }
 0x6e9   :  { %v750_v51 = vadd.f32 1.0, %v3984_v21 }
 0x6eb   :  { %3985 = vrcp.f32 %v750_v51 }
 0x6ec   :  { %3987 = vrcp.f32 %v749_v52 }
 0x6f8   :  { %v3986_v30 = vpop.eup %3985 }
 0x6f9   :  { %v755_v9 = vmul.f32 2.0, %v3986_v30  ;;  %v3988_v28 = vpop.eup %3987 }
 0x6fa   :  { %v757_v55 = vmul.f32 %v3988_v28, %v675_v31 }
 0x6fb   :  { %v3687_v54 = vadd.f32 -1.0, %v755_v9 }
 0x6fd   :  { %v758_v53 = vmul.f32 %v3988_v28, %v3687_v54 }
 0x6ff   :  { %760 = vrot.lane.b32.xlu0 %v758_v53, %s4305_s3 }
 0x771   :  { %v761_v57 = vpop.permute.xlu0 %760 }
 0x772   :  { %v763_v27 = vadd.f32 %v761_v57, %v757_v55 }
 0x774   :  { %3989 = vtanh.f32 %v763_v27 }
 0x781   :  { %v3990_v39 = vpop.eup %3989 }
 0x782   :  { %v4621_v59 = vmul.f32 %v3990_v39, %v3986_v30 }
 0x784   :  { %v781_v60 = vpack.c.bf16 %v4621_v59, %v4621_v59 }
 0x786   :  { %783 = vrot.lane.b32.xlu1 %v781_v60, %s4305_s3 }
 0x7f8   :  { %v784_v29 = vpop.permute.xlu1 %783 }
 0x7f9   :  { %3688 = vmatmul.mubr.msk.bf16.vlgmr.msra.gmra.mxu0 %vm431_vm2, %v784_v29  ;;  %v956_v29 = vadd.f32 %v4533_v36, %v4558_v20 }
 0x7fa   :  { %973 = vmatpush1.bf16.msra.mxu0 %v4440_v12  ;;  %996 = vmatprep.mubr.bf16.mxu0 %v4304_v1 }
 0x7fb   :  { %974 = vmatprep.subr.bf16.mxu0 %v4446_v13 }
 0x7fe   :  { %975 = vmatpush1.bf16.msra.mxu0 %v4456_v14 }
 0x7ff   :  { %976 = vmatprep.subr.bf16.mxu0 %v4463_v15 }
 0x802   :  { %977 = vmatpush1.bf16.msra.mxu0 %v4472_v17 }
 0x803   :  { %978 = vmatprep.subr.bf16.mxu0 %v4479_v18 }
 0x806   :  { %979 = vmatpush1.bf16.msra.mxu0 %v4488_v19 }
 0x8b9   :  { %v822_v61 = vpop.f32.mrf.mxu0 }
 0x8ba   :  { %v829_v63 = vadd.f32 %v822_v61, %v4546_v58 }
 0x8bb   :  { %v824_v4 = vpop.f32.mrf.mxu0 }
 0x8bc   :  { %v3689_v6 = vmul.f32 -1.442695, %v829_v63  ;;  %v830_v7 = vadd.f32 %v824_v4, %v780_v2 }
 0x8bd   :  { %v826_v11 = vpop.f32.mrf.mxu0 }
 0x8be   :  { %v3690_v16 = vmul.f32 -1.442695, %v830_v7  ;;  %3991 = vpow2.f32 %v3689_v6 }
 0x8bf   :  { %v827_v23 = vpop.f32.mrf.mxu0 }
 0x8c0   :  { %3993 = vpow2.f32 %v3690_v16 }
 0x8cb   :  { %v3992_v43 = vpop.eup %3991 }
 0x8cc   :  { %v837_v25 = vadd.f32 1.0, %v3992_v43 }
 0x8cd   :  { %v3994_v0 = vpop.eup %3993 }
 0x8ce   :  { %v838_v62 = vadd.f32 1.0, %v3994_v0 }
 0x8d0   :  { %3995 = vrcp.f32 %v838_v62 }
 0x8d1   :  { %3997 = vrcp.f32 %v837_v25 }
 0x8dd   :  { %v3996_v31 = vpop.eup %3995 }
 0x8de   :  { %v843_v37 = vmul.f32 2.0, %v3996_v31  ;;  %v3998_v40 = vpop.eup %3997 }
 0x8df   :  { %v845_v48 = vmul.f32 %v3998_v40, %v763_v27 }
 0x8e0   :  { %v3691_v58 = vadd.f32 -1.0, %v843_v37 }
 0x8e2   :  { %v846_v41 = vmul.f32 %v3998_v40, %v3691_v58 }
 0x8e4   :  { %848 = vrot.lane.b32.xlu0 %v846_v41, %s4305_s3 }
 0x956   :  { %v849_v56 = vpop.permute.xlu0 %848 }
 0x957   :  { %v851_v35 = vadd.f32 %v849_v56, %v845_v48 }
 0x959   :  { %3999 = vtanh.f32 %v851_v35 }
 0x966   :  { %v4000_v44 = vpop.eup %3999 }
 0x967   :  { %v4639_v42 = vmul.f32 %v4000_v44, %v3996_v31 }
 0x969   :  { %v869_v45 = vpack.c.bf16 %v4639_v42, %v4639_v42 }
 0x96b   :  { %871 = vrot.lane.b32.xlu1 %v869_v45, %s4305_s3 }
 0x9dd   :  { %v872_v46 = vpop.permute.xlu1 %871 }
 0x9de   :  { %3692 = vmatmul.mubr.msk.bf16.vlgmr.msra.gmra.mxu1 %vm431_vm2, %v872_v46 }
 0x9df   :  { %1061 = vmatpush1.bf16.msra.mxu1 %v4440_v12  ;;  %1084 = vmatprep.mubr.bf16.mxu1 %v4304_v1 }
 0x9e0   :  { %1062 = vmatprep.subr.bf16.mxu1 %v4446_v13 }
 0x9e3   :  { %1063 = vmatpush1.bf16.msra.mxu1 %v4456_v14 }
 0x9e4   :  { %1064 = vmatprep.subr.bf16.mxu1 %v4463_v15 }
 0x9e7   :  { %1065 = vmatpush1.bf16.msra.mxu1 %v4472_v17 }
 0x9e8   :  { %1066 = vmatprep.subr.bf16.mxu1 %v4479_v18 }
 0x9eb   :  { %1067 = vmatpush1.bf16.msra.mxu1 %v4488_v19 }
 0xa9e   :  { %v910_v49 = vpop.f32.mrf.mxu1 }
 0xa9f   :  { %v917_v50 = vadd.f32 %v910_v49, %v4552_v3 }
 0xaa0   :  { %v912_v32 = vpop.f32.mrf.mxu1 }
 0xaa1   :  { %v3693_v8 = vmul.f32 -1.442695, %v917_v50  ;;  %v918_v12 = vadd.f32 %v912_v32, %v4556_v10 }
 0xaa2   :  { %v914_v21 = vpop.f32.mrf.mxu1 }
 0xaa3   :  { %v3694_v51 = vmul.f32 -1.442695, %v918_v12  ;;  %4001 = vpow2.f32 %v3693_v8 }
 0xaa4   :  { %v915_v13 = vpop.f32.mrf.mxu1 }
 0xaa5   :  { %4003 = vpow2.f32 %v3694_v51 }
 0xab0   :  { %v4002_v14 = vpop.eup %4001 }
 0xab1   :  { %v925_v17 = vadd.f32 1.0, %v4002_v14 }
 0xab2   :  { %v4004_v15 = vpop.eup %4003 }
 0xab3   :  { %v926_v52 = vadd.f32 1.0, %v4004_v15 }
 0xab5   :  { %4005 = vrcp.f32 %v926_v52 }
 0xab6   :  { %4007 = vrcp.f32 %v925_v17 }
 0xac2   :  { %v4006_v18 = vpop.eup %4005 }
 0xac3   :  { %v931_v19 = vmul.f32 2.0, %v4006_v18  ;;  %v4008_v9 = vpop.eup %4007 }
 0xac4   :  { %v933_v54 = vmul.f32 %v4008_v9, %v851_v35 }
 0xac5   :  { %v3695_v30 = vadd.f32 -1.0, %v931_v19 }
 0xac7   :  { %v934_v3 = vmul.f32 %v4008_v9, %v3695_v30  ;;  %v3882_v9 = vld [vmem:[%s5379_s5] ss:$8 sps:$4 sm:$0xff]  }
 0xac9   :  { %936 = vrot.lane.b32.xlu0 %v934_v3, %s4305_s3 }
 0xb3b   :  { %v937_v10 = vpop.permute.xlu0 %936 }
 0xb3c   :  { %v939_v28 = vadd.f32 %v937_v10, %v933_v54 }
 0xb3e   :  { %4009 = vtanh.f32 %v939_v28 }
 0xb4b   :  { %v4010_v53 = vpop.eup %4009 }
 0xb4c   :  { %v4656_v55 = vmul.f32 %v4010_v53, %v4006_v18  ;;  %v3879_v18 = vld [vmem:[%s5379_s5 + $0x10] ss:$8 sps:$4 sm:$0xff]  }
 0xb4e   :  { %v957_v57 = vpack.c.bf16 %v4656_v55, %v4656_v55 }
 0xb50   :  { %959 = vrot.lane.b32.xlu1 %v957_v57, %s4305_s3 }
 0xbc2   :  { %v960_v27 = vpop.permute.xlu1 %959 }
 0xbc3   :  { %3696 = vmatmul.mubr.msk.bf16.vlgmr.msra.gmra.mxu0 %vm431_vm2, %v960_v27 }
 0xbc4   :  { %1223 = vmatprep.mubr.bf16.mxu0 %v4304_v1 }
 0xc83   :  { %v998_v39 = vpop.f32.mrf.mxu0 }
 0xc84   :  { %v1005_v60 = vadd.f32 %v998_v39, %v4560_v22  ;;  %v3885_v39 = vld [vmem:[%s5379_s5 + $0x30] ss:$8 sps:$4 sm:$0xff]  }
 0xc85   :  { %v1000_v61 = vpop.f32.mrf.mxu0 }
 0xc86   :  { %v3697_v63 = vmul.f32 -1.442695, %v1005_v60  ;;  %v1006_v2 = vadd.f32 %v1000_v61, %v956_v29  ;;  %v3887_v60 = vld [vmem:[%s5379_s5 + $0x34] ss:$8 sps:$4 sm:$0xff]   ;;  %v3888_v29 = vld [vmem:[%s5379_s5 + $0x20] ss:$8 sps:$4 sm:$0xff]  }
 0xc87   :  { %v1002_v4 = vpop.f32.mrf.mxu0  ;;  %1203 = vmatprep.subr.bf16.mxu0 %v3887_v60  ;;  %v3890_v61 = vld [vmem:[%s5379_s5 + $0x24] ss:$8 sps:$4 sm:$0xff]  }
 0xc88   :  { %v3698_v6 = vmul.f32 -1.442695, %v1006_v2  ;;  %4011 = vpow2.f32 %v3697_v63  ;;  %1204 = vmatpush1.bf16.msra.mxu0 %v3885_v39 }
 0xc89   :  { %v1003_v7 = vpop.f32.mrf.mxu0  ;;  %1205 = vmatprep.subr.bf16.mxu0 %v3890_v61 }
 0xc8a   :  { %4013 = vpow2.f32 %v3698_v6  ;;  %v3893_v7 = vld [vmem:[#allocation7 + $0x34] ss:$8 sps:$4 sm:$0xff]  }
 0xc8c   :  { %1206 = vmatpush1.bf16.msra.mxu0 %v3888_v29 }
 0xc8d   :  { %1453 = vmatprep.subr.bf16.mxu0 %v3893_v7 }
 0xc95   :  { %v4012_v11 = vpop.eup %4011 }
 0xc96   :  { %v1013_v43 = vadd.f32 1.0, %v4012_v11  ;;  %v3894_v11 = vld [vmem:[#allocation7 + $0x10] ss:$8 sps:$4 sm:$0xff]  }
 0xc97   :  { %v4014_v16 = vpop.eup %4013 }
 0xc98   :  { %v1014_v23 = vadd.f32 1.0, %v4014_v16 }
 0xc9a   :  { %4015 = vrcp.f32 %v1014_v23  ;;  %v3896_v23 = vld [vmem:[#allocation7 + $0x14] ss:$8 sps:$4 sm:$0xff]  }
 0xc9b   :  { %4017 = vrcp.f32 %v1013_v43  ;;  %v3900_v43 = vld [vmem:[#allocation7] ss:$8 sps:$4 sm:$0xff]  }
 0xca7   :  { %v4016_v0 = vpop.eup %4015 }
 0xca8   :  { %v1019_v62 = vmul.f32 2.0, %v4016_v0  ;;  %v4018_v25 = vpop.eup %4017 }
 0xca9   :  { %v1021_v36 = vmul.f32 %v4018_v25, %v939_v28 }
 0xcaa   :  { %v3699_v22 = vadd.f32 -1.0, %v1019_v62  ;;  %v4743_v62 = vld [vmem:[#allocation9 + $0x34] ss:$8 sps:$4 sm:$0xff]  }
 0xcac   :  { %v1022_v31 = vmul.f32 %v4018_v25, %v3699_v22 }
 0xcae   :  { %1024 = vrot.lane.b32.xlu0 %v1022_v31, %s4305_s3 }
 0xd20   :  { %v1025_v20 = vpop.permute.xlu0 %1024 }
 0xd21   :  { %v4667_v37 = vadd.f32 %v1025_v20, %v1021_v36  ;;  %v3891_v36 = vld [vmem:[#allocation7 + $0x30] ss:$8 sps:$4 sm:$0xff]  }
 0xd23   :  { %4019 = vtanh.f32 %v4667_v37 }
 0xd30   :  { %v4020_v58 = vpop.eup %4019 }
 0xd31   :  { %v1029_v40 = vmul.f32 %v4020_v58, %v4016_v0  ;;  %v3902_v0 = vld [vmem:[#allocation7 + $0x4] ss:$8 sps:$4 sm:$0xff]  }
 0xd33   :  { %v1045_v41 = vpack.c.bf16 %v1029_v40, %v1029_v40 }
 0xd35   :  { %1047 = vrot.lane.b32.xlu1 %v1045_v41, %s4305_s3  ;;  %v3897_v41 = vld [vmem:[#allocation7 + $0x20] ss:$8 sps:$4 sm:$0xff]  }
 0xd39   :  { %502 = vrot.lane.b32.xlu1 %v4567_v5, %s4305_s3 }
 0xd3d   :  { %1035 = vrot.lane.b32.xlu1 %v1029_v40, %s4306_s25 }
 0xd41   :  { %679 = vrot.lane.b32.xlu1 %v4603_v38, %s4305_s3 }
 0xd45   :  { %859 = vrot.lane.b32.xlu1 %v4639_v42, %s4306_s25 }
 0xd49   :  { %683 = vrot.lane.b32.xlu1 %v4603_v38, %s4306_s25 }
 0xd4d   :  { %855 = vrot.lane.b32.xlu1 %v4639_v42, %s4305_s3 }
 0xd51   :  { %507 = vrot.lane.b32.xlu1 %v4567_v5, %s4306_s25 }
 0xd55   :  { %1031 = vrot.lane.b32.xlu1 %v1029_v40, %s4305_s3 }
 0xda7   :  { %v1048_v48 = vpop.permute.xlu1 %1047 }
 0xda8   :  { %3700 = vmatmul.mubr.msk.bf16.vlgmr.msra.gmra.mxu1 %vm431_vm2, %v1048_v48 }
 0xda9   :  { %1328 = vmatprep.mubr.bf16.mxu1 %v4304_v1 }
 0xdab   :  { %v503_v56 = vpop.permute.xlu1 %502 }
 0xdac   :  { %506 = vst.msk [vmem:[#allocation2] sm:$0xff] %vm505_vm3, %v503_v56 }
 0xdaf   :  { %v1036_v35 = vpop.permute.xlu1 %1035 }
 0xdb0   :  { %1038 = vst.msk [vmem:[#allocation3 + $0x8] sm:$0xff] %vm505_vm3, %v1036_v35 }
 0xdb3   :  { %v680_v38 = vpop.permute.xlu1 %679  ;;  %v1127_v63 = vld [vmem:[#allocation2] sm:$0xff] }
 0xdb4   :  { %682 = vst.msk [vmem:[#allocation2 + $0x10] sm:$0xff] %vm505_vm3, %v680_v38 }
 0xdb7   :  { %v860_v44 = vpop.permute.xlu1 %859 }
 0xdb8   :  { %862 = vst.msk [vmem:[#allocation3 + $0x18] sm:$0xff] %vm505_vm3, %v860_v44 }
 0xdbb   :  { %v684_v5 = vpop.permute.xlu1 %683  ;;  %v1129_v58 = vld [vmem:[#allocation2 + $0x10] sm:$0xff] }
 0xdbc   :  { %686 = vst.msk [vmem:[#allocation3 + $0x28] sm:$0xff] %vm505_vm3, %v684_v5 }
 0xdbf   :  { %v856_v42 = vpop.permute.xlu1 %855  ;;  %v1142_v38 = vld [vmem:[#allocation3 + $0x18] sm:$0xff] }
 0xdc0   :  { %858 = vst.msk [vmem:[#allocation2 + $0x20] sm:$0xff] %vm505_vm3, %v856_v42 }
 0xdc3   :  { %v508_v45 = vpop.permute.xlu1 %507 }
 0xdc4   :  { %510 = vst.msk [vmem:[#allocation3 + $0x38] sm:$0xff] %vm505_vm3, %v508_v45 }
 0xdc7   :  { %v1032_v46 = vpop.permute.xlu1 %1031 }
 0xdc8   :  { %1034 = vst.msk [vmem:[#allocation2 + $0x30] sm:$0xff] %vm505_vm3, %v1032_v46  ;;  %v1144_v46 = vld [vmem:[#allocation3 + $0x28] sm:$0xff] }
 0xe68   :  { %v1086_v49 = vpop.f32.mrf.mxu1 }
 0xe69   :  { %v1093_v50 = vadd.f32 %v1086_v49, %v4562_v34  ;;  %v3881_v34 = vld [vmem:[%s5379_s5 + $0x14] ss:$8 sps:$4 sm:$0xff]   ;;  %v1131_v49 = vld [vmem:[#allocation2 + $0x20] sm:$0xff] }
 0xe6a   :  { %v1088_v32 = vpop.f32.mrf.mxu1  ;;  %1308 = vmatprep.subr.bf16.mxu1 %v3881_v34  ;;  %v4781_v34 = vld [vmem:[#allocation9 + $0x14] ss:$8 sps:$4 sm:$0xff]  }
 0xe6b   :  { %v3701_v8 = vmul.f32 -1.442695, %v1093_v50  ;;  %v1094_v12 = vadd.f32 %v1088_v32, %v4564_v47  ;;  %v3884_v47 = vld [vmem:[%s5379_s5 + $0x4] ss:$8 sps:$4 sm:$0xff]   ;;  %1309 = vmatpush1.bf16.msra.mxu1 %v3879_v18 }
 0xe6c   :  { %v1090_v21 = vpop.f32.mrf.mxu1  ;;  %1310 = vmatprep.subr.bf16.mxu1 %v3884_v47  ;;  %v4777_v18 = vld [vmem:[#allocation9 + $0x20] ss:$8 sps:$4 sm:$0xff]   ;;  %v4787_v47 = vld [vmem:[#allocation9 + $0x10] ss:$8 sps:$4 sm:$0xff]  }
 0xe6d   :  { %v3702_v51 = vmul.f32 -1.442695, %v1094_v12  ;;  %4021 = vpow2.f32 %v3701_v8  ;;  %v1146_v21 = vld [vmem:[#allocation3 + $0x38] sm:$0xff] }
 0xe6e   :  { %v1091_v13 = vpop.f32.mrf.mxu1 }
 0xe6f   :  { %4023 = vpow2.f32 %v3702_v51  ;;  %1311 = vmatpush1.bf16.msra.mxu1 %v3882_v9  ;;  %v1133_v51 = vld [vmem:[#allocation2 + $0x30] sm:$0xff] }
 0xe70   :  { %1546 = vmatprep.subr.bf16.mxu1 %v3896_v23 }
 0xe7a   :  { %v4022_v14 = vpop.eup %4021 }
 0xe7b   :  { %v1101_v17 = vadd.f32 1.0, %v4022_v14 }
 0xe7c   :  { %v4024_v15 = vpop.eup %4023 }
 0xe7d   :  { %v1102_v52 = vadd.f32 1.0, %v4024_v15 }
 0xe7f   :  { %4025 = vrcp.f32 %v1102_v52  ;;  %v4768_v52 = vld [vmem:[#allocation9 + $0x30] ss:$8 sps:$4 sm:$0xff]  }
 0xe80   :  { %4027 = vrcp.f32 %v1101_v17  ;;  %v4770_v17 = vld [vmem:[#allocation9 + $0x24] ss:$8 sps:$4 sm:$0xff]  }
 0xe8c   :  { %v4026_v19 = vpop.eup %4025 }
 0xe8d   :  { %v1107_v30 = vmul.f32 2.0, %v4026_v19  ;;  %v4028_v54 = vpop.eup %4027 }
 0xe8e   :  { %v1109_v28 = vmul.f32 %v4028_v54, %v4667_v37 }
 0xe8f   :  { %v3703_v3 = vadd.f32 -1.0, %v1107_v30  ;;  %v4797_v30 = vld [vmem:[#allocation9] ss:$8 sps:$4 sm:$0xff]  }
 0xe91   :  { %v1110_v10 = vmul.f32 %v4028_v54, %v3703_v3 }
 0xe93   :  { %1112 = vrot.lane.b32.xlu0 %v1110_v10, %s4305_s3 }
 0xe97   :  { %591 = vrot.lane.b32.xlu0 %v4584_v26, %s4305_s3 }
 0xf05   :  { %v1113_v53 = vpop.permute.xlu0 %1112 }
 0xf06   :  { %v1115_v57 = vadd.f32 %v1113_v53, %v1109_v28 }
 0xf08   :  { %4029 = vtanh.f32 %v1115_v57  ;;  %v1369_v57 = vld [vmem:[%s5381_s7] sm:$0x3] }
 0xf09   :  { %v592_v27 = vpop.permute.xlu0 %591  ;;  %v4835_v29 = vrot.slane %v1369_v57, %v4525_v24 }
 0xf0a   :  { %594 = vst.msk [vmem:[#allocation2 + $0x8] sm:$0xff] %vm505_vm3, %v592_v27 }
 0xf11   :  { %v1128_v2 = vld [vmem:[#allocation2 + $0x8] sm:$0xff] }
 0xf12   :  { %v4726_v4 = vpack.c.bf16 %v1128_v2, %v1127_v63 }
 0xf14   :  { %3716 = vmatmul.mubr.msk.bf16.vlgmr.msra.gmra.mxu1 %vm505_vm3, %v4726_v4 }
 0xf15   :  { %v4030_v6 = vpop.eup %4029  ;;  %1338 = vmatprep.mubr.bf16.mxu1 %v4304_v1  ;;  %1547 = vmatpush1.bf16.msra.mxu1 %v3894_v11 }
 0xf16   :  { %v1117_v16 = vmul.f32 %v4030_v6, %v4026_v19  ;;  %1548 = vmatprep.subr.bf16.mxu1 %v3902_v0  ;;  %v4789_v19 = vld [vmem:[#allocation9 + $0x4] ss:$8 sps:$4 sm:$0xff]  }
 0xf18   :  { %1123 = vrot.lane.b32.xlu0 %v1117_v16, %s4306_s25 }
 0xf19   :  { %1549 = vmatpush1.bf16.msra.mxu1 %v3900_v43 }
 0xf1a   :  { %1773 = vmatprep.subr.bf16.mxu1 %v4743_v62 }
 0xf1c   :  { %767 = vrot.lane.b32.xlu0 %v4621_v59, %s4305_s3 }
 0xf20   :  { %947 = vrot.lane.b32.xlu0 %v4656_v55, %s4306_s25 }
 0xf24   :  { %771 = vrot.lane.b32.xlu0 %v4621_v59, %s4306_s25 }
 0xf28   :  { %943 = vrot.lane.b32.xlu0 %v4656_v55, %s4305_s3  ;;  %v1140_v55 = vld [vmem:[#allocation3 + $0x8] sm:$0xff] }
 0xf2c   :  { %595 = vrot.lane.b32.xlu0 %v4584_v26, %s4306_s25  ;;  %v3899_v26 = vld [vmem:[#allocation7 + $0x24] ss:$8 sps:$4 sm:$0xff]  }
 0xf30   :  { %1119 = vrot.lane.b32.xlu0 %v1117_v16, %s4305_s3 }
 0xf8a   :  { %v1124_v22 = vpop.permute.xlu0 %1123 }
 0xf8b   :  { %1126 = vst.msk [vmem:[#allocation3] sm:$0xff] %vm505_vm3, %v1124_v22 }
 0xf8e   :  { %v768_v59 = vpop.permute.xlu0 %767 }
 0xf8f   :  { %770 = vst.msk [vmem:[#allocation2 + $0x18] sm:$0xff] %vm505_vm3, %v768_v59 }
 0xf92   :  { %v948_v25 = vpop.permute.xlu0 %947  ;;  %v1139_v31 = vld [vmem:[#allocation3] sm:$0xff] }
 0xf93   :  { %950 = vst.msk [vmem:[#allocation3 + $0x10] sm:$0xff] %vm505_vm3, %v948_v25  ;;  %v1147_v20 = vpack.c.bf16 %v1140_v55, %v1139_v31 }
 0xf95   :  { %3708 = vmatmul.mubr.msk.bf16.vlgmr.msra.gmra.mxu0 %vm505_vm3, %v1147_v20 }
 0xf96   :  { %1454 = vmatpush1.bf16.msra.mxu0 %v3891_v36  ;;  %v772_v37 = vpop.permute.xlu0 %771  ;;  %v1130_v40 = vld [vmem:[#allocation2 + $0x18] sm:$0xff]  ;;  %1233 = vmatprep.mubr.bf16.mxu0 %v4304_v1 }
 0xf97   :  { %774 = vst.msk [vmem:[#allocation3 + $0x20] sm:$0xff] %vm505_vm3, %v772_v37  ;;  %v1136_v48 = vpack.c.bf16 %v1130_v40, %v1129_v58  ;;  %1455 = vmatprep.subr.bf16.mxu0 %v3899_v26 }
 0xf99   :  { %3717 = vmatmul.mubr.msk.bf16.gmra.mxu1 %vm505_vm3, %v1136_v48 }
 0xf9a   :  { %v944_v56 = vpop.permute.xlu0 %943  ;;  %v1141_v35 = vld [vmem:[#allocation3 + $0x10] sm:$0xff]  ;;  %1348 = vmatprep.mubr.bf16.mxu1 %v4304_v1  ;;  %1456 = vmatpush1.bf16.msra.mxu0 %v3897_v41 }
 0xf9b   :  { %946 = vst.msk [vmem:[#allocation2 + $0x28] sm:$0xff] %vm505_vm3, %v944_v56  ;;  %v1148_v44 = vpack.c.bf16 %v1142_v38, %v1141_v35  ;;  %1685 = vmatprep.subr.bf16.mxu0 %v4743_v62 }
 0xf9d   :  { %3709 = vmatmul.mubr.msk.bf16.gmra.mxu0 %vm505_vm3, %v1148_v44 }
 0xf9e   :  { %v596_v5 = vpop.permute.xlu0 %595  ;;  %1243 = vmatprep.mubr.bf16.mxu0 %v4304_v1  ;;  %v1143_v42 = vld [vmem:[#allocation3 + $0x20] sm:$0xff] }
 0xf9f   :  { %598 = vst.msk [vmem:[#allocation3 + $0x30] sm:$0xff] %vm505_vm3, %v596_v5  ;;  %v1149_v32 = vpack.c.bf16 %v1144_v46, %v1143_v42 }
 0xfa2   :  { %v1120_v45 = vpop.permute.xlu0 %1119  ;;  %v1132_v50 = vld [vmem:[#allocation2 + $0x28] sm:$0xff] }
 0xfa3   :  { %1122 = vst.msk [vmem:[#allocation2 + $0x38] sm:$0xff] %vm505_vm3, %v1120_v45  ;;  %v1137_v8 = vpack.c.bf16 %v1132_v50, %v1131_v49 }
 0xfa5   :  { %3710 = vmatmul.mubr.msk.bf16.gmra.mxu0 %vm505_vm3, %v1149_v32  ;;  %3718 = vmatmul.mubr.msk.bf16.gmra.mxu1 %vm505_vm3, %v1137_v8 }
 0xfa6   :  { %1253 = vmatprep.mubr.bf16.mxu0 %v4304_v1  ;;  %1358 = vmatprep.mubr.bf16.mxu1 %v4304_v1  ;;  %v1145_v12 = vld [vmem:[#allocation3 + $0x30] sm:$0xff] }
 0xfa7   :  { %v1150_v14 = vpack.c.bf16 %v1146_v21, %v1145_v12 }
 0xfaa   :  { %v1134_v13 = vld [vmem:[#allocation2 + $0x38] sm:$0xff] }
 0xfab   :  { %v1138_v15 = vpack.c.bf16 %v1134_v13, %v1133_v51 }
 0xfad   :  { %3711 = vmatmul.mubr.msk.bf16.gmra.mxu0 %vm505_vm3, %v1150_v14  ;;  %3719 = vmatmul.mubr.msk.bf16.gmra.mxu1 %vm505_vm3, %v1138_v15 }
 0xfae   :  { %1473 = vmatprep.mubr.bf16.mxu0 %v4304_v1  ;;  %1566 = vmatprep.mubr.bf16.mxu1 %v4304_v1 }
 0xfb5   :  { %3724 = vmatmul.mubr.msk.bf16.vlgmr.msra.gmra.mxu0 %vm505_vm3, %v1147_v20  ;;  %3732 = vmatmul.mubr.msk.bf16.vlgmr.msra.gmra.mxu1 %vm505_vm3, %v4726_v4  ;;  %v4838_v4 = vrot.slane %v1369_v57, %v4531_v33 }
 0xfb6   :  { %1686 = vmatpush1.bf16.msra.mxu0 %v4768_v52  ;;  %1483 = vmatprep.mubr.bf16.mxu0 %v4304_v1 }
 0xfb7   :  { %1576 = vmatprep.mubr.bf16.mxu1 %v4304_v1  ;;  %1687 = vmatprep.subr.bf16.mxu0 %v4770_v17 }
 0xfb8   :  { %1774 = vmatpush1.bf16.msra.mxu1 %v4768_v52 }
 0xfb9   :  { %1775 = vmatprep.subr.bf16.mxu1 %v4770_v17 }
 0xfba   :  { %1688 = vmatpush1.bf16.msra.mxu0 %v4777_v18 }
 0xfbb   :  { %1689 = vmatprep.subr.bf16.mxu0 %v4781_v34 }
 0xfbc   :  { %1776 = vmatpush1.bf16.msra.mxu1 %v4777_v18 }
 0xfbd   :  { %3725 = vmatmul.mubr.msk.bf16.gmra.mxu0 %vm505_vm3, %v1148_v44  ;;  %3733 = vmatmul.mubr.msk.bf16.gmra.mxu1 %vm505_vm3, %v1136_v48 }
 0xfbe   :  { %1493 = vmatprep.mubr.bf16.mxu0 %v4304_v1  ;;  %1586 = vmatprep.mubr.bf16.mxu1 %v4304_v1 }
 0xfbf   :  { %1690 = vmatpush1.bf16.msra.mxu0 %v4787_v47  ;;  %1777 = vmatprep.subr.bf16.mxu1 %v4781_v34 }
 0xfc0   :  { %1691 = vmatprep.subr.bf16.mxu0 %v4789_v19  ;;  %1778 = vmatpush1.bf16.msra.mxu1 %v4787_v47 }
 0xfc1   :  { %1779 = vmatprep.subr.bf16.mxu1 %v4789_v19 }
 0xfc3   :  { %1692 = vmatpush1.bf16.msra.mxu0 %v4797_v30 }
 0xfc4   :  { %1780 = vmatpush1.bf16.msra.mxu1 %v4797_v30  ;;  %1861 = vmatprep.subr.bf16.mxu0 %v4743_v62 }
 0xfc5   :  { %3726 = vmatmul.mubr.msk.bf16.gmra.mxu0 %vm505_vm3, %v1149_v32  ;;  %3734 = vmatmul.mubr.msk.bf16.gmra.mxu1 %vm505_vm3, %v1137_v8 }
 0xfc6   :  { %1503 = vmatprep.mubr.bf16.mxu0 %v4304_v1  ;;  %1596 = vmatprep.mubr.bf16.mxu1 %v4304_v1 }
 0xfc7   :  { %1949 = vmatprep.subr.bf16.mxu1 %v4743_v62 }
 0xfcd   :  { %3727 = vmatmul.mubr.msk.bf16.gmra.mxu0 %vm505_vm3, %v1150_v14  ;;  %3735 = vmatmul.mubr.msk.bf16.gmra.mxu1 %vm505_vm3, %v1138_v15 }
 0xfce   :  { %1709 = vmatprep.mubr.bf16.mxu0 %v4304_v1  ;;  %1797 = vmatprep.mubr.bf16.mxu1 %v4304_v1 }
 0xfd4   :  { %v1330_v9 = vpop.f32.mrf.mxu1 }
 0xfd5   :  { %1710 = vmatmul.mubr.bf16.vlgmr.msra.gmra.mxu0 %v4304_v1 }
 0xfd6   :  { %1862 = vmatpush1.bf16.msra.mxu0 %v4768_v52  ;;  %1885 = vmatprep.mubr.bf16.mxu0 %v4304_v1  ;;  %v4825_v3 = vpop.f32.mrf.mxu1 }
 0xfd7   :  { %1863 = vmatprep.subr.bf16.mxu0 %v4770_v17 }
 0xfd8   :  { %v1334_v54 = vpop.f32.mrf.mxu1 }
 0xfda   :  { %1864 = vmatpush1.bf16.msra.mxu0 %v4777_v18  ;;  %v1336_v53 = vpop.f32.mrf.mxu1 }
 0xfdb   :  { %1865 = vmatprep.subr.bf16.mxu0 %v4781_v34 }
 0xfde   :  { %1866 = vmatpush1.bf16.msra.mxu0 %v4787_v47 }
 0xfdf   :  { %1867 = vmatprep.subr.bf16.mxu0 %v4789_v19 }
 0xfe2   :  { %1868 = vmatpush1.bf16.msra.mxu0 %v4797_v30 }
 0xfe3   :  { %2037 = vmatprep.subr.bf16.mxu0 %v4743_v62 }
0x1055   :  { %v1225_v10 = vpop.f32.mrf.mxu0 }
0x1056   :  { %v4827_v28 = vadd.f32 %v1330_v9, %v1225_v10 }
0x1057   :  { %v4832_v27 = vpop.f32.mrf.mxu0 }
0x1059   :  { %v1229_v39 = vpop.f32.mrf.mxu0  ;;  %v1340_v60 = vpop.f32.mrf.mxu1 }
0x105a   :  { %v1335_v61 = vadd.f32 %v1334_v54, %v1229_v39 }
0x105b   :  { %v1231_v63 = vpop.f32.mrf.mxu0  ;;  %v1342_v2 = vpop.f32.mrf.mxu1 }
0x105c   :  { %v4841_v6 = vadd.f32 %v4835_v29, %v1335_v61  ;;  %v1337_v7 = vadd.f32 %v1336_v53, %v1231_v63 }
0x105d   :  { %v1235_v11 = vpop.f32.mrf.mxu0  ;;  %v1344_v43 = vpop.f32.mrf.mxu1 }
0x105e   :  { %v4844_v16 = vadd.f32 %v4838_v4, %v1337_v7  ;;  %v1341_v23 = vadd.f32 %v1340_v60, %v1235_v11 }
0x105f   :  { %v1237_v0 = vpop.f32.mrf.mxu0  ;;  %v1346_v36 = vpop.f32.mrf.mxu1 }
0x1060   :  { %v4847_v22 = vadd.f32 %v4835_v29, %v1341_v23  ;;  %v1343_v59 = vadd.f32 %v1342_v2, %v1237_v0 }
0x1061   :  { %v1239_v25 = vpop.f32.mrf.mxu0 }
0x1062   :  { %v4850_v31 = vadd.f32 %v4838_v4, %v1343_v59  ;;  %v1345_v55 = vadd.f32 %v1344_v43, %v1239_v25 }
0x1063   :  { %v1241_v20 = vpop.f32.mrf.mxu0 }
0x1064   :  { %v4853_v26 = vadd.f32 %v4835_v29, %v1345_v55  ;;  %v1347_v37 = vadd.f32 %v1346_v36, %v1241_v20 }
0x1065   :  { %v1245_v58 = vpop.f32.mrf.mxu0  ;;  %v1350_v40 = vpop.f32.mrf.mxu1 }
0x1066   :  { %v4856_v41 = vadd.f32 %v4838_v4, %v1347_v37  ;;  %v1351_v48 = vadd.f32 %v1350_v40, %v1245_v58 }
0x1067   :  { %v1247_v56 = vpop.f32.mrf.mxu0  ;;  %v1352_v35 = vpop.f32.mrf.mxu1 }
0x1068   :  { %v1389_v38 = vadd.f32 %v4835_v29, %v1351_v48  ;;  %v1353_v44 = vadd.f32 %v1352_v35, %v1247_v56 }
0x1069   :  { %v1249_v5 = vpop.f32.mrf.mxu0  ;;  %v1354_v42 = vpop.f32.mrf.mxu1 }
0x106a   :  { %v1390_v45 = vadd.f32 %v4838_v4, %v1353_v44  ;;  %v1355_v46 = vadd.f32 %v1354_v42, %v1249_v5 }
0x106b   :  { %v1251_v49 = vpop.f32.mrf.mxu0  ;;  %v1356_v50 = vpop.f32.mrf.mxu1 }
0x106c   :  { %v1391_v32 = vadd.f32 %v4835_v29, %v1355_v46  ;;  %v1357_v8 = vadd.f32 %v1356_v50, %v1251_v49 }
0x106d   :  { %v1255_v12 = vpop.f32.mrf.mxu0  ;;  %v1360_v21 = vpop.f32.mrf.mxu1 }
0x106e   :  { %v1392_v51 = vadd.f32 %v4838_v4, %v1357_v8  ;;  %v1361_v13 = vadd.f32 %v1360_v21, %v1255_v12 }
0x106f   :  { %v1257_v14 = vpop.f32.mrf.mxu0  ;;  %v1362_v15 = vpop.f32.mrf.mxu1 }
0x1070   :  { %v1393_v9 = vadd.f32 %v4835_v29, %v1361_v13  ;;  %v1363_v54 = vadd.f32 %v1362_v15, %v1257_v14 }
0x1071   :  { %v1259_v10 = vpop.f32.mrf.mxu0  ;;  %v1364_v53 = vpop.f32.mrf.mxu1 }
0x1072   :  { %v1394_v57 = vadd.f32 %v4838_v4, %v1363_v54  ;;  %v1365_v39 = vadd.f32 %v1364_v53, %v1259_v10 }
0x1073   :  { %v1261_v60 = vpop.f32.mrf.mxu0  ;;  %v1366_v61 = vpop.f32.mrf.mxu1 }
0x1074   :  { %v1395_v63 = vadd.f32 %v4835_v29, %v1365_v39  ;;  %v1367_v2 = vadd.f32 %v1366_v61, %v1261_v60 }
0x1075   :  { %v1475_v7 = vpop.f32.mrf.mxu0  ;;  %v1568_v11 = vpop.f32.mrf.mxu1 }
0x1076   :  { %v1396_v23 = vadd.f32 %v4838_v4, %v1367_v2  ;;  %v1569_v43 = vadd.f32 %v1568_v11, %v1475_v7 }
0x1077   :  { %v1477_v0 = vpop.f32.mrf.mxu0  ;;  %v1570_v59 = vpop.f32.mrf.mxu1 }
0x1078   :  { %v1571_v25 = vadd.f32 %v1570_v59, %v1477_v0  ;;  %v4866_v55 = vadd.f32 %v1569_v43, %v1395_v63 }
0x1079   :  { %v1479_v36 = vpop.f32.mrf.mxu0  ;;  %v1572_v20 = vpop.f32.mrf.mxu1 }
0x107a   :  { %v1573_v37 = vadd.f32 %v1572_v20, %v1479_v36  ;;  %v4868_v58 = vadd.f32 %v1571_v25, %v1396_v23 }
0x107b   :  { %v1481_v40 = vpop.f32.mrf.mxu0  ;;  %v1574_v48 = vpop.f32.mrf.mxu1 }
0x107c   :  { %v1575_v56 = vadd.f32 %v1574_v48, %v1481_v40  ;;  %v4870_v35 = vadd.f32 %v1573_v37, %v1393_v9  ;;  %v1333_v48 = vadd.f32 %v4825_v3, %v4832_v27 }
0x107d   :  { %v1485_v44 = vpop.f32.mrf.mxu0  ;;  %v1578_v5 = vpop.f32.mrf.mxu1 }
0x107e   :  { %v1579_v42 = vadd.f32 %v1578_v5, %v1485_v44  ;;  %v4872_v46 = vadd.f32 %v1575_v56, %v1394_v57 }
0x107f   :  { %v1487_v49 = vpop.f32.mrf.mxu0  ;;  %v1580_v50 = vpop.f32.mrf.mxu1 }
0x1080   :  { %v1581_v8 = vadd.f32 %v1580_v50, %v1487_v49  ;;  %v4874_v12 = vadd.f32 %v1579_v42, %v1391_v32 }
0x1081   :  { %v1489_v21 = vpop.f32.mrf.mxu0  ;;  %v1582_v13 = vpop.f32.mrf.mxu1 }
0x1082   :  { %v1583_v14 = vadd.f32 %v1582_v13, %v1489_v21  ;;  %v4876_v15 = vadd.f32 %v1581_v8, %v1392_v51 }
0x1083   :  { %v1491_v54 = vpop.f32.mrf.mxu0  ;;  %v1584_v10 = vpop.f32.mrf.mxu1 }
0x1084   :  { %v1585_v53 = vadd.f32 %v1584_v10, %v1491_v54  ;;  %v4878_v9 = vadd.f32 %v1583_v14, %v1389_v38 }
0x1085   :  { %v1495_v39 = vpop.f32.mrf.mxu0  ;;  %v1588_v60 = vpop.f32.mrf.mxu1 }
0x1086   :  { %v1589_v61 = vadd.f32 %v1588_v60, %v1495_v39  ;;  %v4880_v57 = vadd.f32 %v1585_v53, %v1390_v45 }
0x1087   :  { %v1497_v63 = vpop.f32.mrf.mxu0  ;;  %v1590_v2 = vpop.f32.mrf.mxu1 }
0x1088   :  { %v1591_v7 = vadd.f32 %v1590_v2, %v1497_v63  ;;  %v4883_v32 = vadd.f32 %v1589_v61, %v4853_v26 }
0x1089   :  { %v1499_v11 = vpop.f32.mrf.mxu0  ;;  %v1592_v23 = vpop.f32.mrf.mxu1 }
0x108a   :  { %v1593_v51 = vadd.f32 %v1592_v23, %v1499_v11  ;;  %v4886_v43 = vadd.f32 %v1591_v7, %v4856_v41 }
0x108b   :  { %v1501_v0 = vpop.f32.mrf.mxu0  ;;  %v1594_v38 = vpop.f32.mrf.mxu1 }
0x108c   :  { %v1595_v59 = vadd.f32 %v1594_v38, %v1501_v0  ;;  %v4889_v25 = vadd.f32 %v1593_v51, %v4847_v22  ;;  %v1381_v22 = vadd.f32 %v4835_v29, %v4827_v28 }
0x108d   :  { %v1505_v45 = vpop.f32.mrf.mxu0  ;;  %v1598_v36 = vpop.f32.mrf.mxu1 }
0x108e   :  { %v1599_v20 = vadd.f32 %v1598_v36, %v1505_v45  ;;  %v4892_v37 = vadd.f32 %v1595_v59, %v4850_v31  ;;  %v1382_v31 = vadd.f32 %v4838_v4, %v1333_v48 }
0x108f   :  { %v1507_v26 = vpop.f32.mrf.mxu0  ;;  %v1600_v40 = vpop.f32.mrf.mxu1 }
0x1090   :  { %v1601_v56 = vadd.f32 %v1600_v40, %v1507_v26  ;;  %v1756_v41 = vadd.f32 %v1599_v20, %v4841_v6 }
0x1091   :  { %v1509_v44 = vpop.f32.mrf.mxu0  ;;  %v1602_v5 = vpop.f32.mrf.mxu1 }
0x1092   :  { %v1603_v42 = vadd.f32 %v1602_v5, %v1509_v44  ;;  %v1757_v49 = vadd.f32 %v1601_v56, %v4844_v16 }
0x1093   :  { %v1511_v50 = vpop.f32.mrf.mxu0  ;;  %v1604_v8 = vpop.f32.mrf.mxu1 }
0x1094   :  { %v1605_v21 = vadd.f32 %v1604_v8, %v1511_v50  ;;  %v1635_v13 = vadd.f32 %v1603_v42, %v1381_v22 }
0x1095   :  { %v1711_v14 = vpop.f32.mrf.mxu0 }
0x1096   :  { %v1718_v54 = vadd.f32 %v1711_v14, %v1635_v13  ;;  %v1636_v3 = vadd.f32 %v1605_v21, %v1382_v31 }
0x1097   :  { %v1713_v27 = vpop.f32.mrf.mxu0 }
0x1098   :  { %v3744_v10 = vmul.f32 -1.442695, %v1718_v54  ;;  %v1719_v6 = vadd.f32 %v1713_v27, %v1636_v3 }
0x1099   :  { %v1715_v53 = vpop.f32.mrf.mxu0 }
0x109a   :  { %v3745_v39 = vmul.f32 -1.442695, %v1719_v6  ;;  %4031 = vpow2.f32 %v3744_v10 }
0x109b   :  { %v1716_v60 = vpop.f32.mrf.mxu0 }
0x109c   :  { %4033 = vpow2.f32 %v3745_v39 }
0x10a7   :  { %v4032_v28 = vpop.eup %4031 }
0x10a8   :  { %v1726_v61 = vadd.f32 1.0, %v4032_v28 }
0x10a9   :  { %v4034_v29 = vpop.eup %4033 }
0x10aa   :  { %v1727_v16 = vadd.f32 1.0, %v4034_v29 }
0x10ac   :  { %4035 = vrcp.f32 %v1727_v16 }
0x10ad   :  { %4037 = vrcp.f32 %v1726_v61 }
0x10b9   :  { %v4036_v4 = vpop.eup %4035 }
0x10ba   :  { %v1732_v63 = vmul.f32 2.0, %v4036_v4  ;;  %v4038_v7 = vpop.eup %4037 }
0x10bb   :  { %v1734_v23 = vmul.f32 0.0, %v4038_v7 }
0x10bc   :  { %v3746_v2 = vadd.f32 -1.0, %v1732_v63 }
0x10be   :  { %v1735_v11 = vmul.f32 %v4038_v7, %v3746_v2 }
0x10c0   :  { %1737 = vrot.lane.b32.xlu1 %v1735_v11, %s4305_s3 }
0x1132   :  { %v1738_v51 = vpop.permute.xlu1 %1737 }
0x1133   :  { %v1740_v0 = vadd.f32 %v1738_v51, %v1734_v23 }
0x1135   :  { %4039 = vtanh.f32 %v1740_v0 }
0x1142   :  { %v4040_v38 = vpop.eup %4039 }
0x1143   :  { %v4902_v59 = vmul.f32 %v4040_v38, %v4036_v4 }
0x1145   :  { %v1758_v45 = vpack.c.bf16 %v4902_v59, %v4902_v59 }
0x1147   :  { %1760 = vrot.lane.b32.xlu0 %v1758_v45, %s4305_s3 }
0x11b9   :  { %v1761_v36 = vpop.permute.xlu0 %1760 }
0x11ba   :  { %3747 = vmatmul.mubr.msk.bf16.vlgmr.msra.gmra.mxu1 %vm431_vm2, %v1761_v36 }
0x11bb   :  { %1950 = vmatpush1.bf16.msra.mxu1 %v4768_v52  ;;  %1973 = vmatprep.mubr.bf16.mxu1 %v4304_v1 }
0x11bc   :  { %1951 = vmatprep.subr.bf16.mxu1 %v4770_v17 }
0x11bf   :  { %1952 = vmatpush1.bf16.msra.mxu1 %v4777_v18 }
0x11c0   :  { %1953 = vmatprep.subr.bf16.mxu1 %v4781_v34 }
0x11c3   :  { %1954 = vmatpush1.bf16.msra.mxu1 %v4787_v47 }
0x11c4   :  { %1955 = vmatprep.subr.bf16.mxu1 %v4789_v19 }
0x11c7   :  { %1956 = vmatpush1.bf16.msra.mxu1 %v4797_v30 }
0x11c8   :  { %2125 = vmatprep.subr.bf16.mxu1 %v4743_v62 }
0x127a   :  { %v1799_v20 = vpop.f32.mrf.mxu1 }
0x127b   :  { %v1806_v26 = vadd.f32 %v1799_v20, %v1756_v41 }
0x127c   :  { %v1801_v40 = vpop.f32.mrf.mxu1 }
0x127d   :  { %v3748_v48 = vmul.f32 -1.442695, %v1806_v26  ;;  %v1807_v56 = vadd.f32 %v1801_v40, %v1757_v49 }
0x127e   :  { %v1803_v44 = vpop.f32.mrf.mxu1 }
0x127f   :  { %v3749_v5 = vmul.f32 -1.442695, %v1807_v56  ;;  %4041 = vpow2.f32 %v3748_v48 }
0x1280   :  { %v1804_v22 = vpop.f32.mrf.mxu1 }
0x1281   :  { %4043 = vpow2.f32 %v3749_v5 }
0x128c   :  { %v4042_v42 = vpop.eup %4041 }
0x128d   :  { %v1814_v31 = vadd.f32 1.0, %v4042_v42 }
0x128e   :  { %v4044_v50 = vpop.eup %4043 }
0x128f   :  { %v1815_v8 = vadd.f32 1.0, %v4044_v50 }
0x1291   :  { %4045 = vrcp.f32 %v1815_v8 }
0x1292   :  { %4047 = vrcp.f32 %v1814_v31 }
0x129e   :  { %v4046_v21 = vpop.eup %4045 }
0x129f   :  { %v1820_v13 = vmul.f32 2.0, %v4046_v21  ;;  %v4048_v54 = vpop.eup %4047 }
0x12a0   :  { %v1822_v41 = vmul.f32 %v4048_v54, %v1740_v0 }
0x12a1   :  { %v3750_v14 = vadd.f32 -1.0, %v1820_v13 }
0x12a3   :  { %v1823_v3 = vmul.f32 %v4048_v54, %v3750_v14 }
0x12a5   :  { %1825 = vrot.lane.b32.xlu1 %v1823_v3, %s4305_s3 }
0x1317   :  { %v1826_v49 = vpop.permute.xlu1 %1825 }
0x1318   :  { %v1828_v27 = vadd.f32 %v1826_v49, %v1822_v41 }
0x131a   :  { %4049 = vtanh.f32 %v1828_v27 }
0x1327   :  { %v4050_v10 = vpop.eup %4049 }
0x1328   :  { %v4918_v6 = vmul.f32 %v4050_v10, %v4046_v21 }
0x132a   :  { %v1846_v53 = vpack.c.bf16 %v4918_v6, %v4918_v6 }
0x132c   :  { %1848 = vrot.lane.b32.xlu0 %v1846_v53, %s4305_s3 }
0x139e   :  { %v1849_v39 = vpop.permute.xlu0 %1848 }
0x139f   :  { %3751 = vmatmul.mubr.msk.bf16.vlgmr.msra.gmra.mxu0 %vm431_vm2, %v1849_v39 }
0x13a0   :  { %2038 = vmatpush1.bf16.msra.mxu0 %v4768_v52  ;;  %2061 = vmatprep.mubr.bf16.mxu0 %v4304_v1 }
0x13a1   :  { %2039 = vmatprep.subr.bf16.mxu0 %v4770_v17 }
0x13a4   :  { %2040 = vmatpush1.bf16.msra.mxu0 %v4777_v18 }
0x13a5   :  { %2041 = vmatprep.subr.bf16.mxu0 %v4781_v34 }
0x13a8   :  { %2042 = vmatpush1.bf16.msra.mxu0 %v4787_v47 }
0x13a9   :  { %2043 = vmatprep.subr.bf16.mxu0 %v4789_v19 }
0x13ac   :  { %2044 = vmatpush1.bf16.msra.mxu0 %v4797_v30 }
0x13ad   :  { %2213 = vmatprep.subr.bf16.mxu0 %v4743_v62 }
0x145f   :  { %v1887_v60 = vpop.f32.mrf.mxu0 }
0x1460   :  { %v1894_v28 = vadd.f32 %v1887_v60, %v4889_v25 }
0x1461   :  { %v1889_v29 = vpop.f32.mrf.mxu0 }
0x1462   :  { %v3752_v16 = vmul.f32 -1.442695, %v1894_v28  ;;  %v1895_v61 = vadd.f32 %v1889_v29, %v4892_v37 }
0x1463   :  { %v1891_v4 = vpop.f32.mrf.mxu0 }
0x1464   :  { %v3753_v63 = vmul.f32 -1.442695, %v1895_v61  ;;  %4051 = vpow2.f32 %v3752_v16 }
0x1465   :  { %v1892_v2 = vpop.f32.mrf.mxu0 }
0x1466   :  { %4053 = vpow2.f32 %v3753_v63 }
0x1471   :  { %v4052_v7 = vpop.eup %4051 }
0x1472   :  { %v1902_v51 = vadd.f32 1.0, %v4052_v7 }
0x1473   :  { %v4054_v11 = vpop.eup %4053 }
0x1474   :  { %v1903_v23 = vadd.f32 1.0, %v4054_v11 }
0x1476   :  { %4055 = vrcp.f32 %v1903_v23 }
0x1477   :  { %4057 = vrcp.f32 %v1902_v51 }
0x1483   :  { %v4056_v0 = vpop.eup %4055 }
0x1484   :  { %v1908_v38 = vmul.f32 2.0, %v4056_v0  ;;  %v4058_v36 = vpop.eup %4057 }
0x1485   :  { %v1910_v20 = vmul.f32 %v4058_v36, %v1828_v27 }
0x1486   :  { %v3754_v45 = vadd.f32 -1.0, %v1908_v38 }
0x1488   :  { %v1911_v25 = vmul.f32 %v4058_v36, %v3754_v45 }
0x148a   :  { %1913 = vrot.lane.b32.xlu1 %v1911_v25, %s4305_s3 }
0x14fc   :  { %v1914_v37 = vpop.permute.xlu1 %1913 }
0x14fd   :  { %v1916_v26 = vadd.f32 %v1914_v37, %v1910_v20 }
0x14ff   :  { %4059 = vtanh.f32 %v1916_v26 }
0x150c   :  { %v4060_v40 = vpop.eup %4059 }
0x150d   :  { %v4936_v48 = vmul.f32 %v4060_v40, %v4056_v0 }
0x150f   :  { %v1934_v56 = vpack.c.bf16 %v4936_v48, %v4936_v48 }
0x1511   :  { %1936 = vrot.lane.b32.xlu0 %v1934_v56, %s4305_s3 }
0x1583   :  { %v1937_v44 = vpop.permute.xlu0 %1936 }
0x1584   :  { %3755 = vmatmul.mubr.msk.bf16.vlgmr.msra.gmra.mxu1 %vm431_vm2, %v1937_v44 }
0x1585   :  { %2126 = vmatpush1.bf16.msra.mxu1 %v4768_v52  ;;  %2149 = vmatprep.mubr.bf16.mxu1 %v4304_v1 }
0x1586   :  { %2127 = vmatprep.subr.bf16.mxu1 %v4770_v17 }
0x1589   :  { %2128 = vmatpush1.bf16.msra.mxu1 %v4777_v18 }
0x158a   :  { %2129 = vmatprep.subr.bf16.mxu1 %v4781_v34 }
0x158d   :  { %2130 = vmatpush1.bf16.msra.mxu1 %v4787_v47 }
0x158e   :  { %2131 = vmatprep.subr.bf16.mxu1 %v4789_v19 }
0x1591   :  { %2132 = vmatpush1.bf16.msra.mxu1 %v4797_v30 }
0x1592   :  { %2301 = vmatprep.subr.bf16.mxu1 %v4743_v62 }
0x1644   :  { %v1975_v5 = vpop.f32.mrf.mxu1 }
0x1645   :  { %v1982_v22 = vadd.f32 %v1975_v5, %v4883_v32 }
0x1646   :  { %v1977_v42 = vpop.f32.mrf.mxu1 }
0x1647   :  { %v3756_v50 = vmul.f32 -1.442695, %v1982_v22  ;;  %v1983_v8 = vadd.f32 %v1977_v42, %v4886_v43 }
0x1648   :  { %v1979_v31 = vpop.f32.mrf.mxu1 }
0x1649   :  { %v3757_v21 = vmul.f32 -1.442695, %v1983_v8  ;;  %4061 = vpow2.f32 %v3756_v50 }
0x164a   :  { %v1980_v13 = vpop.f32.mrf.mxu1 }
0x164b   :  { %4063 = vpow2.f32 %v3757_v21 }
0x1656   :  { %v4062_v14 = vpop.eup %4061 }
0x1657   :  { %v1990_v41 = vadd.f32 1.0, %v4062_v14 }
0x1658   :  { %v4064_v54 = vpop.eup %4063 }
0x1659   :  { %v1991_v3 = vadd.f32 1.0, %v4064_v54 }
0x165b   :  { %4065 = vrcp.f32 %v1991_v3 }
0x165c   :  { %4067 = vrcp.f32 %v1990_v41 }
0x1668   :  { %v4066_v49 = vpop.eup %4065 }
0x1669   :  { %v1996_v62 = vmul.f32 2.0, %v4066_v49  ;;  %v4068_v10 = vpop.eup %4067 }
0x166a   :  { %v1998_v53 = vmul.f32 %v4068_v10, %v1916_v26 }
0x166b   :  { %v3758_v27 = vadd.f32 -1.0, %v1996_v62 }
0x166d   :  { %v1999_v32 = vmul.f32 %v4068_v10, %v3758_v27 }
0x166f   :  { %2001 = vrot.lane.b32.xlu1 %v1999_v32, %s4305_s3 }
0x16e1   :  { %v2002_v43 = vpop.permute.xlu1 %2001 }
0x16e2   :  { %v2004_v39 = vadd.f32 %v2002_v43, %v1998_v53 }
0x16e4   :  { %4069 = vtanh.f32 %v2004_v39 }
0x16f1   :  { %v4070_v60 = vpop.eup %4069 }
0x16f2   :  { %v4954_v28 = vmul.f32 %v4070_v60, %v4066_v49 }
0x16f4   :  { %v2022_v29 = vpack.c.bf16 %v4954_v28, %v4954_v28 }
0x16f6   :  { %2024 = vrot.lane.b32.xlu0 %v2022_v29, %s4305_s3 }
0x1768   :  { %v2025_v16 = vpop.permute.xlu0 %2024 }
0x1769   :  { %3759 = vmatmul.mubr.msk.bf16.vlgmr.msra.gmra.mxu0 %vm431_vm2, %v2025_v16 }
0x176a   :  { %2214 = vmatpush1.bf16.msra.mxu0 %v4768_v52  ;;  %2237 = vmatprep.mubr.bf16.mxu0 %v4304_v1 }
0x176b   :  { %2215 = vmatprep.subr.bf16.mxu0 %v4770_v17 }
0x176e   :  { %2216 = vmatpush1.bf16.msra.mxu0 %v4777_v18 }
0x176f   :  { %2217 = vmatprep.subr.bf16.mxu0 %v4781_v34 }
0x1772   :  { %2218 = vmatpush1.bf16.msra.mxu0 %v4787_v47 }
0x1773   :  { %2219 = vmatprep.subr.bf16.mxu0 %v4789_v19 }
0x1776   :  { %2220 = vmatpush1.bf16.msra.mxu0 %v4797_v30 }
0x1829   :  { %v2063_v61 = vpop.f32.mrf.mxu0 }
0x182a   :  { %v2070_v4 = vadd.f32 %v2063_v61, %v4878_v9 }
0x182b   :  { %v2065_v63 = vpop.f32.mrf.mxu0 }
0x182c   :  { %v3760_v2 = vmul.f32 -1.442695, %v2070_v4  ;;  %v2071_v7 = vadd.f32 %v2065_v63, %v4880_v57 }
0x182d   :  { %v2067_v11 = vpop.f32.mrf.mxu0 }
0x182e   :  { %v3761_v23 = vmul.f32 -1.442695, %v2071_v7  ;;  %4071 = vpow2.f32 %v3760_v2 }
0x182f   :  { %v2068_v51 = vpop.f32.mrf.mxu0 }
0x1830   :  { %4073 = vpow2.f32 %v3761_v23 }
0x183b   :  { %v4072_v0 = vpop.eup %4071 }
0x183c   :  { %v2078_v36 = vadd.f32 1.0, %v4072_v0 }
0x183d   :  { %v4074_v38 = vpop.eup %4073 }
0x183e   :  { %v2079_v45 = vadd.f32 1.0, %v4074_v38 }
0x1840   :  { %4075 = vrcp.f32 %v2079_v45 }
0x1841   :  { %4077 = vrcp.f32 %v2078_v36 }
0x184d   :  { %v4076_v25 = vpop.eup %4075 }
0x184e   :  { %v2084_v20 = vmul.f32 2.0, %v4076_v25  ;;  %v4078_v26 = vpop.eup %4077 }
0x184f   :  { %v2086_v40 = vmul.f32 %v4078_v26, %v2004_v39 }
0x1850   :  { %v3762_v37 = vadd.f32 -1.0, %v2084_v20 }
0x1852   :  { %v2087_v9 = vmul.f32 %v4078_v26, %v3762_v37 }
0x1854   :  { %2089 = vrot.lane.b32.xlu1 %v2087_v9, %s4305_s3 }
0x18c6   :  { %v2090_v57 = vpop.permute.xlu1 %2089 }
0x18c7   :  { %v2092_v56 = vadd.f32 %v2090_v57, %v2086_v40 }
0x18c9   :  { %4079 = vtanh.f32 %v2092_v56 }
0x18d6   :  { %v4080_v44 = vpop.eup %4079 }
0x18d7   :  { %v4971_v5 = vmul.f32 %v4080_v44, %v4076_v25 }
0x18d9   :  { %v2110_v22 = vpack.c.bf16 %v4971_v5, %v4971_v5 }
0x18db   :  { %2112 = vrot.lane.b32.xlu0 %v2110_v22, %s4305_s3 }
0x194d   :  { %v2113_v42 = vpop.permute.xlu0 %2112 }
0x194e   :  { %3763 = vmatmul.mubr.msk.bf16.vlgmr.msra.gmra.mxu1 %vm431_vm2, %v2113_v42 }
0x194f   :  { %2302 = vmatpush1.bf16.msra.mxu1 %v4768_v52  ;;  %2325 = vmatprep.mubr.bf16.mxu1 %v4304_v1 }
0x1950   :  { %2303 = vmatprep.subr.bf16.mxu1 %v4770_v17 }
0x1953   :  { %2304 = vmatpush1.bf16.msra.mxu1 %v4777_v18 }
0x1954   :  { %2305 = vmatprep.subr.bf16.mxu1 %v4781_v34 }
0x1957   :  { %2306 = vmatpush1.bf16.msra.mxu1 %v4787_v47 }
0x1958   :  { %2307 = vmatprep.subr.bf16.mxu1 %v4789_v19 }
0x195b   :  { %2308 = vmatpush1.bf16.msra.mxu1 %v4797_v30 }
0x1a0e   :  { %v2151_v50 = vpop.f32.mrf.mxu1 }
0x1a0f   :  { %v2158_v8 = vadd.f32 %v2151_v50, %v4874_v12 }
0x1a10   :  { %v2153_v31 = vpop.f32.mrf.mxu1 }
0x1a11   :  { %v3764_v21 = vmul.f32 -1.442695, %v2158_v8  ;;  %v2159_v52 = vadd.f32 %v2153_v31, %v4876_v15 }
0x1a12   :  { %v2155_v13 = vpop.f32.mrf.mxu1 }
0x1a13   :  { %v3765_v14 = vmul.f32 -1.442695, %v2159_v52  ;;  %4081 = vpow2.f32 %v3764_v21 }
0x1a14   :  { %v2156_v17 = vpop.f32.mrf.mxu1 }
0x1a15   :  { %4083 = vpow2.f32 %v3765_v14 }
0x1a20   :  { %v4082_v18 = vpop.eup %4081 }
0x1a21   :  { %v2166_v47 = vadd.f32 1.0, %v4082_v18 }
0x1a22   :  { %v4084_v34 = vpop.eup %4083 }
0x1a23   :  { %v2167_v54 = vadd.f32 1.0, %v4084_v34 }
0x1a25   :  { %4085 = vrcp.f32 %v2167_v54 }
0x1a26   :  { %4087 = vrcp.f32 %v2166_v47  ;;  %v3915_v47 = vld [vmem:[#allocation11 + $0x10] ss:$8 sps:$4 sm:$0xff]  }
0x1a32   :  { %v4086_v19 = vpop.eup %4085 }
0x1a33   :  { %v2172_v30 = vmul.f32 2.0, %v4086_v19  ;;  %v4088_v41 = vpop.eup %4087 }
0x1a34   :  { %v2174_v49 = vmul.f32 %v4088_v41, %v2092_v56 }
0x1a35   :  { %v3766_v3 = vadd.f32 -1.0, %v2172_v30  ;;  %v3920_v30 = vld [vmem:[#allocation11 + $0x4] ss:$8 sps:$4 sm:$0xff]  }
0x1a37   :  { %v2175_v12 = vmul.f32 %v4088_v41, %v3766_v3  ;;  %v3918_v41 = vld [vmem:[#allocation11] ss:$8 sps:$4 sm:$0xff]  }
0x1a39   :  { %2177 = vrot.lane.b32.xlu1 %v2175_v12, %s4305_s3 }
0x1aab   :  { %v2178_v15 = vpop.permute.xlu1 %2177 }
0x1aac   :  { %v2180_v62 = vadd.f32 %v2178_v15, %v2174_v49 }
0x1aae   :  { %4089 = vtanh.f32 %v2180_v62 }
0x1abb   :  { %v4090_v27 = vpop.eup %4089 }
0x1abc   :  { %v4988_v10 = vmul.f32 %v4090_v27, %v4086_v19  ;;  %v3917_v19 = vld [vmem:[#allocation11 + $0x14] ss:$8 sps:$4 sm:$0xff]  }
0x1abd   :  { %2549 = vmatprep.subr.bf16.mxu1 %v3917_v19  ;;  %v5088_v19 = vld [vmem:[#allocation14 + $0x14] ss:$8 sps:$4 sm:$0xff]  }
0x1abe   :  { %v2198_v32 = vpack.c.bf16 %v4988_v10, %v4988_v10 }
0x1ac0   :  { %2200 = vrot.lane.b32.xlu0 %v2198_v32, %s4305_s3 }
0x1b32   :  { %v2201_v53 = vpop.permute.xlu0 %2200 }
0x1b33   :  { %3767 = vmatmul.mubr.msk.bf16.vlgmr.msra.gmra.mxu0 %vm431_vm2, %v2201_v53  ;;  %v3921_v53 = vld [vmem:[#allocation11 + $0x30] ss:$8 sps:$4 sm:$0xff]  }
0x1b34   :  { %2464 = vmatprep.mubr.bf16.mxu0 %v4304_v1 }
0x1bf3   :  { %v2239_v43 = vpop.f32.mrf.mxu0 }
0x1bf4   :  { %v2246_v39 = vadd.f32 %v2239_v43, %v4870_v35  ;;  %v3923_v43 = vld [vmem:[#allocation11 + $0x34] ss:$8 sps:$4 sm:$0xff]  }
0x1bf5   :  { %v2241_v60 = vpop.f32.mrf.mxu0  ;;  %2444 = vmatprep.subr.bf16.mxu0 %v3923_v43 }
0x1bf6   :  { %v3768_v29 = vmul.f32 -1.442695, %v2246_v39  ;;  %v2247_v16 = vadd.f32 %v2241_v60, %v4872_v46  ;;  %2445 = vmatpush1.bf16.msra.mxu0 %v3921_v53  ;;  %v3924_v39 = vld [vmem:[#allocation11 + $0x20] ss:$8 sps:$4 sm:$0xff]   ;;  %v3926_v60 = vld [vmem:[#allocation11 + $0x24] ss:$8 sps:$4 sm:$0xff]  }
0x1bf7   :  { %v2243_v61 = vpop.f32.mrf.mxu0  ;;  %2446 = vmatprep.subr.bf16.mxu0 %v3926_v60 }
0x1bf8   :  { %v3769_v4 = vmul.f32 -1.442695, %v2247_v16  ;;  %4091 = vpow2.f32 %v3768_v29 }
0x1bf9   :  { %v2244_v63 = vpop.f32.mrf.mxu0 }
0x1bfa   :  { %4093 = vpow2.f32 %v3769_v4  ;;  %2447 = vmatpush1.bf16.msra.mxu0 %v3924_v39  ;;  %v3929_v63 = vld [vmem:[#allocation12 + $0x34] ss:$8 sps:$4 sm:$0xff]  }
0x1bfb   :  { %2694 = vmatprep.subr.bf16.mxu0 %v3929_v63 }
0x1c05   :  { %v4092_v2 = vpop.eup %4091 }
0x1c06   :  { %v2254_v23 = vadd.f32 1.0, %v4092_v2  ;;  %v3930_v2 = vld [vmem:[#allocation12 + $0x10] ss:$8 sps:$4 sm:$0xff]  }
0x1c07   :  { %v4094_v7 = vpop.eup %4093 }
0x1c08   :  { %v2255_v11 = vadd.f32 1.0, %v4094_v7 }
0x1c0a   :  { %4095 = vrcp.f32 %v2255_v11  ;;  %v3932_v11 = vld [vmem:[#allocation12 + $0x14] ss:$8 sps:$4 sm:$0xff]  }
0x1c0b   :  { %4097 = vrcp.f32 %v2254_v23  ;;  %v3936_v23 = vld [vmem:[#allocation12] ss:$8 sps:$4 sm:$0xff]  }
0x1c17   :  { %v4096_v51 = vpop.eup %4095 }
0x1c18   :  { %v2260_v0 = vmul.f32 2.0, %v4096_v51  ;;  %v4098_v45 = vpop.eup %4097 }
0x1c19   :  { %v2262_v36 = vmul.f32 %v4098_v45, %v2180_v62 }
0x1c1a   :  { %v3770_v38 = vadd.f32 -1.0, %v2260_v0  ;;  %v5050_v0 = vld [vmem:[#allocation14 + $0x34] ss:$8 sps:$4 sm:$0xff]  }
0x1c1c   :  { %v2263_v35 = vmul.f32 %v4098_v45, %v3770_v38 }
0x1c1e   :  { %2265 = vrot.lane.b32.xlu1 %v2263_v35, %s4305_s3 }
0x1c90   :  { %v2266_v46 = vpop.permute.xlu1 %2265 }
0x1c91   :  { %v4998_v25 = vadd.f32 %v2266_v46, %v2262_v36  ;;  %v3927_v36 = vld [vmem:[#allocation12 + $0x30] ss:$8 sps:$4 sm:$0xff]  }
0x1c93   :  { %4099 = vtanh.f32 %v4998_v25 }
0x1ca0   :  { %v4100_v20 = vpop.eup %4099 }
0x1ca1   :  { %v2270_v37 = vmul.f32 %v4100_v20, %v4096_v51  ;;  %v3938_v51 = vld [vmem:[#allocation12 + $0x4] ss:$8 sps:$4 sm:$0xff]  }
0x1ca3   :  { %v2286_v26 = vpack.c.bf16 %v2270_v37, %v2270_v37 }
0x1ca5   :  { %2288 = vrot.lane.b32.xlu0 %v2286_v26, %s4305_s3  ;;  %v3933_v26 = vld [vmem:[#allocation12 + $0x20] ss:$8 sps:$4 sm:$0xff]  }
0x1ca9   :  { %1744 = vrot.lane.b32.xlu0 %v4902_v59, %s4305_s3 }
0x1cad   :  { %2276 = vrot.lane.b32.xlu0 %v2270_v37, %s4306_s25 }
0x1cb1   :  { %1920 = vrot.lane.b32.xlu0 %v4936_v48, %s4305_s3 }
0x1cb5   :  { %2100 = vrot.lane.b32.xlu0 %v4971_v5, %s4306_s25 }
0x1cb9   :  { %1924 = vrot.lane.b32.xlu0 %v4936_v48, %s4306_s25 }
0x1cbd   :  { %2096 = vrot.lane.b32.xlu0 %v4971_v5, %s4305_s3 }
0x1cc1   :  { %1748 = vrot.lane.b32.xlu0 %v4902_v59, %s4306_s25 }
0x1cc5   :  { %2272 = vrot.lane.b32.xlu0 %v2270_v37, %s4305_s3 }
0x1d17   :  { %v2289_v9 = vpop.permute.xlu0 %2288 }
0x1d18   :  { %3771 = vmatmul.mubr.msk.bf16.vlgmr.msra.gmra.mxu1 %vm431_vm2, %v2289_v9 }
0x1d19   :  { %2569 = vmatprep.mubr.bf16.mxu1 %v4304_v1  ;;  %2550 = vmatpush1.bf16.msra.mxu1 %v3915_v47  ;;  %v5084_v47 = vld [vmem:[#allocation14 + $0x20] ss:$8 sps:$4 sm:$0xff]  }
0x1d1a   :  { %2551 = vmatprep.subr.bf16.mxu1 %v3920_v30  ;;  %v5094_v30 = vld [vmem:[#allocation14 + $0x10] ss:$8 sps:$4 sm:$0xff]  }
0x1d1b   :  { %v1745_v40 = vpop.permute.xlu0 %1744 }
0x1d1c   :  { %1747 = vst.msk [vmem:[#allocation2] sm:$0xff] %vm505_vm3, %v1745_v40 }
0x1d1d   :  { %2552 = vmatpush1.bf16.msra.mxu1 %v3918_v41 }
0x1d1e   :  { %2787 = vmatprep.subr.bf16.mxu1 %v3932_v11 }
0x1d1f   :  { %v2277_v57 = vpop.permute.xlu0 %2276 }
0x1d20   :  { %2279 = vst.msk [vmem:[#allocation3 + $0x8] sm:$0xff] %vm505_vm3, %v2277_v57 }
0x1d23   :  { %v1921_v48 = vpop.permute.xlu0 %1920  ;;  %v2368_v29 = vld [vmem:[#allocation2] sm:$0xff] }
0x1d24   :  { %1923 = vst.msk [vmem:[#allocation2 + $0x10] sm:$0xff] %vm505_vm3, %v1921_v48 }
0x1d27   :  { %v2101_v56 = vpop.permute.xlu0 %2100 }
0x1d28   :  { %2103 = vst.msk [vmem:[#allocation3 + $0x18] sm:$0xff] %vm505_vm3, %v2101_v56 }
0x1d2b   :  { %v1925_v59 = vpop.permute.xlu0 %1924  ;;  %v2370_v20 = vld [vmem:[#allocation2 + $0x10] sm:$0xff] }
0x1d2c   :  { %1927 = vst.msk [vmem:[#allocation3 + $0x28] sm:$0xff] %vm505_vm3, %v1925_v59 }
0x1d2f   :  { %v2097_v44 = vpop.permute.xlu0 %2096  ;;  %v2383_v48 = vld [vmem:[#allocation3 + $0x18] sm:$0xff] }
0x1d30   :  { %2099 = vst.msk [vmem:[#allocation2 + $0x20] sm:$0xff] %vm505_vm3, %v2097_v44 }
0x1d33   :  { %v1749_v5 = vpop.permute.xlu0 %1748 }
0x1d34   :  { %1751 = vst.msk [vmem:[#allocation3 + $0x38] sm:$0xff] %vm505_vm3, %v1749_v5 }
0x1d37   :  { %v2273_v22 = vpop.permute.xlu0 %2272 }
0x1d38   :  { %2275 = vst.msk [vmem:[#allocation2 + $0x30] sm:$0xff] %vm505_vm3, %v2273_v22  ;;  %v2385_v22 = vld [vmem:[#allocation3 + $0x28] sm:$0xff] }
0x1dd8   :  { %v2327_v42 = vpop.f32.mrf.mxu1 }
0x1dd9   :  { %v2334_v50 = vadd.f32 %v2327_v42, %v4866_v55  ;;  %v2372_v42 = vld [vmem:[#allocation2 + $0x20] sm:$0xff] }
0x1dda   :  { %v2329_v8 = vpop.f32.mrf.mxu1 }
0x1ddb   :  { %v3772_v31 = vmul.f32 -1.442695, %v2334_v50  ;;  %v2335_v21 = vadd.f32 %v2329_v8, %v4868_v58 }
0x1ddc   :  { %v2331_v52 = vpop.f32.mrf.mxu1 }
0x1ddd   :  { %v3773_v13 = vmul.f32 -1.442695, %v2335_v21  ;;  %4101 = vpow2.f32 %v3772_v31  ;;  %v2387_v52 = vld [vmem:[#allocation3 + $0x38] sm:$0xff] }
0x1dde   :  { %v2332_v14 = vpop.f32.mrf.mxu1 }
0x1ddf   :  { %4103 = vpow2.f32 %v3773_v13  ;;  %v2374_v13 = vld [vmem:[#allocation2 + $0x30] sm:$0xff] }
0x1dea   :  { %v4102_v17 = vpop.eup %4101 }
0x1deb   :  { %v2342_v54 = vadd.f32 1.0, %v4102_v17 }
0x1dec   :  { %v4104_v18 = vpop.eup %4103 }
0x1ded   :  { %v2343_v34 = vadd.f32 1.0, %v4104_v18 }
0x1def   :  { %4105 = vrcp.f32 %v2343_v34  ;;  %v5075_v34 = vld [vmem:[#allocation14 + $0x30] ss:$8 sps:$4 sm:$0xff]  }
0x1df0   :  { %4107 = vrcp.f32 %v2342_v54  ;;  %v5077_v54 = vld [vmem:[#allocation14 + $0x24] ss:$8 sps:$4 sm:$0xff]  }
0x1dfc   :  { %v4106_v3 = vpop.eup %4105 }
0x1dfd   :  { %v2348_v55 = vmul.f32 2.0, %v4106_v3  ;;  %v4108_v12 = vpop.eup %4107 }
0x1dfe   :  { %v2350_v15 = vmul.f32 %v4108_v12, %v4998_v25 }
0x1dff   :  { %v3774_v58 = vadd.f32 -1.0, %v2348_v55  ;;  %v5104_v55 = vld [vmem:[#allocation14] ss:$8 sps:$4 sm:$0xff]  }
0x1e01   :  { %v2351_v49 = vmul.f32 %v4108_v12, %v3774_v58 }
0x1e03   :  { %2353 = vrot.lane.b32.xlu1 %v2351_v49, %s4305_s3 }
0x1e07   :  { %1832 = vrot.lane.b32.xlu1 %v4918_v6, %s4305_s3 }
0x1e75   :  { %v2354_v62 = vpop.permute.xlu1 %2353 }
0x1e76   :  { %v2356_v27 = vadd.f32 %v2354_v62, %v2350_v15 }
0x1e78   :  { %4109 = vtanh.f32 %v2356_v27  ;;  %v2610_v27 = vld [vmem:[%s5385_s11] sm:$0x3] }
0x1e79   :  { %v1833_v32 = vpop.permute.xlu1 %1832  ;;  %v5142_v39 = vrot.slane %v2610_v27, %v4525_v24 }
0x1e7a   :  { %1835 = vst.msk [vmem:[#allocation2 + $0x8] sm:$0xff] %vm505_vm3, %v1833_v32 }
0x1e81   :  { %v2369_v16 = vld [vmem:[#allocation2 + $0x8] sm:$0xff] }
0x1e82   :  { %v5033_v61 = vpack.c.bf16 %v2369_v16, %v2368_v29 }
0x1e84   :  { %3787 = vmatmul.mubr.msk.bf16.vlgmr.msra.gmra.mxu1 %vm505_vm3, %v5033_v61 }
0x1e85   :  { %v4110_v4 = vpop.eup %4109  ;;  %2579 = vmatprep.mubr.bf16.mxu1 %v4304_v1  ;;  %2788 = vmatpush1.bf16.msra.mxu1 %v3930_v2 }
0x1e86   :  { %v2358_v7 = vmul.f32 %v4110_v4, %v4106_v3  ;;  %2789 = vmatprep.subr.bf16.mxu1 %v3938_v51  ;;  %v5096_v3 = vld [vmem:[#allocation14 + $0x4] ss:$8 sps:$4 sm:$0xff]  }
0x1e88   :  { %2364 = vrot.lane.b32.xlu1 %v2358_v7, %s4306_s25 }
0x1e89   :  { %2790 = vmatpush1.bf16.msra.mxu1 %v3936_v23 }
0x1e8a   :  { %3014 = vmatprep.subr.bf16.mxu1 %v5050_v0 }
0x1e8c   :  { %2008 = vrot.lane.b32.xlu1 %v4954_v28, %s4305_s3 }
0x1e90   :  { %2188 = vrot.lane.b32.xlu1 %v4988_v10, %s4306_s25 }
0x1e94   :  { %2012 = vrot.lane.b32.xlu1 %v4954_v28, %s4306_s25 }
0x1e98   :  { %2184 = vrot.lane.b32.xlu1 %v4988_v10, %s4305_s3  ;;  %v2381_v10 = vld [vmem:[#allocation3 + $0x8] sm:$0xff] }
0x1e9c   :  { %1836 = vrot.lane.b32.xlu1 %v4918_v6, %s4306_s25  ;;  %v3935_v6 = vld [vmem:[#allocation12 + $0x24] ss:$8 sps:$4 sm:$0xff]  }
0x1ea0   :  { %2360 = vrot.lane.b32.xlu1 %v2358_v7, %s4305_s3 }
0x1efa   :  { %v2365_v38 = vpop.permute.xlu1 %2364 }
0x1efb   :  { %2367 = vst.msk [vmem:[#allocation3] sm:$0xff] %vm505_vm3, %v2365_v38 }
0x1efe   :  { %v2009_v28 = vpop.permute.xlu1 %2008 }
0x1eff   :  { %2011 = vst.msk [vmem:[#allocation2 + $0x18] sm:$0xff] %vm505_vm3, %v2009_v28 }
0x1f02   :  { %v2189_v45 = vpop.permute.xlu1 %2188  ;;  %v2380_v35 = vld [vmem:[#allocation3] sm:$0xff] }
0x1f03   :  { %2191 = vst.msk [vmem:[#allocation3 + $0x10] sm:$0xff] %vm505_vm3, %v2189_v45  ;;  %v2388_v46 = vpack.c.bf16 %v2381_v10, %v2380_v35 }
0x1f05   :  { %3779 = vmatmul.mubr.msk.bf16.vlgmr.msra.gmra.mxu0 %vm505_vm3, %v2388_v46 }
0x1f06   :  { %2695 = vmatpush1.bf16.msra.mxu0 %v3927_v36  ;;  %v2013_v25 = vpop.permute.xlu1 %2012  ;;  %v2371_v37 = vld [vmem:[#allocation2 + $0x18] sm:$0xff]  ;;  %2474 = vmatprep.mubr.bf16.mxu0 %v4304_v1 }
0x1f07   :  { %2015 = vst.msk [vmem:[#allocation3 + $0x20] sm:$0xff] %vm505_vm3, %v2013_v25  ;;  %v2377_v9 = vpack.c.bf16 %v2371_v37, %v2370_v20  ;;  %2696 = vmatprep.subr.bf16.mxu0 %v3935_v6 }
0x1f09   :  { %3788 = vmatmul.mubr.msk.bf16.gmra.mxu1 %vm505_vm3, %v2377_v9 }
0x1f0a   :  { %v2185_v40 = vpop.permute.xlu1 %2184  ;;  %v2382_v57 = vld [vmem:[#allocation3 + $0x10] sm:$0xff]  ;;  %2589 = vmatprep.mubr.bf16.mxu1 %v4304_v1  ;;  %2697 = vmatpush1.bf16.msra.mxu0 %v3933_v26 }
0x1f0b   :  { %2187 = vst.msk [vmem:[#allocation2 + $0x28] sm:$0xff] %vm505_vm3, %v2185_v40  ;;  %v2389_v56 = vpack.c.bf16 %v2383_v48, %v2382_v57  ;;  %2926 = vmatprep.subr.bf16.mxu0 %v5050_v0 }
0x1f0d   :  { %3780 = vmatmul.mubr.msk.bf16.gmra.mxu0 %vm505_vm3, %v2389_v56 }
0x1f0e   :  { %v1837_v59 = vpop.permute.xlu1 %1836  ;;  %2484 = vmatprep.mubr.bf16.mxu0 %v4304_v1  ;;  %v2384_v44 = vld [vmem:[#allocation3 + $0x20] sm:$0xff] }
0x1f0f   :  { %1839 = vst.msk [vmem:[#allocation3 + $0x30] sm:$0xff] %vm505_vm3, %v1837_v59  ;;  %v2390_v8 = vpack.c.bf16 %v2385_v22, %v2384_v44 }
0x1f12   :  { %v2361_v5 = vpop.permute.xlu1 %2360  ;;  %v2373_v50 = vld [vmem:[#allocation2 + $0x28] sm:$0xff] }
0x1f13   :  { %2363 = vst.msk [vmem:[#allocation2 + $0x38] sm:$0xff] %vm505_vm3, %v2361_v5  ;;  %v2378_v31 = vpack.c.bf16 %v2373_v50, %v2372_v42 }
0x1f15   :  { %3781 = vmatmul.mubr.msk.bf16.gmra.mxu0 %vm505_vm3, %v2390_v8  ;;  %3789 = vmatmul.mubr.msk.bf16.gmra.mxu1 %vm505_vm3, %v2378_v31 }
0x1f16   :  { %2494 = vmatprep.mubr.bf16.mxu0 %v4304_v1  ;;  %2599 = vmatprep.mubr.bf16.mxu1 %v4304_v1  ;;  %v2386_v21 = vld [vmem:[#allocation3 + $0x30] sm:$0xff] }
0x1f17   :  { %v2391_v17 = vpack.c.bf16 %v2387_v52, %v2386_v21 }
0x1f1a   :  { %v2375_v14 = vld [vmem:[#allocation2 + $0x38] sm:$0xff] }
0x1f1b   :  { %v2379_v18 = vpack.c.bf16 %v2375_v14, %v2374_v13 }
0x1f1d   :  { %3782 = vmatmul.mubr.msk.bf16.gmra.mxu0 %vm505_vm3, %v2391_v17  ;;  %3790 = vmatmul.mubr.msk.bf16.gmra.mxu1 %vm505_vm3, %v2379_v18 }
0x1f1e   :  { %2714 = vmatprep.mubr.bf16.mxu0 %v4304_v1  ;;  %2807 = vmatprep.mubr.bf16.mxu1 %v4304_v1 }
0x1f25   :  { %3795 = vmatmul.mubr.msk.bf16.vlgmr.msra.gmra.mxu0 %vm505_vm3, %v2388_v46  ;;  %3803 = vmatmul.mubr.msk.bf16.vlgmr.msra.gmra.mxu1 %vm505_vm3, %v5033_v61  ;;  %v5145_v61 = vrot.slane %v2610_v27, %v4531_v33 }
0x1f26   :  { %2927 = vmatpush1.bf16.msra.mxu0 %v5075_v34  ;;  %2724 = vmatprep.mubr.bf16.mxu0 %v4304_v1 }
0x1f27   :  { %2817 = vmatprep.mubr.bf16.mxu1 %v4304_v1  ;;  %2928 = vmatprep.subr.bf16.mxu0 %v5077_v54 }
0x1f28   :  { %3015 = vmatpush1.bf16.msra.mxu1 %v5075_v34 }
0x1f29   :  { %3016 = vmatprep.subr.bf16.mxu1 %v5077_v54 }
0x1f2a   :  { %2929 = vmatpush1.bf16.msra.mxu0 %v5084_v47 }
0x1f2b   :  { %2930 = vmatprep.subr.bf16.mxu0 %v5088_v19 }
0x1f2c   :  { %3017 = vmatpush1.bf16.msra.mxu1 %v5084_v47 }
0x1f2d   :  { %3796 = vmatmul.mubr.msk.bf16.gmra.mxu0 %vm505_vm3, %v2389_v56  ;;  %3804 = vmatmul.mubr.msk.bf16.gmra.mxu1 %vm505_vm3, %v2377_v9 }
0x1f2e   :  { %2734 = vmatprep.mubr.bf16.mxu0 %v4304_v1  ;;  %2827 = vmatprep.mubr.bf16.mxu1 %v4304_v1 }
0x1f2f   :  { %2931 = vmatpush1.bf16.msra.mxu0 %v5094_v30  ;;  %3018 = vmatprep.subr.bf16.mxu1 %v5088_v19 }
0x1f30   :  { %2932 = vmatprep.subr.bf16.mxu0 %v5096_v3  ;;  %3019 = vmatpush1.bf16.msra.mxu1 %v5094_v30 }
0x1f31   :  { %3020 = vmatprep.subr.bf16.mxu1 %v5096_v3 }
0x1f33   :  { %2933 = vmatpush1.bf16.msra.mxu0 %v5104_v55 }
0x1f34   :  { %3021 = vmatpush1.bf16.msra.mxu1 %v5104_v55  ;;  %3102 = vmatprep.subr.bf16.mxu0 %v5050_v0 }
0x1f35   :  { %3797 = vmatmul.mubr.msk.bf16.gmra.mxu0 %vm505_vm3, %v2390_v8  ;;  %3805 = vmatmul.mubr.msk.bf16.gmra.mxu1 %vm505_vm3, %v2378_v31 }
0x1f36   :  { %2744 = vmatprep.mubr.bf16.mxu0 %v4304_v1  ;;  %2837 = vmatprep.mubr.bf16.mxu1 %v4304_v1 }
0x1f37   :  { %3190 = vmatprep.subr.bf16.mxu1 %v5050_v0 }
0x1f3d   :  { %3798 = vmatmul.mubr.msk.bf16.gmra.mxu0 %vm505_vm3, %v2391_v17  ;;  %3806 = vmatmul.mubr.msk.bf16.gmra.mxu1 %vm505_vm3, %v2379_v18 }
0x1f3e   :  { %2950 = vmatprep.mubr.bf16.mxu0 %v4304_v1  ;;  %3038 = vmatprep.mubr.bf16.mxu1 %v4304_v1 }
0x1f44   :  { %v2571_v41 = vpop.f32.mrf.mxu1 }
0x1f45   :  { %2951 = vmatmul.mubr.bf16.vlgmr.msra.gmra.mxu0 %v4304_v1 }
0x1f46   :  { %3103 = vmatpush1.bf16.msra.mxu0 %v5075_v34  ;;  %3126 = vmatprep.mubr.bf16.mxu0 %v4304_v1  ;;  %v5132_v58 = vpop.f32.mrf.mxu1 }
0x1f47   :  { %3104 = vmatprep.subr.bf16.mxu0 %v5077_v54 }
0x1f48   :  { %v2575_v12 = vpop.f32.mrf.mxu1 }
0x1f4a   :  { %3105 = vmatpush1.bf16.msra.mxu0 %v5084_v47  ;;  %v2577_v62 = vpop.f32.mrf.mxu1 }
0x1f4b   :  { %3106 = vmatprep.subr.bf16.mxu0 %v5088_v19 }
0x1f4e   :  { %3107 = vmatpush1.bf16.msra.mxu0 %v5094_v30 }
0x1f4f   :  { %3108 = vmatprep.subr.bf16.mxu0 %v5096_v3 }
0x1f52   :  { %3109 = vmatpush1.bf16.msra.mxu0 %v5104_v55 }
0x1f53   :  { %3278 = vmatprep.subr.bf16.mxu0 %v5050_v0 }
0x1fc5   :  { %v2466_v49 = vpop.f32.mrf.mxu0 }
0x1fc6   :  { %v5134_v15 = vadd.f32 %v2571_v41, %v2466_v49 }
0x1fc7   :  { %v5139_v32 = vpop.f32.mrf.mxu0 }
0x1fc9   :  { %v2470_v53 = vpop.f32.mrf.mxu0  ;;  %v2581_v43 = vpop.f32.mrf.mxu1 }
0x1fca   :  { %v2576_v60 = vadd.f32 %v2575_v12, %v2470_v53 }
0x1fcb   :  { %v2472_v29 = vpop.f32.mrf.mxu0  ;;  %v2583_v16 = vpop.f32.mrf.mxu1 }
0x1fcc   :  { %v5148_v4 = vadd.f32 %v5142_v39, %v2576_v60  ;;  %v2578_v63 = vadd.f32 %v2577_v62, %v2472_v29 }
0x1fcd   :  { %v2476_v2 = vpop.f32.mrf.mxu0  ;;  %v2585_v23 = vpop.f32.mrf.mxu1 }
0x1fce   :  { %v5151_v7 = vadd.f32 %v5145_v61, %v2578_v63  ;;  %v2582_v11 = vadd.f32 %v2581_v43, %v2476_v2 }
0x1fcf   :  { %v2478_v51 = vpop.f32.mrf.mxu0  ;;  %v2587_v35 = vpop.f32.mrf.mxu1 }
0x1fd0   :  { %v5154_v24 = vadd.f32 %v5142_v39, %v2582_v11  ;;  %v2584_v38 = vadd.f32 %v2583_v16, %v2478_v51 }
0x1fd1   :  { %v2480_v28 = vpop.f32.mrf.mxu0 }
0x1fd2   :  { %v5157_v45 = vadd.f32 %v5145_v61, %v2584_v38  ;;  %v2586_v33 = vadd.f32 %v2585_v23, %v2480_v28 }
0x1fd3   :  { %v2482_v10 = vpop.f32.mrf.mxu0 }
0x1fd4   :  { %v5160_v36 = vadd.f32 %v5142_v39, %v2586_v33  ;;  %v2588_v46 = vadd.f32 %v2587_v35, %v2482_v10 }
0x1fd5   :  { %v2486_v6 = vpop.f32.mrf.mxu0  ;;  %v2591_v25 = vpop.f32.mrf.mxu1 }
0x1fd6   :  { %v5163_v20 = vadd.f32 %v5145_v61, %v2588_v46  ;;  %v2592_v37 = vadd.f32 %v2591_v25, %v2486_v6 }
0x1fd7   :  { %v2488_v26 = vpop.f32.mrf.mxu0  ;;  %v2593_v9 = vpop.f32.mrf.mxu1 }
0x1fd8   :  { %v2630_v40 = vadd.f32 %v5142_v39, %v2592_v37  ;;  %v2594_v57 = vadd.f32 %v2593_v9, %v2488_v26 }
0x1fd9   :  { %v2490_v48 = vpop.f32.mrf.mxu0  ;;  %v2595_v56 = vpop.f32.mrf.mxu1 }
0x1fda   :  { %v2631_v59 = vadd.f32 %v5145_v61, %v2594_v57  ;;  %v2596_v44 = vadd.f32 %v2595_v56, %v2490_v48 }
0x1fdb   :  { %v2492_v5 = vpop.f32.mrf.mxu0  ;;  %v2597_v22 = vpop.f32.mrf.mxu1 }
0x1fdc   :  { %v2632_v42 = vadd.f32 %v5142_v39, %v2596_v44  ;;  %v2598_v50 = vadd.f32 %v2597_v22, %v2492_v5 }
0x1fdd   :  { %v2496_v8 = vpop.f32.mrf.mxu0  ;;  %v2601_v31 = vpop.f32.mrf.mxu1 }
0x1fde   :  { %v2633_v21 = vadd.f32 %v5145_v61, %v2598_v50  ;;  %v2602_v52 = vadd.f32 %v2601_v31, %v2496_v8 }
0x1fdf   :  { %v2498_v13 = vpop.f32.mrf.mxu0  ;;  %v2603_v14 = vpop.f32.mrf.mxu1 }
0x1fe0   :  { %v2634_v17 = vadd.f32 %v5142_v39, %v2602_v52  ;;  %v2604_v18 = vadd.f32 %v2603_v14, %v2498_v13 }
0x1fe1   :  { %v2500_v41 = vpop.f32.mrf.mxu0  ;;  %v2605_v12 = vpop.f32.mrf.mxu1 }
0x1fe2   :  { %v2635_v49 = vadd.f32 %v5145_v61, %v2604_v18  ;;  %v2606_v62 = vadd.f32 %v2605_v12, %v2500_v41 }
0x1fe3   :  { %v2502_v27 = vpop.f32.mrf.mxu0  ;;  %v2607_v53 = vpop.f32.mrf.mxu1 }
0x1fe4   :  { %v2636_v43 = vadd.f32 %v5142_v39, %v2606_v62  ;;  %v2608_v60 = vadd.f32 %v2607_v53, %v2502_v27 }
0x1fe5   :  { %v2716_v29 = vpop.f32.mrf.mxu0  ;;  %v2809_v16 = vpop.f32.mrf.mxu1 }
0x1fe6   :  { %v2637_v63 = vadd.f32 %v5145_v61, %v2608_v60  ;;  %v2810_v2 = vadd.f32 %v2809_v16, %v2716_v29 }
0x1fe7   :  { %v2718_v11 = vpop.f32.mrf.mxu0  ;;  %v2811_v23 = vpop.f32.mrf.mxu1 }
0x1fe8   :  { %v2812_v51 = vadd.f32 %v2811_v23, %v2718_v11  ;;  %v5173_v38 = vadd.f32 %v2810_v2, %v2636_v43 }
0x1fe9   :  { %v2720_v28 = vpop.f32.mrf.mxu0  ;;  %v2813_v33 = vpop.f32.mrf.mxu1 }
0x1fea   :  { %v2814_v35 = vadd.f32 %v2813_v33, %v2720_v28  ;;  %v5175_v10 = vadd.f32 %v2812_v51, %v2637_v63 }
0x1feb   :  { %v2722_v46 = vpop.f32.mrf.mxu0  ;;  %v2815_v6 = vpop.f32.mrf.mxu1 }
0x1fec   :  { %v2816_v25 = vadd.f32 %v2815_v6, %v2722_v46  ;;  %v5177_v37 = vadd.f32 %v2814_v35, %v2634_v17  ;;  %v2574_v35 = vadd.f32 %v5132_v58, %v5139_v32 }
0x1fed   :  { %v2726_v26 = vpop.f32.mrf.mxu0  ;;  %v2819_v9 = vpop.f32.mrf.mxu1 }
0x1fee   :  { %v2820_v57 = vadd.f32 %v2819_v9, %v2726_v26  ;;  %v5179_v48 = vadd.f32 %v2816_v25, %v2635_v49 }
0x1fef   :  { %v2728_v56 = vpop.f32.mrf.mxu0  ;;  %v2821_v44 = vpop.f32.mrf.mxu1 }
0x1ff0   :  { %v2822_v5 = vadd.f32 %v2821_v44, %v2728_v56  ;;  %v5181_v22 = vadd.f32 %v2820_v57, %v2632_v42 }
0x1ff1   :  { %v2730_v50 = vpop.f32.mrf.mxu0  ;;  %v2823_v8 = vpop.f32.mrf.mxu1 }
0x1ff2   :  { %v2824_v31 = vadd.f32 %v2823_v8, %v2730_v50  ;;  %v5183_v52 = vadd.f32 %v2822_v5, %v2633_v21 }
0x1ff3   :  { %v2732_v13 = vpop.f32.mrf.mxu0  ;;  %v2825_v14 = vpop.f32.mrf.mxu1 }
0x1ff4   :  { %v2826_v18 = vadd.f32 %v2825_v14, %v2732_v13  ;;  %v5185_v17 = vadd.f32 %v2824_v31, %v2630_v40 }
0x1ff5   :  { %v2736_v41 = vpop.f32.mrf.mxu0  ;;  %v2829_v12 = vpop.f32.mrf.mxu1 }
0x1ff6   :  { %v2830_v62 = vadd.f32 %v2829_v12, %v2736_v41  ;;  %v5187_v49 = vadd.f32 %v2826_v18, %v2631_v59 }
0x1ff7   :  { %v2738_v27 = vpop.f32.mrf.mxu0  ;;  %v2831_v53 = vpop.f32.mrf.mxu1 }
0x1ff8   :  { %v2832_v43 = vadd.f32 %v2831_v53, %v2738_v27  ;;  %v5190_v42 = vadd.f32 %v2830_v62, %v5160_v36 }
0x1ff9   :  { %v2740_v60 = vpop.f32.mrf.mxu0  ;;  %v2833_v29 = vpop.f32.mrf.mxu1 }
0x1ffa   :  { %v2834_v21 = vadd.f32 %v2833_v29, %v2740_v60  ;;  %v5193_v16 = vadd.f32 %v2832_v43, %v5163_v20 }
0x1ffb   :  { %v2742_v63 = vpop.f32.mrf.mxu0  ;;  %v2835_v40 = vpop.f32.mrf.mxu1 }
0x1ffc   :  { %v2836_v2 = vadd.f32 %v2835_v40, %v2742_v63  ;;  %v5196_v11 = vadd.f32 %v2834_v21, %v5154_v24  ;;  %v2622_v24 = vadd.f32 %v5142_v39, %v5134_v15 }
0x1ffd   :  { %v2746_v59 = vpop.f32.mrf.mxu0  ;;  %v2839_v23 = vpop.f32.mrf.mxu1 }
0x1ffe   :  { %v2840_v51 = vadd.f32 %v2839_v23, %v2746_v59  ;;  %v5199_v28 = vadd.f32 %v2836_v2, %v5157_v45  ;;  %v2623_v45 = vadd.f32 %v5145_v61, %v2574_v35 }
0x1fff   :  { %v2748_v36 = vpop.f32.mrf.mxu0  ;;  %v2841_v33 = vpop.f32.mrf.mxu1 }
0x2000   :  { %v2842_v46 = vadd.f32 %v2841_v33, %v2748_v36  ;;  %v2997_v20 = vadd.f32 %v2840_v51, %v5148_v4 }
0x2001   :  { %v2750_v6 = vpop.f32.mrf.mxu0  ;;  %v2843_v25 = vpop.f32.mrf.mxu1 }
0x2002   :  { %v2844_v26 = vadd.f32 %v2843_v25, %v2750_v6  ;;  %v2998_v9 = vadd.f32 %v2842_v46, %v5151_v7 }
0x2003   :  { %v2752_v57 = vpop.f32.mrf.mxu0  ;;  %v2845_v56 = vpop.f32.mrf.mxu1 }
0x2004   :  { %v2846_v44 = vadd.f32 %v2845_v56, %v2752_v57  ;;  %v2876_v5 = vadd.f32 %v2844_v26, %v2622_v24 }
0x2005   :  { %v2952_v50 = vpop.f32.mrf.mxu0 }
0x2006   :  { %v2959_v8 = vadd.f32 %v2952_v50, %v2876_v5  ;;  %v2877_v58 = vadd.f32 %v2846_v44, %v2623_v45 }
0x2007   :  { %v2954_v32 = vpop.f32.mrf.mxu0 }
0x2008   :  { %v3815_v31 = vmul.f32 -1.442695, %v2959_v8  ;;  %v2960_v4 = vadd.f32 %v2954_v32, %v2877_v58 }
0x2009   :  { %v2956_v13 = vpop.f32.mrf.mxu0 }
0x200a   :  { %v3816_v14 = vmul.f32 -1.442695, %v2960_v4  ;;  %4111 = vpow2.f32 %v3815_v31 }
0x200b   :  { %v2957_v18 = vpop.f32.mrf.mxu0 }
0x200c   :  { %4113 = vpow2.f32 %v3816_v14 }
0x2017   :  { %v4112_v15 = vpop.eup %4111 }
0x2018   :  { %v2967_v41 = vadd.f32 1.0, %v4112_v15 }
0x2019   :  { %v4114_v39 = vpop.eup %4113 }
0x201a   :  { %v2968_v7 = vadd.f32 1.0, %v4114_v39 }
0x201c   :  { %4115 = vrcp.f32 %v2968_v7 }
0x201d   :  { %4117 = vrcp.f32 %v2967_v41 }
0x2029   :  { %v4116_v61 = vpop.eup %4115 }
0x202a   :  { %v2973_v12 = vmul.f32 2.0, %v4116_v61  ;;  %v4118_v27 = vpop.eup %4117 }
0x202b   :  { %v2975_v43 = vmul.f32 0.0, %v4118_v27 }
0x202c   :  { %v3817_v62 = vadd.f32 -1.0, %v2973_v12 }
0x202e   :  { %v2976_v53 = vmul.f32 %v4118_v27, %v3817_v62 }
0x2030   :  { %2978 = vrot.lane.b32.xlu0 %v2976_v53, %s4305_s3 }
0x20a2   :  { %v2979_v60 = vpop.permute.xlu0 %2978 }
0x20a3   :  { %v2981_v29 = vadd.f32 %v2979_v60, %v2975_v43 }
0x20a5   :  { %4119 = vtanh.f32 %v2981_v29 }
0x20b2   :  { %v4120_v21 = vpop.eup %4119 }
0x20b3   :  { %v5209_v63 = vmul.f32 %v4120_v21, %v4116_v61 }
0x20b5   :  { %v2999_v40 = vpack.c.bf16 %v5209_v63, %v5209_v63 }
0x20b7   :  { %3001 = vrot.lane.b32.xlu1 %v2999_v40, %s4305_s3 }
0x2129   :  { %v3002_v2 = vpop.permute.xlu1 %3001 }
0x212a   :  { %3818 = vmatmul.mubr.msk.bf16.vlgmr.msra.gmra.mxu1 %vm431_vm2, %v3002_v2 }
0x212b   :  { %3191 = vmatpush1.bf16.msra.mxu1 %v5075_v34  ;;  %3214 = vmatprep.mubr.bf16.mxu1 %v4304_v1 }
0x212c   :  { %3192 = vmatprep.subr.bf16.mxu1 %v5077_v54 }
0x212f   :  { %3193 = vmatpush1.bf16.msra.mxu1 %v5084_v47 }
0x2130   :  { %3194 = vmatprep.subr.bf16.mxu1 %v5088_v19 }
0x2133   :  { %3195 = vmatpush1.bf16.msra.mxu1 %v5094_v30 }
0x2134   :  { %3196 = vmatprep.subr.bf16.mxu1 %v5096_v3 }
0x2137   :  { %3197 = vmatpush1.bf16.msra.mxu1 %v5104_v55 }
0x2138   :  { %3366 = vmatprep.subr.bf16.mxu1 %v5050_v0 }
0x21ea   :  { %v3040_v59 = vpop.f32.mrf.mxu1 }
0x21eb   :  { %v3047_v23 = vadd.f32 %v3040_v59, %v2997_v20 }
0x21ec   :  { %v3042_v51 = vpop.f32.mrf.mxu1 }
0x21ed   :  { %v3819_v36 = vmul.f32 -1.442695, %v3047_v23  ;;  %v3048_v33 = vadd.f32 %v3042_v51, %v2998_v9 }
0x21ee   :  { %v3044_v35 = vpop.f32.mrf.mxu1 }
0x21ef   :  { %v3820_v46 = vmul.f32 -1.442695, %v3048_v33  ;;  %4121 = vpow2.f32 %v3819_v36 }
0x21f0   :  { %v3045_v6 = vpop.f32.mrf.mxu1 }
0x21f1   :  { %4123 = vpow2.f32 %v3820_v46 }
0x21fc   :  { %v4122_v25 = vpop.eup %4121 }
0x21fd   :  { %v3055_v57 = vadd.f32 1.0, %v4122_v25 }
0x21fe   :  { %v4124_v24 = vpop.eup %4123 }
0x21ff   :  { %v3056_v26 = vadd.f32 1.0, %v4124_v24 }
0x2201   :  { %4125 = vrcp.f32 %v3056_v26 }
0x2202   :  { %4127 = vrcp.f32 %v3055_v57 }
0x220e   :  { %v4126_v56 = vpop.eup %4125 }
0x220f   :  { %v3061_v45 = vmul.f32 2.0, %v4126_v56  ;;  %v4128_v5 = vpop.eup %4127 }
0x2210   :  { %v3063_v20 = vmul.f32 %v4128_v5, %v2981_v29 }
0x2211   :  { %v3821_v44 = vadd.f32 -1.0, %v3061_v45 }
0x2213   :  { %v3064_v50 = vmul.f32 %v4128_v5, %v3821_v44 }
0x2215   :  { %3066 = vrot.lane.b32.xlu0 %v3064_v50, %s4305_s3 }
0x2287   :  { %v3067_v9 = vpop.permute.xlu0 %3066 }
0x2288   :  { %v3069_v8 = vadd.f32 %v3067_v9, %v3063_v20 }
0x228a   :  { %4129 = vtanh.f32 %v3069_v8 }
0x2297   :  { %v4130_v58 = vpop.eup %4129 }
0x2298   :  { %v5225_v32 = vmul.f32 %v4130_v58, %v4126_v56 }
0x229a   :  { %v3087_v31 = vpack.c.bf16 %v5225_v32, %v5225_v32 }
0x229c   :  { %3089 = vrot.lane.b32.xlu1 %v3087_v31, %s4305_s3 }
0x230e   :  { %v3090_v4 = vpop.permute.xlu1 %3089 }
0x230f   :  { %3822 = vmatmul.mubr.msk.bf16.vlgmr.msra.gmra.mxu0 %vm431_vm2, %v3090_v4 }
0x2310   :  { %3279 = vmatpush1.bf16.msra.mxu0 %v5075_v34  ;;  %3302 = vmatprep.mubr.bf16.mxu0 %v4304_v1 }
0x2311   :  { %3280 = vmatprep.subr.bf16.mxu0 %v5077_v54 }
0x2314   :  { %3281 = vmatpush1.bf16.msra.mxu0 %v5084_v47 }
0x2315   :  { %3282 = vmatprep.subr.bf16.mxu0 %v5088_v19 }
0x2318   :  { %3283 = vmatpush1.bf16.msra.mxu0 %v5094_v30 }
0x2319   :  { %3284 = vmatprep.subr.bf16.mxu0 %v5096_v3 }
0x231c   :  { %3285 = vmatpush1.bf16.msra.mxu0 %v5104_v55 }
0x231d   :  { %3454 = vmatprep.subr.bf16.mxu0 %v5050_v0 }
0x23cf   :  { %v3128_v13 = vpop.f32.mrf.mxu0 }
0x23d0   :  { %v3135_v14 = vadd.f32 %v3128_v13, %v5196_v11 }
0x23d1   :  { %v3130_v18 = vpop.f32.mrf.mxu0 }
0x23d2   :  { %v3823_v15 = vmul.f32 -1.442695, %v3135_v14  ;;  %v3136_v39 = vadd.f32 %v3130_v18, %v5199_v28 }
0x23d3   :  { %v3132_v7 = vpop.f32.mrf.mxu0 }
0x23d4   :  { %v3824_v41 = vmul.f32 -1.442695, %v3136_v39  ;;  %4131 = vpow2.f32 %v3823_v15 }
0x23d5   :  { %v3133_v61 = vpop.f32.mrf.mxu0 }
0x23d6   :  { %4133 = vpow2.f32 %v3824_v41 }
0x23e1   :  { %v4132_v12 = vpop.eup %4131 }
0x23e2   :  { %v3143_v53 = vadd.f32 1.0, %v4132_v12 }
0x23e3   :  { %v4134_v62 = vpop.eup %4133 }
0x23e4   :  { %v3144_v27 = vadd.f32 1.0, %v4134_v62 }
0x23e6   :  { %4135 = vrcp.f32 %v3144_v27 }
0x23e7   :  { %4137 = vrcp.f32 %v3143_v53 }
0x23f3   :  { %v4136_v43 = vpop.eup %4135 }
0x23f4   :  { %v3149_v60 = vmul.f32 2.0, %v4136_v43  ;;  %v4138_v21 = vpop.eup %4137 }
0x23f5   :  { %v3151_v40 = vmul.f32 %v4138_v21, %v3069_v8 }
0x23f6   :  { %v3825_v29 = vadd.f32 -1.0, %v3149_v60 }
0x23f8   :  { %v3152_v11 = vmul.f32 %v4138_v21, %v3825_v29 }
0x23fa   :  { %3154 = vrot.lane.b32.xlu0 %v3152_v11, %s4305_s3 }
0x246c   :  { %v3155_v28 = vpop.permute.xlu0 %3154 }
0x246d   :  { %v3157_v2 = vadd.f32 %v3155_v28, %v3151_v40 }
0x246f   :  { %4139 = vtanh.f32 %v3157_v2 }
0x247c   :  { %v4140_v59 = vpop.eup %4139 }
0x247d   :  { %v5243_v23 = vmul.f32 %v4140_v59, %v4136_v43 }
0x247f   :  { %v3175_v51 = vpack.c.bf16 %v5243_v23, %v5243_v23 }
0x2481   :  { %3177 = vrot.lane.b32.xlu1 %v3175_v51, %s4305_s3 }
0x24f3   :  { %v3178_v36 = vpop.permute.xlu1 %3177 }
0x24f4   :  { %3826 = vmatmul.mubr.msk.bf16.vlgmr.msra.gmra.mxu1 %vm431_vm2, %v3178_v36 }
0x24f5   :  { %3367 = vmatpush1.bf16.msra.mxu1 %v5075_v34  ;;  %3390 = vmatprep.mubr.bf16.mxu1 %v4304_v1 }
0x24f6   :  { %3368 = vmatprep.subr.bf16.mxu1 %v5077_v54 }
0x24f9   :  { %3369 = vmatpush1.bf16.msra.mxu1 %v5084_v47 }
0x24fa   :  { %3370 = vmatprep.subr.bf16.mxu1 %v5088_v19 }
0x24fd   :  { %3371 = vmatpush1.bf16.msra.mxu1 %v5094_v30 }
0x24fe   :  { %3372 = vmatprep.subr.bf16.mxu1 %v5096_v3 }
0x2501   :  { %3373 = vmatpush1.bf16.msra.mxu1 %v5104_v55 }
0x2502   :  { %3542 = vmatprep.subr.bf16.mxu1 %v5050_v0 }
0x25b4   :  { %v3216_v33 = vpop.f32.mrf.mxu1 }
0x25b5   :  { %v3223_v35 = vadd.f32 %v3216_v33, %v5190_v42 }
0x25b6   :  { %v3218_v46 = vpop.f32.mrf.mxu1 }
0x25b7   :  { %v3827_v6 = vmul.f32 -1.442695, %v3223_v35  ;;  %v3224_v25 = vadd.f32 %v3218_v46, %v5193_v16 }
0x25b8   :  { %v3220_v24 = vpop.f32.mrf.mxu1 }
0x25b9   :  { %v3828_v26 = vmul.f32 -1.442695, %v3224_v25  ;;  %4141 = vpow2.f32 %v3827_v6 }
0x25ba   :  { %v3221_v57 = vpop.f32.mrf.mxu1 }
0x25bb   :  { %4143 = vpow2.f32 %v3828_v26 }
0x25c6   :  { %v4142_v56 = vpop.eup %4141 }
0x25c7   :  { %v3231_v5 = vadd.f32 1.0, %v4142_v56 }
0x25c8   :  { %v4144_v45 = vpop.eup %4143 }
0x25c9   :  { %v3232_v44 = vadd.f32 1.0, %v4144_v45 }
0x25cb   :  { %4145 = vrcp.f32 %v3232_v44 }
0x25cc   :  { %4147 = vrcp.f32 %v3231_v5 }
0x25d8   :  { %v4146_v50 = vpop.eup %4145 }
0x25d9   :  { %v3237_v0 = vmul.f32 2.0, %v4146_v50  ;;  %v4148_v9 = vpop.eup %4147 }
0x25da   :  { %v3239_v8 = vmul.f32 %v4148_v9, %v3157_v2 }
0x25db   :  { %v3829_v20 = vadd.f32 -1.0, %v3237_v0 }
0x25dd   :  { %v3240_v42 = vmul.f32 %v4148_v9, %v3829_v20 }
0x25df   :  { %3242 = vrot.lane.b32.xlu0 %v3240_v42, %s4305_s3 }
0x2651   :  { %v3243_v16 = vpop.permute.xlu0 %3242 }
0x2652   :  { %v3245_v58 = vadd.f32 %v3243_v16, %v3239_v8 }
0x2654   :  { %4149 = vtanh.f32 %v3245_v58 }
0x2661   :  { %v4150_v31 = vpop.eup %4149 }
0x2662   :  { %v5261_v4 = vmul.f32 %v4150_v31, %v4146_v50 }
0x2664   :  { %v3263_v13 = vpack.c.bf16 %v5261_v4, %v5261_v4 }
0x2666   :  { %3265 = vrot.lane.b32.xlu1 %v3263_v13, %s4305_s3 }
0x26d8   :  { %v3266_v14 = vpop.permute.xlu1 %3265 }
0x26d9   :  { %3830 = vmatmul.mubr.msk.bf16.vlgmr.msra.gmra.mxu0 %vm431_vm2, %v3266_v14 }
0x26da   :  { %3455 = vmatpush1.bf16.msra.mxu0 %v5075_v34  ;;  %3478 = vmatprep.mubr.bf16.mxu0 %v4304_v1 }
0x26db   :  { %3456 = vmatprep.subr.bf16.mxu0 %v5077_v54 }
0x26de   :  { %3457 = vmatpush1.bf16.msra.mxu0 %v5084_v47 }
0x26df   :  { %3458 = vmatprep.subr.bf16.mxu0 %v5088_v19 }
0x26e2   :  { %3459 = vmatpush1.bf16.msra.mxu0 %v5094_v30 }
0x26e3   :  { %3460 = vmatprep.subr.bf16.mxu0 %v5096_v3 }
0x26e6   :  { %3461 = vmatpush1.bf16.msra.mxu0 %v5104_v55 }
0x2799   :  { %v3304_v18 = vpop.f32.mrf.mxu0 }
0x279a   :  { %v3311_v15 = vadd.f32 %v3304_v18, %v5185_v17 }
0x279b   :  { %v3306_v39 = vpop.f32.mrf.mxu0 }
0x279c   :  { %v3831_v7 = vmul.f32 -1.442695, %v3311_v15  ;;  %v3312_v41 = vadd.f32 %v3306_v39, %v5187_v49 }
0x279d   :  { %v3308_v61 = vpop.f32.mrf.mxu0 }
0x279e   :  { %v3832_v12 = vmul.f32 -1.442695, %v3312_v41  ;;  %4151 = vpow2.f32 %v3831_v7 }
0x279f   :  { %v3309_v62 = vpop.f32.mrf.mxu0 }
0x27a0   :  { %4153 = vpow2.f32 %v3832_v12 }
0x27ab   :  { %v4152_v27 = vpop.eup %4151 }
0x27ac   :  { %v3319_v60 = vadd.f32 1.0, %v4152_v27 }
0x27ad   :  { %v4154_v53 = vpop.eup %4153 }
0x27ae   :  { %v3320_v43 = vadd.f32 1.0, %v4154_v53 }
0x27b0   :  { %4155 = vrcp.f32 %v3320_v43 }
0x27b1   :  { %4157 = vrcp.f32 %v3319_v60 }
0x27bd   :  { %v4156_v29 = vpop.eup %4155 }
0x27be   :  { %v3325_v21 = vmul.f32 2.0, %v4156_v29  ;;  %v4158_v40 = vpop.eup %4157 }
0x27bf   :  { %v3327_v28 = vmul.f32 %v4158_v40, %v3245_v58 }
0x27c0   :  { %v3833_v11 = vadd.f32 -1.0, %v3325_v21  ;;  %v5314_v21 = vld [vmem:[%s5387_s13] ss:$0 sm:$0xff] }
0x27c2   :  { %v3328_v17 = vmul.f32 %v4158_v40, %v3833_v11 }
0x27c4   :  { %3330 = vrot.lane.b32.xlu0 %v3328_v17, %s4305_s3 }
0x2836   :  { %v3331_v49 = vpop.permute.xlu0 %3330 }
0x2837   :  { %v3333_v2 = vadd.f32 %v3331_v49, %v3327_v28 }
0x2839   :  { %4159 = vtanh.f32 %v3333_v2 }
0x2846   :  { %v4160_v59 = vpop.eup %4159 }
0x2847   :  { %v5278_v51 = vmul.f32 %v4160_v59, %v4156_v29 }
0x2849   :  { %v3351_v36 = vpack.c.bf16 %v5278_v51, %v5278_v51 }
0x284b   :  { %3353 = vrot.lane.b32.xlu1 %v3351_v36, %s4305_s3 }
0x28bd   :  { %v3354_v33 = vpop.permute.xlu1 %3353 }
0x28be   :  { %3834 = vmatmul.mubr.msk.bf16.vlgmr.msra.gmra.mxu1 %vm431_vm2, %v3354_v33 }
0x28bf   :  { %3543 = vmatpush1.bf16.msra.mxu1 %v5075_v34  ;;  %3566 = vmatprep.mubr.bf16.mxu1 %v4304_v1 }
0x28c0   :  { %3544 = vmatprep.subr.bf16.mxu1 %v5077_v54 }
0x28c3   :  { %3545 = vmatpush1.bf16.msra.mxu1 %v5084_v47 }
0x28c4   :  { %3546 = vmatprep.subr.bf16.mxu1 %v5088_v19 }
0x28c7   :  { %3547 = vmatpush1.bf16.msra.mxu1 %v5094_v30 }
0x28c8   :  { %3548 = vmatprep.subr.bf16.mxu1 %v5096_v3 }
0x28cb   :  { %3549 = vmatpush1.bf16.msra.mxu1 %v5104_v55 }
0x297e   :  { %v3392_v35 = vpop.f32.mrf.mxu1 }
0x297f   :  { %v3399_v46 = vadd.f32 %v3392_v35, %v5181_v22 }
0x2980   :  { %v3394_v6 = vpop.f32.mrf.mxu1 }
0x2981   :  { %v3835_v25 = vmul.f32 -1.442695, %v3399_v46  ;;  %v3400_v34 = vadd.f32 %v3394_v6, %v5183_v52 }
0x2982   :  { %v3396_v1 = vpop.f32.mrf.mxu1 }
0x2983   :  { %v3836_v24 = vmul.f32 -1.442695, %v3400_v34  ;;  %4161 = vpow2.f32 %v3835_v25 }
0x2984   :  { %v3397_v54 = vpop.f32.mrf.mxu1 }
0x2985   :  { %4163 = vpow2.f32 %v3836_v24 }
0x2990   :  { %v4162_v47 = vpop.eup %4161 }
0x2991   :  { %v3407_v30 = vadd.f32 1.0, %v4162_v47 }
0x2992   :  { %v4164_v19 = vpop.eup %4163 }
0x2993   :  { %v3408_v26 = vadd.f32 1.0, %v4164_v19 }
0x2995   :  { %4165 = vrcp.f32 %v3408_v26 }
0x2996   :  { %4167 = vrcp.f32 %v3407_v30 }
0x29a2   :  { %v4166_v3 = vpop.eup %4165 }
0x29a3   :  { %v3413_v55 = vmul.f32 2.0, %v4166_v3  ;;  %v4168_v56 = vpop.eup %4167 }
0x29a4   :  { %v3415_v45 = vmul.f32 %v4168_v56, %v3333_v2 }
0x29a5   :  { %v3837_v57 = vadd.f32 -1.0, %v3413_v55 }
0x29a7   :  { %v3416_v22 = vmul.f32 %v4168_v56, %v3837_v57 }
0x29a9   :  { %3418 = vrot.lane.b32.xlu0 %v3416_v22, %s4305_s3 }
0x2a1b   :  { %v3419_v52 = vpop.permute.xlu0 %3418 }
0x2a1c   :  { %v3421_v44 = vadd.f32 %v3419_v52, %v3415_v45 }
0x2a1e   :  { %4169 = vtanh.f32 %v3421_v44 }
0x2a2b   :  { %v4170_v5 = vpop.eup %4169 }
0x2a2c   :  { %v5295_v50 = vmul.f32 %v4170_v5, %v4166_v3 }
0x2a2e   :  { %v3439_v0 = vpack.c.bf16 %v5295_v50, %v5295_v50 }
0x2a30   :  { %3441 = vrot.lane.b32.xlu1 %v3439_v0, %s4305_s3 }
0x2aa2   :  { %v3442_v20 = vpop.permute.xlu1 %3441 }
0x2aa3   :  { %3838 = vmatmul.mubr.msk.bf16.vlgmr.msra.gmra.mxu0 %vm431_vm2, %v3442_v20 }
0x2b63   :  { %v3480_v9 = vpop.f32.mrf.mxu0 }
0x2b64   :  { %v3487_v42 = vadd.f32 %v3480_v9, %v5177_v37 }
0x2b65   :  { %v3482_v8 = vpop.f32.mrf.mxu0 }
0x2b66   :  { %v3839_v16 = vmul.f32 -1.442695, %v3487_v42  ;;  %v3488_v58 = vadd.f32 %v3482_v8, %v5179_v48 }
0x2b67   :  { %v3484_v31 = vpop.f32.mrf.mxu0 }
0x2b68   :  { %v3840_v13 = vmul.f32 -1.442695, %v3488_v58  ;;  %4171 = vpow2.f32 %v3839_v16 }
0x2b69   :  { %v3485_v14 = vpop.f32.mrf.mxu0 }
0x2b6a   :  { %4173 = vpow2.f32 %v3840_v13  ;;  %v3847_v13 = vld [vmem:[#allocation6] ss:$0 sm:$0xff] }
0x2b75   :  { %v4172_v18 = vpop.eup %4171 }
0x2b76   :  { %v3495_v7 = vadd.f32 1.0, %v4172_v18 }
0x2b77   :  { %v4174_v15 = vpop.eup %4173 }
0x2b78   :  { %v3496_v39 = vadd.f32 1.0, %v4174_v15 }
0x2b7a   :  { %4175 = vrcp.f32 %v3496_v39 }
0x2b7b   :  { %4177 = vrcp.f32 %v3495_v7 }
0x2b87   :  { %v4176_v41 = vpop.eup %4175 }
0x2b88   :  { %v3501_v61 = vmul.f32 2.0, %v4176_v41  ;;  %v4178_v62 = vpop.eup %4177 }
0x2b89   :  { %v3503_v27 = vmul.f32 %v4178_v62, %v3421_v44 }
0x2b8a   :  { %v3841_v12 = vadd.f32 -1.0, %v3501_v61 }
0x2b8c   :  { %v3504_v37 = vmul.f32 %v4178_v62, %v3841_v12 }
0x2b8e   :  { %3506 = vrot.lane.b32.xlu0 %v3504_v37, %s4305_s3 }
0x2c00   :  { %v3507_v48 = vpop.permute.xlu0 %3506 }
0x2c01   :  { %v3509_v53 = vadd.f32 %v3507_v48, %v3503_v27 }
0x2c03   :  { %4179 = vtanh.f32 %v3509_v53 }
0x2c10   :  { %v4180_v43 = vpop.eup %4179 }
0x2c11   :  { %v5304_v60 = vmul.f32 %v4180_v43, %v4176_v41 }
0x2c13   :  { %v3527_v29 = vpack.c.bf16 %v5304_v60, %v5304_v60 }
0x2c15   :  { %3529 = vrot.lane.b32.xlu1 %v3527_v29, %s4305_s3 }
0x2c19   :  { %2989 = vrot.lane.b32.xlu1 %v5209_v63, %s4306_s25 }
0x2c1d   :  { %3622 = vrot.lane.b32.xlu1 %v5314_v21, %s4307_s30 }
0x2c87   :  { %v3530_v11 = vpop.permute.xlu1 %3529 }
0x2c88   :  { %3842 = vmatmul.mubr.msk.bf16.vlgmr.msra.gmra.mxu1 %vm431_vm2, %v3530_v11 }
0x2c8b   :  { %v2990_v40 = vpop.permute.xlu1 %2989 }
0x2c8c   :  { %2992 = vst.msk [vmem:[#allocation3 + $0x38] sm:$0xff] %vm505_vm3, %v2990_v40 }
0x2c8f   :  { %v3623_v17 = vpop.permute.xlu1 %3622 }
0x2c93   :  { %v3610_v28 = vld [vmem:[#allocation3 + $0x38] sm:$0xff] }
0x2c94   :  { %v3625_v49 = vmul.f32 %v3623_v17, %v3610_v28 }
0x2c96   :  { %v3626_v2 = vsel %vm505_vm3, %v3625_v49, 0.0 }
0x2c97   :  { %3627 = vadd.xlane.f32.xlu1 %v3626_v2 }
0x2ca8   :  { %3073 = vrot.lane.b32.xlu1 %v5225_v32, %s4305_s3 }
0x2cac   :  { %3161 = vrot.lane.b32.xlu1 %v5243_v23, %s4305_s3 }
0x2cb0   :  { %3249 = vrot.lane.b32.xlu1 %v5261_v4, %s4305_s3 }
0x2cb4   :  { %3337 = vrot.lane.b32.xlu1 %v5278_v51, %s4305_s3 }
0x2cb8   :  { %3425 = vrot.lane.b32.xlu1 %v5295_v50, %s4305_s3 }
0x2cbc   :  { %3513 = vrot.lane.b32.xlu1 %v5304_v60, %s4305_s3 }
0x2d20   :  { %v5332_v59 = vpop.xlane.xlu1 %3627 }
0x2d24   :  { %v3074_v36 = vpop.permute.xlu1 %3073 }
0x2d25   :  { %3076 = vst.msk [vmem:[#allocation2 + $0x8] sm:$0xff] %vm505_vm3, %v3074_v36 }
0x2d28   :  { %v3162_v33 = vpop.permute.xlu1 %3161 }
0x2d29   :  { %3164 = vst.msk [vmem:[#allocation2 + $0x10] sm:$0xff] %vm505_vm3, %v3162_v33 }
0x2d2c   :  { %v3250_v35 = vpop.permute.xlu1 %3249 }
0x2d2d   :  { %3252 = vst.msk [vmem:[#allocation2 + $0x18] sm:$0xff] %vm505_vm3, %v3250_v35 }
0x2d30   :  { %v3338_v46 = vpop.permute.xlu1 %3337 }
0x2d31   :  { %3340 = vst.msk [vmem:[#allocation2 + $0x20] sm:$0xff] %vm505_vm3, %v3338_v46 }
0x2d34   :  { %v3426_v6 = vpop.permute.xlu1 %3425 }
0x2d35   :  { %3428 = vst.msk [vmem:[#allocation2 + $0x28] sm:$0xff] %vm505_vm3, %v3426_v6 }
0x2d38   :  { %v3514_v25 = vpop.permute.xlu1 %3513 }
0x2d39   :  { %3516 = vst.msk [vmem:[#allocation2 + $0x30] sm:$0xff] %vm505_vm3, %v3514_v25 }
0x2d48   :  { %v3568_v34 = vpop.f32.mrf.mxu1 }
0x2d49   :  { %v3575_v1 = vadd.f32 %v3568_v34, %v5173_v38 }
0x2d4a   :  { %v3570_v24 = vpop.f32.mrf.mxu1 }
0x2d4b   :  { %v3843_v54 = vmul.f32 -1.442695, %v3575_v1  ;;  %v3576_v47 = vadd.f32 %v3570_v24, %v5175_v10 }
0x2d4c   :  { %v3572_v19 = vpop.f32.mrf.mxu1 }
0x2d4d   :  { %v3844_v26 = vmul.f32 -1.442695, %v3576_v47  ;;  %4181 = vpow2.f32 %v3843_v54 }
0x2d4e   :  { %v3573_v30 = vpop.f32.mrf.mxu1 }
0x2d4f   :  { %4183 = vpow2.f32 %v3844_v26 }
0x2d5a   :  { %v4182_v3 = vpop.eup %4181 }
0x2d5b   :  { %v3583_v56 = vadd.f32 1.0, %v4182_v3 }
0x2d5c   :  { %v4184_v55 = vpop.eup %4183 }
0x2d5d   :  { %v3584_v57 = vadd.f32 1.0, %v4184_v55 }
0x2d5f   :  { %4185 = vrcp.f32 %v3584_v57 }
0x2d60   :  { %4187 = vrcp.f32 %v3583_v56 }
0x2d6c   :  { %v4186_v22 = vpop.eup %4185 }
0x2d6d   :  { %v3589_v45 = vmul.f32 2.0, %v4186_v22  ;;  %v4188_v44 = vpop.eup %4187 }
0x2d6e   :  { %v3591_v5 = vmul.f32 %v4188_v44, %v3509_v53 }
0x2d6f   :  { %v3845_v52 = vadd.f32 -1.0, %v3589_v45 }
0x2d71   :  { %v3592_v38 = vmul.f32 %v4188_v44, %v3845_v52 }
0x2d73   :  { %3594 = vrot.lane.b32.xlu0 %v3592_v38, %s4305_s3 }
0x2de5   :  { %v3595_v10 = vpop.permute.xlu0 %3594 }
0x2de6   :  { %v3597_v0 = vadd.f32 %v3595_v10, %v3591_v5 }
0x2de8   :  { %4189 = vtanh.f32 %v3597_v0 }
0x2df5   :  { %v4190_v20 = vpop.eup %4189 }
0x2df6   :  { %v3599_v9 = vmul.f32 %v4190_v20, %v4186_v22 }
0x2df8   :  { %3605 = vrot.lane.b32.xlu1 %v3599_v9, %s4306_s25  ;;  %3601 = vrot.lane.b32.xlu0 %v3599_v9, %s4305_s3 }
0x2dfc   :  { %2985 = vrot.lane.b32.xlu0 %v5209_v63, %s4305_s3 }
0x2e00   :  { %3077 = vrot.lane.b32.xlu0 %v5225_v32, %s4306_s25 }
0x2e04   :  { %3165 = vrot.lane.b32.xlu0 %v5243_v23, %s4306_s25 }
0x2e08   :  { %3253 = vrot.lane.b32.xlu0 %v5261_v4, %s4306_s25 }
0x2e0c   :  { %3341 = vrot.lane.b32.xlu0 %v5278_v51, %s4306_s25 }
0x2e10   :  { %3429 = vrot.lane.b32.xlu0 %v5295_v50, %s4306_s25 }
0x2e6a   :  { %v3606_v42 = vpop.permute.xlu1 %3605  ;;  %v3602_v8 = vpop.permute.xlu0 %3601 }
0x2e6b   :  { %3608 = vst.msk [vmem:[#allocation3] sm:$0xff] %vm505_vm3, %v3606_v42  ;;  %3604 = vst.msk [vmem:[#allocation2 + $0x38] sm:$0xff] %vm505_vm3, %v3602_v8 }
0x2e6e   :  { %v2986_v63 = vpop.permute.xlu0 %2985 }
0x2e6f   :  { %2988 = vst.msk [vmem:[#allocation2] sm:$0xff] %vm505_vm3, %v2986_v63 }
0x2e72   :  { %v3078_v32 = vpop.permute.xlu0 %3077  ;;  %v3609_v23 = vld [vmem:[#allocation2 + $0x38] sm:$0xff] }
0x2e73   :  { %3080 = vst.msk [vmem:[#allocation3 + $0x30] sm:$0xff] %vm505_vm3, %v3078_v32  ;;  %v3618_v4 = vmul.f32 %v5314_v21, %v3609_v23 }
0x2e75   :  { %v3619_v51 = vsel %vm505_vm3, %v3618_v4, 0.0 }
0x2e76   :  { %3620 = vadd.xlane.f32.xlu0 %v3619_v51  ;;  %v3166_v16 = vpop.permute.xlu0 %3165 }
0x2e77   :  { %3168 = vst.msk [vmem:[#allocation3 + $0x28] sm:$0xff] %vm505_vm3, %v3166_v16 }
0x2e7a   :  { %v3254_v50 = vpop.permute.xlu0 %3253 }
0x2e7b   :  { %3256 = vst.msk [vmem:[#allocation3 + $0x20] sm:$0xff] %vm505_vm3, %v3254_v50 }
0x2e7e   :  { %v3342_v58 = vpop.permute.xlu0 %3341 }
0x2e7f   :  { %3344 = vst.msk [vmem:[#allocation3 + $0x18] sm:$0xff] %vm505_vm3, %v3342_v58 }
0x2e82   :  { %v3430_v31 = vpop.permute.xlu0 %3429 }
0x2e83   :  { %3432 = vst.msk [vmem:[#allocation3 + $0x10] sm:$0xff] %vm505_vm3, %v3430_v31 }
0x2e8c   :  { %3517 = vrot.lane.b32.xlu0 %v5304_v60, %s4306_s25 }
0x2eff   :  { %v3621_v14 = vpop.xlane.xlu0 %3620 }
0x2f00   :  { %v3629_v18 = vadd.f32 %v5332_v59, %v3621_v14 }
0x2f02   :  { %v3637_v15 = vadd.f32 %v3847_v13, %v3629_v18 }
0x2f03   :  { %v3518_v39 = vpop.permute.xlu0 %3517 }
0x2f04   :  { %3639 = vst.msk [vmem:[%s5389_s15] sm:$0xff] %vm3638_vm4, %v3637_v15 }
0x2f05   :  { %3520 = vst.msk [vmem:[#allocation3 + $0x8] sm:$0xff] %vm505_vm3, %v3518_v39 }
0x2f06   :  { %3644 = vsyncpa [#allocation8], 1 }
0x2f07   :  { %3645 = vsyncpa [#allocation10], 1 }
0x2f08   :  { %3646 = vsyncpa [#allocation13], 1 }

</bundles_post_ra>
